<compile_context>
chip_gen: v7x
topology: tpu7x:2x2x1
jax: 0.10.0
libtpu: 0.0.40
codegen_flags: <defaults>
</compile_context>

<pallas_src>
from functools import partial

import jax
import jax.numpy as jnp
from jax.experimental import pallas as pl
from jax.experimental.pallas import tpu as pltpu

IN_DIM = 3
IN_PAD = 8      # x / w1 K-dim padded to 8 so layer 1 can use the MXU
HIDDEN = 512
OUT_DIM = 2
OUT_PAD = 128   # lane-dense output width; padded head columns are exactly zero


def _mlp_kernel(x_ref,
                w1_ref, b1_ref,
                w2_ref, b2_ref,
                w3_ref, b3_ref,
                w4_ref, b4_ref,
                o_ref,
                *, layer1_on_mxu):
    # ---- Layer 1 ----
    if layer1_on_mxu:
        # x_ref: [tile_n, 8] f32 (cols 3..7 are zero), w1_ref: [8, 512] bf16.
        h = jnp.dot(x_ref[...].astype(jnp.bfloat16), w1_ref[...],
                    preferred_element_type=jnp.float32)
    else:
        # v5e path: x_ref is [tile_n, 3] f32; a K=3 matmul would waste an MXU pass.
        x = x_ref[...]
        h = (x[:, 0:1] * w1_ref[0:1, :]
             + x[:, 1:2] * w1_ref[1:2, :]
             + x[:, 2:3] * w1_ref[2:3, :])
    # bias + ReLU in f32, then cast to bf16 right away (halves spill traffic).
    h = jnp.maximum(h + b1_ref[...], 0.0).astype(jnp.bfloat16)

    # ---- Layer 2: bf16 operands, f32 accumulation on the MXU ----
    h = jnp.dot(h, w2_ref[...], preferred_element_type=jnp.float32)
    h = jnp.maximum(h + b2_ref[...], 0.0).astype(jnp.bfloat16)

    # ---- Layer 3 ----
    h = jnp.dot(h, w3_ref[...], preferred_element_type=jnp.float32)
    h = jnp.maximum(h + b3_ref[...], 0.0).astype(jnp.bfloat16)

    # ---- Layer 4 (head): padded to OUT_PAD lanes so the store is lane-dense ----
    o_ref[...] = (jnp.dot(h, w4_ref[...], preferred_element_type=jnp.float32)
                  + b4_ref[...]).astype(o_ref.dtype)


def _pick_tile_n(N, tile_n):
    """Cap tile_n at N and keep the grid >= 2 steps when possible (v7x megacore)."""
    tile_n = min(tile_n, N)
    if N // tile_n < 2 and N >= 16 and (N // 2) % 8 == 0:
        tile_n = N // 2
    return tile_n


def checker_mlp(x, params, *, tile_n=1024, layer1_on_mxu=True):
    """x: [N, 3] float32.  params: dict name -> (W [in,out] f32, b [1,out] f32).

    Contract: N must be a multiple of the chosen tile_n (pad the batch with junk
    rows and slice them off afterwards if needed); the kernel does no row masking.
    Set layer1_on_mxu=False on v5e (MXU already binding there; keep layer 1 on VPU).
    """
    N, F = x.shape
    assert F == IN_DIM
    tile_n = _pick_tile_n(N, tile_n)
    assert N % tile_n == 0, "pad batch to a multiple of tile_n"
    assert tile_n % 8 == 0 or tile_n == N

    w1, b1 = params["l1"]
    w2, b2 = params["l2"]
    w3, b3 = params["l3"]
    w4, b4 = params["l4"]

    # Zero-pad the head from OUT_DIM -> OUT_PAD columns (lane-dense output stores).
    w4p = jnp.zeros((HIDDEN, OUT_PAD), jnp.float32).at[:, :OUT_DIM].set(w4)
    b4p = jnp.zeros((1, OUT_PAD), jnp.float32).at[:, :OUT_DIM].set(b4)

    # bf16 weights for the MXU layers (accumulation stays f32 inside the kernel).
    w2b = w2.astype(jnp.bfloat16)
    w3b = w3.astype(jnp.bfloat16)
    w4b = w4p.astype(jnp.bfloat16)

    if layer1_on_mxu:
        # Pad x only to K=8 (full-dim block -> tiny HBM traffic, satisfies the
        # full-array-dim exception to the (8,128) rule). w1 padded to [8, 512].
        x_in = jnp.zeros((N, IN_PAD), jnp.float32).at[:, :IN_DIM].set(x)
        w1_in = jnp.zeros((IN_PAD, HIDDEN), jnp.float32).at[:IN_DIM, :].set(w1)
        w1_in = w1_in.astype(jnp.bfloat16)
        x_block = (tile_n, IN_PAD)
        w1_shape = (IN_PAD, HIDDEN)
    else:
        x_in = x
        w1_in = w1                                   # f32, used on the VPU
        x_block = (tile_n, IN_DIM)
        w1_shape = (IN_DIM, HIDDEN)

    # Weights/biases have constant index_maps -> DMA'd once; single-buffer them
    # so they don't reserve a useless second VMEM buffer.
    def resident(shape):
        return pl.BlockSpec(shape, lambda i: (0, 0), pipeline_mode=pl.Buffered(1))

    weight_bytes = (w1_in.size * w1_in.dtype.itemsize
                    + w2b.size * 2 + w3b.size * 2 + w4b.size * 2
                    + (b1.size + b2.size + b3.size + b4p.size) * 4)
    cost = pl.CostEstimate(
        flops=2 * N * (IN_PAD * HIDDEN + HIDDEN * HIDDEN * 2 + HIDDEN * OUT_PAD),
        transcendentals=0,
        bytes_accessed=N * (x_block[1] * 4 + OUT_PAD * 4) + weight_bytes,
    )

    out = pl.pallas_call(
        partial(_mlp_kernel, layer1_on_mxu=layer1_on_mxu),
        out_shape=jax.ShapeDtypeStruct((N, OUT_PAD), jnp.float32),
        grid_spec=pltpu.PrefetchScalarGridSpec(
            num_scalar_prefetch=0,
            grid=(N // tile_n,),
            in_specs=[
                pl.BlockSpec(x_block, lambda i: (i, 0)),              # x tile
                resident(w1_shape), resident((1, HIDDEN)),            # layer 1
                resident((HIDDEN, HIDDEN)), resident((1, HIDDEN)),    # layer 2
                resident((HIDDEN, HIDDEN)), resident((1, HIDDEN)),    # layer 3
                resident((HIDDEN, OUT_PAD)), resident((1, OUT_PAD)),  # layer 4
            ],
            out_specs=pl.BlockSpec((tile_n, OUT_PAD), lambda i: (i, 0)),
        ),
        compiler_params=pltpu.CompilerParams(
            dimension_semantics=("parallel",),
            vmem_limit_bytes=48 * 1024 * 1024),
        cost_estimate=cost,
    )(x_in, w1_in, b1, w2b, b2, w3b, b3, w4b, b4p)

    return out[:, :OUT_DIM]


def init_params(key):
    """Deterministic init mimicking torch.nn.Linear default (U[-1/sqrt(fan_in), +])."""
    dims = [(IN_DIM, HIDDEN), (HIDDEN, HIDDEN), (HIDDEN, HIDDEN), (HIDDEN, OUT_DIM)]
    params = {}
    for idx, (fan_in, fan_out) in enumerate(dims, start=1):
        key, kw, kb = jax.random.split(key, 3)
        bound = 1.0 / (fan_in ** 0.5)
        w = jax.random.uniform(kw, (fan_in, fan_out), jnp.float32, -bound, bound)
        b = jax.random.uniform(kb, (1, fan_out), jnp.float32, -bound, bound)
        params[f"l{idx}"] = (w, b)
    return params


def reference_mlp_matched(x, params):
    """Same numeric policy as the MXU-layer-1 kernel (bf16 operands, f32 acc, bf16 h)."""
    N = x.shape[0]
    w1, b1 = params["l1"]
    w2, b2 = params["l2"]
    w3, b3 = params["l3"]
    w4, b4 = params["l4"]
    xp = jnp.zeros((N, IN_PAD), jnp.float32).at[:, :IN_DIM].set(x)
    w1p = jnp.zeros((IN_PAD, HIDDEN), jnp.float32).at[:IN_DIM, :].set(w1)
    w4p = jnp.zeros((HIDDEN, OUT_PAD), jnp.float32).at[:, :OUT_DIM].set(w4)
    b4p = jnp.zeros((1, OUT_PAD), jnp.float32).at[:, :OUT_DIM].set(b4)

    h = jnp.dot(xp.astype(jnp.bfloat16), w1p.astype(jnp.bfloat16),
                preferred_element_type=jnp.float32)
    h = jnp.maximum(h + b1, 0.0).astype(jnp.bfloat16)
    h = jnp.dot(h, w2.astype(jnp.bfloat16), preferred_element_type=jnp.float32)
    h = jnp.maximum(h + b2, 0.0).astype(jnp.bfloat16)
    h = jnp.dot(h, w3.astype(jnp.bfloat16), preferred_element_type=jnp.float32)
    h = jnp.maximum(h + b3, 0.0).astype(jnp.bfloat16)
    out = jnp.dot(h, w4p.astype(jnp.bfloat16),
                  preferred_element_type=jnp.float32) + b4p
    return out[:, :OUT_DIM]


def reference_mlp_f32(x, params):
    """Full-precision f32 reference (original module semantics, modulo f64)."""
    h = x
    for name in ("l1", "l2", "l3"):
        w, b = params[name]
        h = jnp.maximum(
            jnp.dot(h, w, precision=jax.lax.Precision.HIGHEST) + b, 0.0)
    w, b = params["l4"]
    return jnp.dot(h, w, precision=jax.lax.Precision.HIGHEST) + b


if __name__ == "__main__":
    key = jax.random.PRNGKey(0)
    k_in, k_p = jax.random.split(key)

    N = 512  # batch of 3-D points; tile picker gives 2 tiles of 256 (both v7x TCs busy)
    x = jax.random.normal(k_in, (N, IN_DIM), jnp.float32)
    params = init_params(k_p)

    out = checker_mlp(x, params)           # default tile_n=1024 -> auto-capped to 256
    out = jax.block_until_ready(out)
    assert out.shape == (N, OUT_DIM)

    # Exact-policy reference (bf16 MXU operands, f32 accumulation, bf16 h): tight check.
    ref_matched = reference_mlp_matched(x, params)
    assert jnp.allclose(out, ref_matched, atol=2e-3, rtol=2e-3), \
        "mismatch vs bf16-matched reference"

    # Full f32 reference: informational only (bf16 operand rounding makes a hard
    # tolerance seed-dependent; the matched check above is the meaningful one).
    ref_f32 = reference_mlp_f32(x, params)
    max_abs = float(jnp.max(jnp.abs(out - ref_f32)))
    print(f"max |kernel - f32 reference| = {max_abs:.3e}")

    print("KERNEL_OK")
</pallas_src>

<mosaic_0001>
module attributes {stable_mosaic.version = 11 : i64} {
  func.func @_mlp_kernel(%arg0: i32, %arg1: memref<256x8xf32, #tpu.memory_space<vmem>>, %arg2: memref<8x512xbf16, #tpu.memory_space<vmem>>, %arg3: memref<1x512xf32, #tpu.memory_space<vmem>>, %arg4: memref<512x512xbf16, #tpu.memory_space<vmem>>, %arg5: memref<1x512xf32, #tpu.memory_space<vmem>>, %arg6: memref<512x512xbf16, #tpu.memory_space<vmem>>, %arg7: memref<1x512xf32, #tpu.memory_space<vmem>>, %arg8: memref<512x128xbf16, #tpu.memory_space<vmem>>, %arg9: memref<1x128xf32, #tpu.memory_space<vmem>>, %arg10: memref<256x128xf32, #tpu.memory_space<vmem>>) attributes {dimension_semantics = [#tpu.dimension_semantics<parallel>], iteration_bounds = array<i64: 2>, scalar_prefetch = 0 : i64, scratch_operands = 0 : i64, tpu.core_type = #tpu.core_type<tc>, window_params = [{transform_indices = @transform_0, window_bounds = array<i64: 256, 8>}, {pipeline_mode = #tpu.pipeline_mode<synchronous>, transform_indices = @transform_1, window_bounds = array<i64: 8, 512>}, {pipeline_mode = #tpu.pipeline_mode<synchronous>, transform_indices = @transform_2, window_bounds = array<i64: 1, 512>}, {pipeline_mode = #tpu.pipeline_mode<synchronous>, transform_indices = @transform_3, window_bounds = array<i64: 512, 512>}, {pipeline_mode = #tpu.pipeline_mode<synchronous>, transform_indices = @transform_4, window_bounds = array<i64: 1, 512>}, {pipeline_mode = #tpu.pipeline_mode<synchronous>, transform_indices = @transform_5, window_bounds = array<i64: 512, 512>}, {pipeline_mode = #tpu.pipeline_mode<synchronous>, transform_indices = @transform_6, window_bounds = array<i64: 1, 512>}, {pipeline_mode = #tpu.pipeline_mode<synchronous>, transform_indices = @transform_7, window_bounds = array<i64: 512, 128>}, {pipeline_mode = #tpu.pipeline_mode<synchronous>, transform_indices = @transform_8, window_bounds = array<i64: 1, 128>}, {transform_indices = @transform_9, window_bounds = array<i64: 256, 128>}]} {
    %c0 = arith.constant 0 : index
    %c0_0 = arith.constant 0 : index
    %0 = vector.load %arg1[%c0, %c0_0] : memref<256x8xf32, #tpu.memory_space<vmem>>, vector<256x8xf32>
    %1 = arith.truncf %0 : vector<256x8xf32> to vector<256x8xbf16>
    %c0_1 = arith.constant 0 : index
    %c0_2 = arith.constant 0 : index
    %2 = vector.load %arg2[%c0_1, %c0_2] : memref<8x512xbf16, #tpu.memory_space<vmem>>, vector<8x512xbf16>
    %cst = arith.constant dense<0.000000e+00> : vector<256x512xf32>
    %3 = tpu.matmul %1, %2, %cst {dimension_numbers = #tpu.dot_dimension_numbers<[1], [0], [0], [1], [0, 0, 1, 1], [], []>} : vector<256x8xbf16>, vector<8x512xbf16>, vector<256x512xf32> -> vector<256x512xf32>
    %c0_3 = arith.constant 0 : index
    %c0_4 = arith.constant 0 : index
    %4 = vector.load %arg3[%c0_3, %c0_4] : memref<1x512xf32, #tpu.memory_space<vmem>>, vector<1x512xf32>
    %5 = vector.broadcast %4 : vector<1x512xf32> to vector<256x512xf32>
    %6 = arith.addf %3, %5 : vector<256x512xf32>
    %cst_5 = arith.constant 0.000000e+00 : f32
    %7 = vector.broadcast %cst_5 : f32 to vector<256x512xf32>
    %8 = arith.maximumf %6, %7 : vector<256x512xf32>
    %9 = arith.truncf %8 : vector<256x512xf32> to vector<256x512xbf16>
    %c0_6 = arith.constant 0 : index
    %c0_7 = arith.constant 0 : index
    %10 = vector.load %arg4[%c0_6, %c0_7] : memref<512x512xbf16, #tpu.memory_space<vmem>>, vector<512x512xbf16>
    %cst_8 = arith.constant dense<0.000000e+00> : vector<256x512xf32>
    %11 = tpu.matmul %9, %10, %cst_8 {dimension_numbers = #tpu.dot_dimension_numbers<[1], [0], [0], [1], [0, 0, 1, 1], [], []>} : vector<256x512xbf16>, vector<512x512xbf16>, vector<256x512xf32> -> vector<256x512xf32>
    %c0_9 = arith.constant 0 : index
    %c0_10 = arith.constant 0 : index
    %12 = vector.load %arg5[%c0_9, %c0_10] : memref<1x512xf32, #tpu.memory_space<vmem>>, vector<1x512xf32>
    %13 = vector.broadcast %12 : vector<1x512xf32> to vector<256x512xf32>
    %14 = arith.addf %11, %13 : vector<256x512xf32>
    %cst_11 = arith.constant 0.000000e+00 : f32
    %15 = vector.broadcast %cst_11 : f32 to vector<256x512xf32>
    %16 = arith.maximumf %14, %15 : vector<256x512xf32>
    %17 = arith.truncf %16 : vector<256x512xf32> to vector<256x512xbf16>
    %c0_12 = arith.constant 0 : index
    %c0_13 = arith.constant 0 : index
    %18 = vector.load %arg6[%c0_12, %c0_13] : memref<512x512xbf16, #tpu.memory_space<vmem>>, vector<512x512xbf16>
    %cst_14 = arith.constant dense<0.000000e+00> : vector<256x512xf32>
    %19 = tpu.matmul %17, %18, %cst_14 {dimension_numbers = #tpu.dot_dimension_numbers<[1], [0], [0], [1], [0, 0, 1, 1], [], []>} : vector<256x512xbf16>, vector<512x512xbf16>, vector<256x512xf32> -> vector<256x512xf32>
    %c0_15 = arith.constant 0 : index
    %c0_16 = arith.constant 0 : index
    %20 = vector.load %arg7[%c0_15, %c0_16] : memref<1x512xf32, #tpu.memory_space<vmem>>, vector<1x512xf32>
    %21 = vector.broadcast %20 : vector<1x512xf32> to vector<256x512xf32>
    %22 = arith.addf %19, %21 : vector<256x512xf32>
    %cst_17 = arith.constant 0.000000e+00 : f32
    %23 = vector.broadcast %cst_17 : f32 to vector<256x512xf32>
    %24 = arith.maximumf %22, %23 : vector<256x512xf32>
    %25 = arith.truncf %24 : vector<256x512xf32> to vector<256x512xbf16>
    %c0_18 = arith.constant 0 : index
    %c0_19 = arith.constant 0 : index
    %26 = vector.load %arg8[%c0_18, %c0_19] : memref<512x128xbf16, #tpu.memory_space<vmem>>, vector<512x128xbf16>
    %cst_20 = arith.constant dense<0.000000e+00> : vector<256x128xf32>
    %27 = tpu.matmul %25, %26, %cst_20 {dimension_numbers = #tpu.dot_dimension_numbers<[1], [0], [0], [1], [0, 0, 1, 1], [], []>} : vector<256x512xbf16>, vector<512x128xbf16>, vector<256x128xf32> -> vector<256x128xf32>
    %c0_21 = arith.constant 0 : index
    %c0_22 = arith.constant 0 : index
    %28 = vector.load %arg9[%c0_21, %c0_22] : memref<1x128xf32, #tpu.memory_space<vmem>>, vector<1x128xf32>
    %29 = vector.broadcast %28 : vector<1x128xf32> to vector<256x128xf32>
    %30 = arith.addf %27, %29 : vector<256x128xf32>
    %c0_23 = arith.constant 0 : index
    %c0_24 = arith.constant 0 : index
    %31 = vector.load %arg10[%c0_23, %c0_24] : memref<256x128xf32, #tpu.memory_space<vmem>>, vector<256x128xf32>
    tpu.vector_store %arg10[%c0_23, %c0_24], %30 {strides = array<i32>} : memref<256x128xf32, #tpu.memory_space<vmem>>, vector<256x128xf32>,
    return
  }
  func.func @transform_0(%arg0: i32) -> (i32, i32) {
    %c0_i32 = arith.constant 0 : i32
    %c0_i32_0 = arith.constant 0 : i32
    return %arg0, %c0_i32 : i32, i32
  }
  func.func @transform_1(%arg0: i32) -> (i32, i32) {
    %c0_i32 = arith.constant 0 : i32
    %c0_i32_0 = arith.constant 0 : i32
    %c0_i32_1 = arith.constant 0 : i32
    return %c0_i32, %c0_i32_0 : i32, i32
  }
  func.func @transform_2(%arg0: i32) -> (i32, i32) {
    %c0_i32 = arith.constant 0 : i32
    %c0_i32_0 = arith.constant 0 : i32
    %c0_i32_1 = arith.constant 0 : i32
    return %c0_i32, %c0_i32_0 : i32, i32
  }
  func.func @transform_3(%arg0: i32) -> (i32, i32) {
    %c0_i32 = arith.constant 0 : i32
    %c0_i32_0 = arith.constant 0 : i32
    %c0_i32_1 = arith.constant 0 : i32
    return %c0_i32, %c0_i32_0 : i32, i32
  }
  func.func @transform_4(%arg0: i32) -> (i32, i32) {
    %c0_i32 = arith.constant 0 : i32
    %c0_i32_0 = arith.constant 0 : i32
    %c0_i32_1 = arith.constant 0 : i32
    return %c0_i32, %c0_i32_0 : i32, i32
  }
  func.func @transform_5(%arg0: i32) -> (i32, i32) {
    %c0_i32 = arith.constant 0 : i32
    %c0_i32_0 = arith.constant 0 : i32
    %c0_i32_1 = arith.constant 0 : i32
    return %c0_i32, %c0_i32_0 : i32, i32
  }
  func.func @transform_6(%arg0: i32) -> (i32, i32) {
    %c0_i32 = arith.constant 0 : i32
    %c0_i32_0 = arith.constant 0 : i32
    %c0_i32_1 = arith.constant 0 : i32
    return %c0_i32, %c0_i32_0 : i32, i32
  }
  func.func @transform_7(%arg0: i32) -> (i32, i32) {
    %c0_i32 = arith.constant 0 : i32
    %c0_i32_0 = arith.constant 0 : i32
    %c0_i32_1 = arith.constant 0 : i32
    return %c0_i32, %c0_i32_0 : i32, i32
  }
  func.func @transform_8(%arg0: i32) -> (i32, i32) {
    %c0_i32 = arith.constant 0 : i32
    %c0_i32_0 = arith.constant 0 : i32
    %c0_i32_1 = arith.constant 0 : i32
    return %c0_i32, %c0_i32_0 : i32, i32
  }
  func.func @transform_9(%arg0: i32) -> (i32, i32) {
    %c0_i32 = arith.constant 0 : i32
    %c0_i32_0 = arith.constant 0 : i32
    return %arg0, %c0_i32 : i32, i32
  }
}

</mosaic_0001>

<bundles_post_ra>
// kernel: tpu_custom_call.1
= control target key start
LH: loop header
LB: loop body
LE: loop exit
PB: predicated region body
PF: predicated region fallthrough
CT: control target
= control target key end

     0   :  { %14 = vsyncpa [#allocation3], 0  ;;  %s8208_s0 = inlined_call_operand.vmem [shape: f32[512,8], index: 0, kind: input, shape index: {}]   ;;  %s8209_s1 = inlined_call_operand.vmem [shape: bf16[8,512], index: 1, kind: input, shape index: {}]   ;;  %s8210_s2 = inlined_call_operand.vmem [shape: f32[1,512], index: 2, kind: input, shape index: {}]   ;;  %s8211_s3 = inlined_call_operand.hbm [shape: bf16[512,512], index: 3, kind: input, shape index: {}]   ;;  %s8212_s4 = inlined_call_operand.vmem [shape: f32[1,512], index: 4, kind: input, shape index: {}]   ;;  %s8213_s5 = inlined_call_operand.hbm [shape: bf16[512,512], index: 5, kind: input, shape index: {}]   ;;  %s8214_s6 = inlined_call_operand.vmem [shape: f32[1,512], index: 6, kind: input, shape index: {}]   ;;  %s8215_s7 = inlined_call_operand.vmem [shape: bf16[512,128], index: 7, kind: input, shape index: {}]   ;;  %s8216_s8 = inlined_call_operand.vmem [shape: f32[1,128], index: 8, kind: input, shape index: {}]   ;;  %s8217_s9 = inlined_call_operand.hbm [shape: f32[512,128], index: 9, kind: output, shape index: {}]  }
   0x1   :  { %15 = vsyncpa [#allocation6], 0 }
   0x2   :  { %16 = vsyncpa [#allocation4], 0 }
   0x3   :  { %18 = vsyncpa [#allocation4 + $0x1], 0  ;;  %s7061_s30 = smov 0   ;;  %s7063_s10 = smov 0  }
   0x4   :  { %s7065_s11 = smov 0   ;;  %s7067_s12 = smov 0  }
   0x5 LB: > { %8224 = sst [smem:[#allocation11_spill]] %s6997_s11  ;;  %s7082_s13 = sadd.s32 4294967295, %s7001_s12   ;;  %s7001_s12 = sphi %s7067_s12, %s8238_s12   ;;  %s6997_s11 = sphi %s7065_s11, %s8240_s11   ;;  %s6993_s10 = sphi %s7063_s10, %s8242_s10   ;;  %s6989_s30 = sphi %s7061_s30, %s8241_s30  }
   0x6   : > { %s5310_s14 = sadd.s32 4294967294, %s7001_s12   ;;  %s7086_s15 = sadd.s32 1, %s7001_s12  }
   0x7   : > { %8225 = sst [smem:[#allocation12_spill]] %s7086_s15  ;;  %s225_s16 = sadd.s32 1, %s6997_s11 }
   0x8   : > { %s222_s17 = ssub.s32 %s7001_s12, %s7086_s15  ;;  %p235_p0 = scmp.ne.s32.totalorder %s6997_s11, %s6993_s10 }
   0x9   : > { %p223_p1 = scmp.eq.s32.totalorder %s222_s17, 0  ;;  %p236_p2 = scmp.eq.s32.totalorder %s7082_s13, 1 }
   0xa   : > { %p241_p3 = scmp.ne.s32.totalorder %s6993_s10, %s6989_s30  ;;  %p242_p4 = scmp.eq.s32.totalorder %s5310_s14, 1 }
   0xb   : > { %s7097_s18 = scalar_select %p223_p1, %s6997_s11, %s225_s16  }
   0xc   : > { %p7099_p5 = por %p236_p2, %p235_p0  ;;  %p7103_p6 = por %p242_p4, %p241_p3 }
   0xd   : > { %8226 = sst [smem:[#allocation13_spill]] %s7097_s18  ;;  %p5311_p7 = scmp.ge.s32.totalorder %s7001_s12, 1 }
   0xe   : > { %s8227_s19 = scalar_select %p7099_p5, 1, 0 }
   0xf   : > { %s8228_s20 = scalar_select %p7103_p6, 1, 0 }
  0x10   : > { %p249_p8 = scmp.lt.s32.totalorder %s7001_s12, 3  ;;  %p8218_p9 = scmp.eq.s32.totalorder %s7082_s13, 0 }
  0x11   : > { %s7003_s22 = smov [#allocation2]   ;;  %s7004_s25 = smov [#allocation5]  }
  0x12   : > { %p7110_p10 = pnand %p5311_p7, %p249_p8  ;;  %s267_s23 = sshll.u32 %s7003_s22, 4  ;;  %s268_s23 = int_to_ptr.vmem [resolvable:$true] %s267_s23 }
  0x13   : > { %s283_s26 = sshll.u32 %s7004_s25, 4  ;;  %s6875_s29 = scalar_lea.hbm %s8211_s3, 16384  ;;  %s7122_s26 = int_to_ptr.vmem [resolvable:$true] %s283_s26 }
  0x14   : > { %s8229_s21 = scalar_select %p7110_p10, 1, 0 }
  0x15   : > { %p6400_p11 = pneg %p7110_p10  ;;  %p6876_p13 = scmp.ne.s32.totalorder %s8211_s3, %s6875_s29 }
  0x16   : > { %p6882_p3 = scmp.lt.u32.totalorder %s6875_s29, %s8211_s3 }
  0x17   : > { %p7118_p12 = pnand %p8218_p9, %p6400_p11 }
  0x19   : > { %p6877_p0 = pneg %p7118_p12 }
  0x1b   : > { %p6878_p1 = pnand %p6877_p0, %p6876_p13 }
  0x1d   : > { %p6879_p2 = pneg %p6878_p1 }
  0x1f   : > { %p6884_p4 = pnand %p6882_p3, %p6879_p2 }
  0x21   : > { %6887 = shalt.err (!%p6884_p4)
}
  0x22   : > { %s6888_s25 = scalar_lea.vmem %s268_s23, 16384  ;;  %p6896_p9 = scmp.lt.s32.totalorder %s268_s23, %s268_s23 }
  0x23   : > { %p6889_p7 = scmp.ne.s32.totalorder %s268_s23, %s6888_s25  ;;  %p6897_p6 = scmp.lt.s32.totalorder %s6888_s25, %s6888_s25 }
  0x25   : > { %p6891_p8 = pnand %p6889_p7, %p6877_p0  ;;  %p6898_p5 = por %p6897_p6, %p6896_p9 }
  0x27   : > { %p6892_p11 = pneg %p6891_p8 }
  0x29   : > { %p6899_p10 = pnand %p6898_p5, %p6892_p11 }
  0x2b   : > { %6902 = shalt.err (!%p6899_p10)
}
  0x2c   : > { %s7005_s27 = smov 256   ;;  %s7006_s28 = smov 16  }
  0x2d   : > { %6403 = dma.hbm_to_vmem [thread:$0]  (!%p7118_p12), %s8211_s3, 16384, %s268_s23, [#allocation3], %s7005_s27, %s7005_s27, %s7006_s28  }
  0x2e   : > { %s6903_s22 = scalar_lea.hbm %s8213_s5, 16384 }
  0x2f   : > { %p6904_p13 = scmp.ne.s32.totalorder %s8213_s5, %s6903_s22  ;;  %p6910_p9 = scmp.lt.u32.totalorder %s6903_s22, %s8213_s5 }
  0x31   : > { %p6906_p5 = pnand %p6904_p13, %p6877_p0 }
  0x33   : > { %p6907_p6 = pneg %p6906_p5 }
  0x35   : > { %p6912_p10 = pnand %p6910_p9, %p6907_p6 }
  0x37   : > { %6915 = shalt.err (!%p6912_p10)
}
  0x38   : > { %s6916_s23 = scalar_lea.vmem %s7122_s26, 16384  ;;  %p6924_p4 = scmp.lt.s32.totalorder %s7122_s26, %s7122_s26 }
  0x39   : > { %p6917_p1 = scmp.ne.s32.totalorder %s7122_s26, %s6916_s23  ;;  %p6925_p7 = scmp.lt.s32.totalorder %s6916_s23, %s6916_s23 }
  0x3b   : > { %p6919_p2 = pnand %p6917_p1, %p6877_p0  ;;  %p6926_p8 = por %p6925_p7, %p6924_p4 }
  0x3d   : > { %p6920_p3 = pneg %p6919_p2 }
  0x3f   : > { %p6927_p11 = pnand %p6926_p8, %p6920_p3 }
  0x41   : > { %6930 = shalt.err (!%p6927_p11)
}
  0x42   : > { %6406 = dma.hbm_to_vmem [thread:$0]  (!%p7118_p12), %s8213_s5, 16384, %s7122_s26, [#allocation6], %s7005_s27, %s7005_s27, %s7006_s28  }
  0x43   : > { %p8231_p13 = scmp.ne.s32.totalorder %s8229_s21, 0 }
  0x44   : > { %p8232_p5 = scmp.eq.s32.totalorder (!%p8231_p13), %s7082_s13, 0 }
  0x45   : > { %317 = sbr.rel (%p8231_p13) target bundleno = 1368 (0x558), region = 56 }
  0x4c   : > { %6976 = dma.done.wait (%p8232_p5), [#allocation3], 16384   ;;  %p8233_p0 = pmov %p8232_p5 }
  0x4e   : > { %6978 = vsyncadd (%p8233_p0), [#allocation3], 4294950912  ;;  %p8234_p6 = pmov %p8233_p0 }
  0x4f   : > { %p8235_p9 = pmov %p8233_p0 }
  0x50   : > { %6980 = dma.done.wait (%p8234_p6), [#allocation6], 16384  }
  0x51   : > { %6982 = vsyncadd (%p8235_p9), [#allocation6], 4294950912  ;;  %s5319_s18 = sshll.u32 %s7082_s13, 5  ;;  %v7007_v0 = vmov 0   ;;  %v413_v1 = vld [vmem:[%s8209_s1] sm:$0xff]  ;;  %vm496_vm0 = vcmask 1043456  }
  0x52   : > { %541 = vmatprep.mubr.bf16.mxu0 %v7007_v0  ;;  %p358_p12 = scmp.lt.s32.totalorder %s5319_s18, 63  ;;  %734 = vmatprep.mubr.bf16.mxu1 %v7007_v0  ;;  %v5322_v4 = vcombine.high %v413_v1, %v413_v1  ;;  %v5321_v5 = vcombine.low %v413_v1, %v413_v1  ;;  %vm447_vm1 = vcmask 64512   ;;  %v414_v10 = vld [vmem:[%s8209_s1 + $0x8] sm:$0xff]  ;;  %v6459_v13 = vld [vmem:[#allocation2] ss:$16 sps:$4 sm:$0xff]   ;;  %s5653_s17 = sshll.u32 %s7082_s13, 12 }
  0x53   : > { %v5324_v11 = vcombine.high %v414_v10, %v414_v10  ;;  %v5323_v12 = vcombine.low %v414_v10, %v414_v10  ;;  %v6461_v14 = vld [vmem:[#allocation2 + $0x4] ss:$16 sps:$4 sm:$0xff]   ;;  %v6462_v18 = vld [vmem:[#allocation2 + $0x20] ss:$16 sps:$4 sm:$0xff]   ;;  %v6486_v29 = vld [vmem:[#allocation2 + $0x8] ss:$16 sps:$4 sm:$0xff]   ;;  %s8159_s11 = scalar_lea.hbm %s8217_s9, %s5653_s17 }
  0x54   : > { %s8244_s18 = smov (!%p358_p12, %s5319_s18), 63  ;;  %5325 = vmatprep.subr.msk.bf16.mxu0 %vm496_vm0, %v5322_v4  ;;  %v498_v6 = vsel %vm496_vm0, %v5321_v5, 0  ;;  %v6464_v17 = vld [vmem:[#allocation2 + $0x24] ss:$16 sps:$4 sm:$0xff]   ;;  %v6465_v22 = vld [vmem:[#allocation2 + $0x40] ss:$16 sps:$4 sm:$0xff]  }
  0x55   : > { %s5320_s21 = sshll.u32 %s8244_s18, 3  ;;  %510 = vmatpush1.bf16.msra.mxu0 %v498_v6  ;;  %5342 = vmatprep.subr.msk.bf16.mxu1 %vm496_vm0, %v5324_v11  ;;  %v504_v16 = vsel %vm496_vm0, %v5323_v12, 0  ;;  %v6467_v19 = vld [vmem:[#allocation2 + $0x44] ss:$16 sps:$4 sm:$0xff]   ;;  %v6468_v25 = vld [vmem:[#allocation2 + $0x60] ss:$16 sps:$4 sm:$0xff]  }
  0x56   : > { %s7187_s27 = scalar_lea.vmem %s8208_s0, %s5320_s21  ;;  %1877 = vmatprep.subr.bf16.mxu0 %v6461_v14  ;;  %703 = vmatpush1.bf16.msra.mxu1 %v504_v16  ;;  %v6470_v23 = vld [vmem:[#allocation2 + $0x64] ss:$16 sps:$4 sm:$0xff]   ;;  %v6488_v30 = vld [vmem:[#allocation2 + $0xc] ss:$16 sps:$4 sm:$0xff]   ;;  %v6471_v31 = vld [vmem:[#allocation2 + $0x80] ss:$16 sps:$4 sm:$0xff]  }
  0x57   : > { %v365_v2 = vld [vmem:[%s7187_s27] sm:$0xff]  ;;  %v366_v3 = vld [vmem:[%s7187_s27 + $0x8] sm:$0xff]  ;;  %v367_v8 = vld [vmem:[%s7187_s27 + $0x10] sm:$0xff]  ;;  %2263 = vmatprep.subr.bf16.mxu1 %v6488_v30  ;;  %p8236_p1 = scmp.ne.s32.totalorder %s8227_s19, 0  ;;  %s7008_s18 = smov [#allocation7]  }
  0x58   : > { %v397_v7 = vpack.c.bf16 %v366_v3, %v365_v2  ;;  %v368_v9 = vld [vmem:[%s7187_s27 + $0x18] sm:$0xff]  ;;  %v369_v20 = vld [vmem:[%s7187_s27 + $0x20] sm:$0xff]  ;;  %v370_v21 = vld [vmem:[%s7187_s27 + $0x28] sm:$0xff]  ;;  %s6935_s21 = sshll.u32 %s7008_s18, 4  ;;  %s6936_s21 = int_to_ptr.vmem [resolvable:$false] %s6935_s21 }
  0x59   : > { %v398_v15 = vpack.c.bf16 %v368_v9, %v367_v8  ;;  %v399_v24 = vpack.c.bf16 %v370_v21, %v369_v20  ;;  %v371_v26 = vld [vmem:[%s7187_s27 + $0x30] sm:$0xff]  ;;  %v372_v28 = vld [vmem:[%s7187_s27 + $0x38] sm:$0xff]  ;;  %v373_v39 = vld [vmem:[%s7187_s27 + $0x40] sm:$0xff]  ;;  %s6937_s24 = scalar_lea.vmem %s6936_s21, 8192 }
  0x5a   : > { %5326 = vmatmul.mubr.msk.bf16.vlgmr.msra.gmra.mrb[0].mxu0 %vm447_vm1, %v397_v7  ;;  %5343 = vmatmul.mubr.msk.bf16.vlgmr.msra.gmra.mrb[0].mxu1 %vm447_vm1, %v397_v7  ;;  %v6473_v27 = vld [vmem:[#allocation2 + $0x84] ss:$16 sps:$4 sm:$0xff]   ;;  %v6491_v32 = vld [vmem:[#allocation2 + $0x2c] ss:$16 sps:$4 sm:$0xff]   ;;  %v400_v34 = vpack.c.bf16 %v372_v28, %v371_v26  ;;  %v6474_v35 = vld [vmem:[#allocation2 + $0xa0] ss:$16 sps:$4 sm:$0xff]  }
  0x5b   : > { %551 = vmatprep.mubr.bf16.mxu0 %v7007_v0  ;;  %1878 = vmatpush1.bf16.msra.mxu0 %v6459_v13  ;;  %v6476_v33 = vld [vmem:[#allocation2 + $0xa4] ss:$16 sps:$4 sm:$0xff]   ;;  %v6489_v37 = vld [vmem:[#allocation2 + $0x28] ss:$16 sps:$4 sm:$0xff]   ;;  %v6497_v38 = vld [vmem:[#allocation2 + $0x4c] ss:$16 sps:$4 sm:$0xff]  }
  0x5c   : > { %1879 = vmatprep.subr.bf16.mxu0 %v6464_v17  ;;  %744 = vmatprep.mubr.bf16.mxu1 %v7007_v0  ;;  %v6479_v36 = vld [vmem:[#allocation2 + $0xc4] ss:$16 sps:$4 sm:$0xff]   ;;  %v374_v40 = vld [vmem:[%s7187_s27 + $0x48] sm:$0xff]  ;;  %v6477_v41 = vld [vmem:[#allocation2 + $0xc0] ss:$16 sps:$4 sm:$0xff]  }
  0x5d   : > { %2264 = vmatpush1.bf16.msra.mxu1 %v6486_v29  ;;  %v6482_v42 = vld [vmem:[#allocation2 + $0xe4] ss:$16 sps:$4 sm:$0xff]   ;;  %v6495_v43 = vld [vmem:[#allocation2 + $0x48] ss:$16 sps:$4 sm:$0xff]   ;;  %v6500_v44 = vld [vmem:[#allocation2 + $0x6c] ss:$16 sps:$4 sm:$0xff]   ;;  %v401_v45 = vpack.c.bf16 %v374_v40, %v373_v39 }
  0x5e   : > { %2265 = vmatprep.subr.bf16.mxu1 %v6491_v32  ;;  %v6480_v46 = vld [vmem:[#allocation2 + $0xe0] ss:$16 sps:$4 sm:$0xff]   ;;  %v6485_v47 = vld [vmem:[#allocation2 + $0x104] ss:$16 sps:$4 sm:$0xff]   ;;  %v6498_v48 = vld [vmem:[#allocation2 + $0x68] ss:$16 sps:$4 sm:$0xff]  }
  0x5f   : > { %1880 = vmatpush1.bf16.msra.mxu0 %v6462_v18  ;;  %v6506_v49 = vld [vmem:[#allocation2 + $0x8c] ss:$16 sps:$4 sm:$0xff]   ;;  %v375_v50 = vld [vmem:[%s7187_s27 + $0x50] sm:$0xff]  ;;  %v6504_v54 = vld [vmem:[#allocation2 + $0x88] ss:$16 sps:$4 sm:$0xff]  }
  0x60   : > { %1881 = vmatprep.subr.bf16.mxu0 %v6467_v19  ;;  %v376_v51 = vld [vmem:[%s7187_s27 + $0x58] sm:$0xff]  ;;  %v6483_v52 = vld [vmem:[#allocation2 + $0x100] ss:$16 sps:$4 sm:$0xff]   ;;  %v6494_v53 = vld [vmem:[#allocation2 + $0x124] ss:$16 sps:$4 sm:$0xff]  }
  0x61   : > { %2266 = vmatpush1.bf16.msra.mxu1 %v6489_v37  ;;  %v6509_v55 = vld [vmem:[#allocation2 + $0xac] ss:$16 sps:$4 sm:$0xff]   ;;  %v402_v56 = vpack.c.bf16 %v376_v51, %v375_v50  ;;  %v6492_v57 = vld [vmem:[#allocation2 + $0x120] ss:$16 sps:$4 sm:$0xff]   ;;  %v6503_v58 = vld [vmem:[#allocation2 + $0x144] ss:$16 sps:$4 sm:$0xff]  }
  0x62   : > { %5327 = vmatmul.mubr.msk.bf16.gmra.mrb[4].mxu0 %vm447_vm1, %v398_v15  ;;  %5344 = vmatmul.mubr.msk.bf16.gmra.mrb[4].mxu1 %vm447_vm1, %v398_v15  ;;  %v6507_v59 = vld [vmem:[#allocation2 + $0xa8] ss:$16 sps:$4 sm:$0xff]   ;;  %v6515_v60 = vld [vmem:[#allocation2 + $0xcc] ss:$16 sps:$4 sm:$0xff]   ;;  %v377_v61 = vld [vmem:[%s7187_s27 + $0x60] sm:$0xff] }
  0x63   : > { %561 = vmatprep.mubr.bf16.mxu0 %v7007_v0  ;;  %1882 = vmatpush1.bf16.msra.mxu0 %v6465_v22  ;;  %v378_v62 = vld [vmem:[%s7187_s27 + $0x68] sm:$0xff]  ;;  %v6501_v63 = vld [vmem:[#allocation2 + $0x140] ss:$16 sps:$4 sm:$0xff]   ;;  %v6512_v1 = vld [vmem:[#allocation2 + $0x164] ss:$16 sps:$4 sm:$0xff]  }
  0x64   : > { %1883 = vmatprep.subr.bf16.mxu0 %v6470_v23  ;;  %754 = vmatprep.mubr.bf16.mxu1 %v7007_v0  ;;  %v6513_v2 = vld [vmem:[#allocation2 + $0xc8] ss:$16 sps:$4 sm:$0xff]   ;;  %v6518_v3 = vld [vmem:[#allocation2 + $0xec] ss:$16 sps:$4 sm:$0xff]   ;;  %v403_v4 = vpack.c.bf16 %v378_v62, %v377_v61  ;;  %v6510_v5 = vld [vmem:[#allocation2 + $0x160] ss:$16 sps:$4 sm:$0xff]  }
  0x65   : > { %2267 = vmatprep.subr.bf16.mxu1 %v6497_v38  ;;  %v6516_v6 = vld [vmem:[#allocation2 + $0xe8] ss:$16 sps:$4 sm:$0xff]   ;;  %v6521_v7 = vld [vmem:[#allocation2 + $0x184] ss:$16 sps:$4 sm:$0xff]   ;;  %v6524_v8 = vld [vmem:[#allocation2 + $0x10c] ss:$16 sps:$4 sm:$0xff]  }
  0x66   : > { %2268 = vmatpush1.bf16.msra.mxu1 %v6495_v43  ;;  %v379_v9 = vld [vmem:[%s7187_s27 + $0x70] sm:$0xff]  ;;  %v380_v10 = vld [vmem:[%s7187_s27 + $0x78] sm:$0xff]  ;;  %v381_v20 = vld [vmem:[%s7187_s27 + $0x80] sm:$0xff] }
  0x67   : > { %1884 = vmatpush1.bf16.msra.mxu0 %v6468_v25  ;;  %2269 = vmatprep.subr.bf16.mxu1 %v6500_v44  ;;  %v6519_v11 = vld [vmem:[#allocation2 + $0x180] ss:$16 sps:$4 sm:$0xff]   ;;  %v6522_v12 = vld [vmem:[#allocation2 + $0x108] ss:$16 sps:$4 sm:$0xff]   ;;  %v6527_v13 = vld [vmem:[#allocation2 + $0x12c] ss:$16 sps:$4 sm:$0xff]   ;;  %v404_v15 = vpack.c.bf16 %v380_v10, %v379_v9 }
  0x68   : > { %1885 = vmatprep.subr.bf16.mxu0 %v6473_v27  ;;  %v6530_v14 = vld [vmem:[#allocation2 + $0x1a4] ss:$16 sps:$4 sm:$0xff]   ;;  %v6525_v16 = vld [vmem:[#allocation2 + $0x128] ss:$16 sps:$4 sm:$0xff]   ;;  %v6528_v17 = vld [vmem:[#allocation2 + $0x1a0] ss:$16 sps:$4 sm:$0xff]  }
  0x69   : > { %v6533_v18 = vld [vmem:[#allocation2 + $0x14c] ss:$16 sps:$4 sm:$0xff]   ;;  %v6539_v19 = vld [vmem:[#allocation2 + $0x1c4] ss:$16 sps:$4 sm:$0xff]   ;;  %v6531_v22 = vld [vmem:[#allocation2 + $0x148] ss:$16 sps:$4 sm:$0xff]  }
  0x6a   : > { %5328 = vmatmul.mubr.msk.bf16.gmra.mrb[8].mxu0 %vm447_vm1, %v399_v24  ;;  %5345 = vmatmul.mubr.msk.bf16.gmra.mrb[8].mxu1 %vm447_vm1, %v399_v24  ;;  %v382_v21 = vld [vmem:[%s7187_s27 + $0x88] sm:$0xff]  ;;  %v6537_v23 = vld [vmem:[#allocation2 + $0x1c0] ss:$16 sps:$4 sm:$0xff]   ;;  %v384_v29 = vld [vmem:[%s7187_s27 + $0x98] sm:$0xff] }
  0x6b   : > { %571 = vmatprep.mubr.bf16.mxu0 %v7007_v0  ;;  %1886 = vmatpush1.bf16.msra.mxu0 %v6471_v31  ;;  %v6536_v24 = vld [vmem:[#allocation2 + $0x16c] ss:$16 sps:$4 sm:$0xff]   ;;  %v405_v25 = vpack.c.bf16 %v382_v21, %v381_v20  ;;  %v6534_v26 = vld [vmem:[#allocation2 + $0x168] ss:$16 sps:$4 sm:$0xff]   ;;  %v383_v28 = vld [vmem:[%s7187_s27 + $0x90] sm:$0xff] }
  0x6c   : > { %1887 = vmatprep.subr.bf16.mxu0 %v6476_v33  ;;  %764 = vmatprep.mubr.bf16.mxu1 %v7007_v0  ;;  %v6542_v27 = vld [vmem:[#allocation2 + $0x18c] ss:$16 sps:$4 sm:$0xff]   ;;  %v6540_v30 = vld [vmem:[#allocation2 + $0x188] ss:$16 sps:$4 sm:$0xff]   ;;  %v406_v32 = vpack.c.bf16 %v384_v29, %v383_v28  ;;  %v387_v37 = vld [vmem:[%s7187_s27 + $0xb0] sm:$0xff] }
  0x6d   : > { %2270 = vmatpush1.bf16.msra.mxu1 %v6498_v48  ;;  %v6545_v31 = vld [vmem:[#allocation2 + $0x1ac] ss:$16 sps:$4 sm:$0xff]   ;;  %v6543_v33 = vld [vmem:[#allocation2 + $0x1a8] ss:$16 sps:$4 sm:$0xff]   ;;  %v6548_v44 = vld [vmem:[#allocation2 + $0x1e4] ss:$16 sps:$4 sm:$0xff]  }
  0x6e   : > { %2271 = vmatprep.subr.bf16.mxu1 %v6506_v49  ;;  %v388_v38 = vld [vmem:[%s7187_s27 + $0xb8] sm:$0xff]  ;;  %v390_v43 = vld [vmem:[%s7187_s27 + $0xc8] sm:$0xff]  ;;  %v391_v49 = vld [vmem:[%s7187_s27 + $0xd0] sm:$0xff] }
  0x6f   : > { %1888 = vmatpush1.bf16.msra.mxu0 %v6474_v35  ;;  %v386_v35 = vld [vmem:[%s7187_s27 + $0xa8] sm:$0xff]  ;;  %v408_v39 = vpack.c.bf16 %v388_v38, %v387_v37  ;;  %v392_v50 = vld [vmem:[%s7187_s27 + $0xd8] sm:$0xff]  ;;  %v6557_v51 = vld [vmem:[#allocation2 + $0x204] ss:$16 sps:$4 sm:$0xff]  }
  0x70   : > { %1889 = vmatprep.subr.bf16.mxu0 %v6479_v36  ;;  %v6551_v40 = vld [vmem:[#allocation2 + $0x1cc] ss:$16 sps:$4 sm:$0xff]   ;;  %v6558_v37 = vld [vmem:[#allocation2 + $0x220] ss:$16 sps:$4 sm:$0xff]  }
  0x71   : > { %2272 = vmatpush1.bf16.msra.mxu1 %v6504_v54  ;;  %v394_v54 = vld [vmem:[%s7187_s27 + $0xe8] sm:$0xff] }
  0x72   : > { %5329 = vmatmul.mubr.msk.bf16.gmra.mrb[12].mxu0 %vm447_vm1, %v400_v34  ;;  %5346 = vmatmul.mubr.msk.bf16.gmra.mrb[12].mxu1 %vm447_vm1, %v400_v34  ;;  %v385_v34 = vld [vmem:[%s7187_s27 + $0xa0] sm:$0xff]  ;;  %v6587_v28 = vld [vmem:[#allocation2 + $0x22c] ss:$16 sps:$4 sm:$0xff]  }
  0x73   : > { %581 = vmatprep.mubr.bf16.mxu0 %v7007_v0  ;;  %1890 = vmatpush1.bf16.msra.mxu0 %v6477_v41  ;;  %v407_v36 = vpack.c.bf16 %v386_v35, %v385_v34  ;;  %v6549_v41 = vld [vmem:[#allocation2 + $0x1c8] ss:$16 sps:$4 sm:$0xff]  }
  0x74   : > { %1891 = vmatprep.subr.bf16.mxu0 %v6482_v42  ;;  %774 = vmatprep.mubr.bf16.mxu1 %v7007_v0  ;;  %v389_v42 = vld [vmem:[%s7187_s27 + $0xc0] sm:$0xff] }
  0x75   : > { %2273 = vmatprep.subr.bf16.mxu1 %v6509_v55  ;;  %v409_v48 = vpack.c.bf16 %v390_v43, %v389_v42  ;;  %v6563_v42 = vld [vmem:[#allocation2 + $0x244] ss:$16 sps:$4 sm:$0xff]   ;;  %v6585_v43 = vld [vmem:[#allocation2 + $0x228] ss:$16 sps:$4 sm:$0xff]  }
  0x76   : > { %2274 = vmatpush1.bf16.msra.mxu1 %v6507_v59  ;;  %v6584_v59 = vld [vmem:[#allocation2 + $0x20c] ss:$16 sps:$4 sm:$0xff]  }
  0x77   : > { %1892 = vmatpush1.bf16.msra.mxu0 %v6480_v46  ;;  %2275 = vmatprep.subr.bf16.mxu1 %v6515_v60  ;;  %v6546_v46 = vld [vmem:[#allocation2 + $0x1e0] ss:$16 sps:$4 sm:$0xff]   ;;  %v417_v60 = vlaneseq }
  0x78   : > { %1893 = vmatprep.subr.bf16.mxu0 %v6485_v47  ;;  %v6552_v47 = vld [vmem:[#allocation2 + $0x1e8] ss:$16 sps:$4 sm:$0xff]  }
  0x79   : > { %v418_v61 = vshrl.u32 %v417_v60, 7 }
  0x7a   : > { %5330 = vmatmul.mubr.msk.bf16.gmra.mrb[16].mxu0 %vm447_vm1, %v401_v45  ;;  %5347 = vmatmul.mubr.msk.bf16.gmra.mrb[16].mxu1 %vm447_vm1, %v401_v45  ;;  %v6554_v45 = vld [vmem:[#allocation2 + $0x1ec] ss:$16 sps:$4 sm:$0xff]  }
  0x7b   : > { %591 = vmatprep.mubr.bf16.mxu0 %v7007_v0  ;;  %1894 = vmatpush1.bf16.msra.mxu0 %v6483_v52  ;;  %v410_v52 = vpack.c.bf16 %v392_v50, %v391_v49  ;;  %v7293_v62 = vsub.s32 0, %v418_v61  ;;  %v7310_v9 = vsub.s32 3, %v418_v61 }
  0x7c   : > { %1895 = vmatprep.subr.bf16.mxu0 %v6494_v53  ;;  %784 = vmatprep.mubr.bf16.mxu1 %v7007_v0  ;;  %v393_v53 = vld [vmem:[%s7187_s27 + $0xe0] sm:$0xff] }
  0x7d   : > { %2276 = vmatpush1.bf16.msra.mxu1 %v6513_v2  ;;  %v411_v55 = vpack.c.bf16 %v394_v54, %v393_v53 }
  0x7e   : > { %2277 = vmatprep.subr.bf16.mxu1 %v6518_v3 }
  0x7f   : > { %1896 = vmatpush1.bf16.msra.mxu0 %v6492_v57  ;;  %v396_v57 = vld [vmem:[%s7187_s27 + $0xf8] sm:$0xff] }
  0x80   : > { %1897 = vmatprep.subr.bf16.mxu0 %v6503_v58 }
  0x81   : > { %2278 = vmatpush1.bf16.msra.mxu1 %v6516_v6  ;;  %v7307_v6 = vsub.s32 2, %v418_v61 }
  0x82   : > { %5331 = vmatmul.mubr.msk.bf16.gmra.mrb[20].mxu0 %vm447_vm1, %v402_v56  ;;  %5348 = vmatmul.mubr.msk.bf16.gmra.mrb[20].mxu1 %vm447_vm1, %v402_v56  ;;  %v395_v56 = vld [vmem:[%s7187_s27 + $0xf0] sm:$0xff]  ;;  %s354_s27 = sand.u32 1, %s6993_s10  }
  0x83   : > { %601 = vmatprep.mubr.bf16.mxu0 %v7007_v0  ;;  %1898 = vmatpush1.bf16.msra.mxu0 %v6501_v63  ;;  %v412_v58 = vpack.c.bf16 %v396_v57, %v395_v56  ;;  %v415_v63 = vld [vmem:[%s8210_s2] sm:$0xf]  ;;  %s5318_s14 = sshll.u32 %s354_s27, 8  ;;  %s8167_s15 = scalar_lea.sflag [#allocation4], %s354_s27 }
  0x84   : > { %1899 = vmatprep.subr.bf16.mxu0 %v6512_v1  ;;  %794 = vmatprep.mubr.bf16.mxu1 %v7007_v0  ;;  %v7298_v1 = vsub.s32 1, %v418_v61  ;;  %v7301_v2 = vrot.slane %v415_v63, %v7293_v62  ;;  %v6561_v57 = vld [vmem:[#allocation2 + $0x240] ss:$16 sps:$4 sm:$0xff]   ;;  %s8092_s16 = scalar_lea.vmem [#allocation7], %s5318_s14 }
  0x85   : > { %2279 = vmatprep.subr.bf16.mxu1 %v6524_v8  ;;  %s5226_s22 = sshll.u32 %s8092_s16, 4  ;;  %s8161_s22 = int_to_ptr.vmem [resolvable:$true] %s5226_s22 }
  0x86   : > { %2280 = vmatpush1.bf16.msra.mxu1 %v6522_v12  ;;  %v7304_v3 = vrot.slane %v415_v63, %v7298_v1  ;;  %s6931_s13 = scalar_lea.vmem %s8161_s22, 4096  ;;  %p6938_p4 = scmp.lt.s32.totalorder %s8161_s22, %s6936_s21 }
  0x87   : > { %1900 = vmatpush1.bf16.msra.mxu0 %v6510_v5  ;;  %2281 = vmatprep.subr.bf16.mxu1 %v6527_v13  ;;  %p6932_p10 = scmp.ne.s32.totalorder %s8161_s22, %s6931_s13  ;;  %p6939_p7 = scmp.lt.s32.totalorder %s6937_s24, %s6931_s13 }
  0x88   : > { %1901 = vmatprep.subr.bf16.mxu0 %v6521_v7 }
  0x89   : > { %p6933_p2 = pnand %p6932_p10, %p8236_p1  ;;  %p6940_p8 = por %p6939_p7, %p6938_p4 }
  0x8a   : > { %5332 = vmatmul.mubr.msk.bf16.gmra.mrb[24].mxu0 %vm447_vm1, %v403_v4  ;;  %5349 = vmatmul.mubr.msk.bf16.gmra.mrb[24].mxu1 %vm447_vm1, %v403_v4 }
  0x8b   : > { %611 = vmatprep.mubr.bf16.mxu0 %v7007_v0  ;;  %1902 = vmatpush1.bf16.msra.mxu0 %v6519_v11  ;;  %p6934_p3 = pneg %p6933_p2 }
  0x8c   : > { %1903 = vmatprep.subr.bf16.mxu0 %v6530_v14  ;;  %804 = vmatprep.mubr.bf16.mxu1 %v7007_v0 }
  0x8d   : > { %2282 = vmatpush1.bf16.msra.mxu1 %v6525_v16  ;;  %p6941_p11 = pnand %p6940_p8, %p6934_p3 }
  0x8e   : > { %2283 = vmatprep.subr.bf16.mxu1 %v6533_v18  ;;  %v7318_v18 = vrot.slane %v415_v63, %v7310_v9 }
  0x8f   : > { %1904 = vmatpush1.bf16.msra.mxu0 %v6528_v17 }
  0x90   : > { %1905 = vmatprep.subr.bf16.mxu0 %v6539_v19 }
  0x91   : > { %2284 = vmatpush1.bf16.msra.mxu1 %v6531_v22  ;;  %v6555_v22 = vld [vmem:[#allocation2 + $0x200] ss:$16 sps:$4 sm:$0xff]  }
  0x92   : > { %5333 = vmatmul.mubr.msk.bf16.gmra.mrb[28].mxu0 %vm447_vm1, %v404_v15  ;;  %2285 = vmatprep.subr.bf16.mxu1 %v6536_v24 }
  0x93   : > { %621 = vmatprep.mubr.bf16.mxu0 %v7007_v0  ;;  %1906 = vmatpush1.bf16.msra.mxu0 %v6537_v23  ;;  %v6582_v23 = vld [vmem:[#allocation2 + $0x208] ss:$16 sps:$4 sm:$0xff]  }
  0x94   : > { %5350 = vmatmul.mubr.msk.bf16.gmra.mrb[28].mxu1 %vm447_vm1, %v404_v15  ;;  %1907 = vmatprep.subr.bf16.mxu0 %v6548_v44  ;;  %v7315_v15 = vrot.slane %v415_v63, %v7307_v6 }
  0x95   : > { %814 = vmatprep.mubr.bf16.mxu1 %v7007_v0  ;;  %2286 = vmatpush1.bf16.msra.mxu1 %v6534_v26 }
  0x96   : > { %2287 = vmatprep.subr.bf16.mxu1 %v6542_v27  ;;  %v6560_v27 = vld [vmem:[#allocation2 + $0x224] ss:$16 sps:$4 sm:$0xff]  }
  0x97   : > { %1908 = vmatpush1.bf16.msra.mxu0 %v6546_v46 }
  0x98   : > { %2070 = vmatprep.subr.bf16.mxu0 %v6557_v51 }
  0x99   : > { %2288 = vmatpush1.bf16.msra.mxu1 %v6540_v30 }
  0x9a   : > { %5334 = vmatmul.mubr.msk.bf16.gmra.mrb[32].mxu0 %vm447_vm1, %v405_v25  ;;  %2289 = vmatprep.subr.bf16.mxu1 %v6545_v31 }
  0x9b   : > { %631 = vmatprep.mubr.bf16.mxu0 %v7007_v0 }
  0x9c   : > { %5351 = vmatmul.mubr.msk.bf16.gmra.mrb[32].mxu1 %vm447_vm1, %v405_v25 }
  0x9d   : > { %824 = vmatprep.mubr.bf16.mxu1 %v7007_v0  ;;  %2290 = vmatpush1.bf16.msra.mxu1 %v6543_v33 }
  0x9e   : > { %2291 = vmatprep.subr.bf16.mxu1 %v6551_v40 }
  0xa1   : > { %2292 = vmatpush1.bf16.msra.mxu1 %v6549_v41 }
  0xa2   : > { %5335 = vmatmul.mubr.msk.bf16.gmra.mrb[36].mxu0 %vm447_vm1, %v406_v32  ;;  %2293 = vmatprep.subr.bf16.mxu1 %v6554_v45 }
  0xa3   : > { %641 = vmatprep.mubr.bf16.mxu0 %v7007_v0 }
  0xa4   : > { %5352 = vmatmul.mubr.msk.bf16.gmra.mrb[36].mxu1 %vm447_vm1, %v406_v32 }
  0xa5   : > { %834 = vmatprep.mubr.bf16.mxu1 %v7007_v0  ;;  %2294 = vmatpush1.bf16.msra.mxu1 %v6552_v47 }
  0xa6   : > { %2456 = vmatprep.subr.bf16.mxu1 %v6584_v59 }
  0xaa   : > { %5336 = vmatmul.mubr.msk.bf16.gmra.mrb[40].mxu0 %vm447_vm1, %v407_v36 }
  0xab   : > { %651 = vmatprep.mubr.bf16.mxu0 %v7007_v0 }
  0xac   : > { %5353 = vmatmul.mubr.msk.bf16.gmra.mrb[40].mxu1 %vm447_vm1, %v407_v36 }
  0xad   : > { %844 = vmatprep.mubr.bf16.mxu1 %v7007_v0 }
  0xb2   : > { %5337 = vmatmul.mubr.msk.bf16.gmra.mrb[44].mxu0 %vm447_vm1, %v408_v39 }
  0xb3   : > { %661 = vmatprep.mubr.bf16.mxu0 %v7007_v0 }
  0xb4   : > { %5354 = vmatmul.mubr.msk.bf16.gmra.mrb[44].mxu1 %vm447_vm1, %v408_v39 }
  0xb5   : > { %854 = vmatprep.mubr.bf16.mxu1 %v7007_v0 }
  0xba   : > { %5338 = vmatmul.mubr.msk.bf16.gmra.mrb[48].mxu0 %vm447_vm1, %v409_v48 }
  0xbb   : > { %671 = vmatprep.mubr.bf16.mxu0 %v7007_v0 }
  0xbc   : > { %5355 = vmatmul.mubr.msk.bf16.gmra.mrb[48].mxu1 %vm447_vm1, %v409_v48  ;;  %v6593_v48 = vld [vmem:[#allocation2 + $0x24c] ss:$16 sps:$4 sm:$0xff]  }
  0xbd   : > { %864 = vmatprep.mubr.bf16.mxu1 %v7007_v0 }
  0xc2   : > { %5339 = vmatmul.mubr.msk.bf16.gmra.mrb[52].mxu0 %vm447_vm1, %v410_v52 }
  0xc3   : > { %681 = vmatprep.mubr.bf16.mxu0 %v7007_v0 }
  0xc4   : > { %5356 = vmatmul.mubr.msk.bf16.gmra.mrb[52].mxu1 %vm447_vm1, %v410_v52 }
  0xc5   : > { %874 = vmatprep.mubr.bf16.mxu1 %v7007_v0 }
  0xca   : > { %5340 = vmatmul.mubr.msk.bf16.gmra.mrb[56].mxu0 %vm447_vm1, %v411_v55 }
  0xcb   : > { %691 = vmatprep.mubr.bf16.mxu0 %v7007_v0 }
  0xcc   : > { %5357 = vmatmul.mubr.msk.bf16.gmra.mrb[56].mxu1 %vm447_vm1, %v411_v55 }
  0xcd   : > { %884 = vmatprep.mubr.bf16.mxu1 %v7007_v0 }
  0xd2   : > { %5341 = vmatmul.mubr.msk.bf16.gmra.mrb[60].mxu0 %vm447_vm1, %v412_v58 }
  0xd4   : > { %5358 = vmatmul.mubr.msk.bf16.gmra.mrb[60].mxu1 %vm447_vm1, %v412_v58  ;;  %v6591_v58 = vld [vmem:[#allocation2 + $0x248] ss:$16 sps:$4 sm:$0xff]  }
 0x12d   : > { %v543_v0 = vpop.f32.mrb[0].mxu0  ;;  %v736_v24 = vpop.f32.mrb[0].mxu1 }
 0x12e   : > { %v544_v4 = vadd.f32 %v543_v0, %v7301_v2  ;;  %v545_v5 = vpop.f32.mrb[1].mxu0  ;;  %v737_v29 = vadd.f32 %v736_v24, %v7315_v15  ;;  %v738_v30 = vpop.f32.mrb[1].mxu1  ;;  %v6566_v0 = vld [vmem:[#allocation2 + $0x264] ss:$16 sps:$4 sm:$0xff]  }
 0x12f   : > { %v546_v7 = vadd.f32 %v545_v5, %v7304_v3  ;;  %v547_v8 = vpop.f32.mrb[2].mxu0  ;;  %v739_v33 = vadd.f32 %v738_v30, %v7318_v18  ;;  %v740_v34 = vpop.f32.mrb[2].mxu1 }
 0x130   : > { %v548_v10 = vadd.f32 %v547_v8, %v7301_v2  ;;  %v549_v11 = vpop.f32.mrb[3].mxu0  ;;  %v895_v13 = vmax.f32 %v544_v4, 0.0  ;;  %v897_v38 = vmax.f32 %v737_v29, 0.0  ;;  %v741_v39 = vadd.f32 %v740_v34, %v7315_v15  ;;  %v742_v40 = vpop.f32.mrb[3].mxu1  ;;  %v6596_v4 = vld [vmem:[#allocation2 + $0x26c] ss:$16 sps:$4 sm:$0xff]  }
 0x131   : > { %v550_v12 = vadd.f32 %v549_v11, %v7304_v3  ;;  %v896_v16 = vmax.f32 %v546_v7, 0.0  ;;  %v898_v44 = vmax.f32 %v739_v33, 0.0  ;;  %v743_v45 = vadd.f32 %v742_v40, %v7318_v18 }
 0x132   : > { %v899_v14 = vmax.f32 %v548_v10, 0.0  ;;  %v901_v49 = vmax.f32 %v741_v39, 0.0 }
 0x133   : > { %v900_v17 = vmax.f32 %v550_v12, 0.0  ;;  %v902_v52 = vmax.f32 %v743_v45, 0.0 }
 0x134   : > { %v1023_v19 = vpack.c.bf16 %v899_v14, %v895_v13  ;;  %v7328_v54 = vpack.c.bf16 %v901_v49, %v897_v38  ;;  %v6600_v38 = vld [vmem:[#allocation2 + $0x288] ss:$16 sps:$4 sm:$0xff]  }
 0x135   : > { %v1024_v20 = vpack.c.bf16 %v900_v17, %v896_v16  ;;  %v553_v21 = vpop.f32.mrb[4].mxu0  ;;  %v7330_v59 = vpack.c.bf16 %v902_v52, %v898_v44  ;;  %v746_v60 = vpop.f32.mrb[4].mxu1  ;;  %v6564_v16 = vld [vmem:[#allocation2 + $0x260] ss:$16 sps:$4 sm:$0xff]   ;;  %v6605_v44 = vld [vmem:[#allocation2 + $0x2ac] ss:$16 sps:$4 sm:$0xff]  }
 0x136   : > { %v554_v25 = vadd.f32 %v553_v21, %v7301_v2  ;;  %v555_v26 = vpop.f32.mrb[5].mxu0  ;;  %v747_v5 = vadd.f32 %v746_v60, %v7315_v15  ;;  %v748_v7 = vpop.f32.mrb[5].mxu1  ;;  %v6575_v60 = vld [vmem:[#allocation2 + $0x2c4] ss:$16 sps:$4 sm:$0xff]  }
 0x137   : > { %v556_v31 = vadd.f32 %v555_v26, %v7304_v3  ;;  %v557_v32 = vpop.f32.mrb[6].mxu0  ;;  %1909 = vmatprep.mubr.bf16.mxu0 %v1024_v20  ;;  %2295 = vmatprep.mubr.bf16.mxu1 %v1024_v20  ;;  %v749_v11 = vadd.f32 %v748_v7, %v7318_v18  ;;  %v750_v12 = vpop.f32.mrb[6].mxu1  ;;  %v6611_v7 = vld [vmem:[#allocation2 + $0x2cc] ss:$16 sps:$4 sm:$0xff]  }
 0x138   : > { %v558_v35 = vadd.f32 %v557_v32, %v7301_v2  ;;  %v559_v36 = vpop.f32.mrb[7].mxu0  ;;  %1910 = vmatmul.mubr.bf16.vlgmr.msra.gmra.mrb[64].mxu0 %v1023_v19  ;;  %2296 = vmatmul.mubr.bf16.vlgmr.msra.gmra.mrb[64].mxu1 %v1023_v19  ;;  %v903_v46 = vmax.f32 %v554_v25, 0.0  ;;  %v905_v17 = vmax.f32 %v747_v5, 0.0  ;;  %v751_v19 = vadd.f32 %v750_v12, %v7315_v15  ;;  %v752_v20 = vpop.f32.mrb[7].mxu1 }
 0x139   : > { %v560_v41 = vadd.f32 %v559_v36, %v7304_v3  ;;  %2071 = vmatpush1.bf16.msra.mxu0 %v6555_v22  ;;  %2457 = vmatpush1.bf16.msra.mxu1 %v6582_v23  ;;  %v904_v50 = vmax.f32 %v556_v31, 0.0  ;;  %v6569_v22 = vld [vmem:[#allocation2 + $0x284] ss:$16 sps:$4 sm:$0xff]   ;;  %v6594_v23 = vld [vmem:[#allocation2 + $0x268] ss:$16 sps:$4 sm:$0xff]   ;;  %v906_v24 = vmax.f32 %v749_v11, 0.0  ;;  %v753_v25 = vadd.f32 %v752_v20, %v7318_v18 }
 0x13a   : > { %v907_v47 = vmax.f32 %v558_v35, 0.0  ;;  %2072 = vmatprep.subr.bf16.mxu0 %v6560_v27  ;;  %2458 = vmatprep.subr.bf16.mxu1 %v6587_v28  ;;  %v6602_v28 = vld [vmem:[#allocation2 + $0x28c] ss:$16 sps:$4 sm:$0xff]   ;;  %v909_v29 = vmax.f32 %v751_v19, 0.0  ;;  %v6573_v19 = vld [vmem:[#allocation2 + $0x2c0] ss:$16 sps:$4 sm:$0xff]  }
 0x13b   : > { %v908_v51 = vmax.f32 %v560_v41, 0.0  ;;  %v910_v32 = vmax.f32 %v753_v25, 0.0  ;;  %v6609_v20 = vld [vmem:[#allocation2 + $0x2c8] ss:$16 sps:$4 sm:$0xff]   ;;  %v6578_v25 = vld [vmem:[#allocation2 + $0x2e4] ss:$16 sps:$4 sm:$0xff]  }
 0x13c   : > { %v1027_v53 = vpack.c.bf16 %v907_v47, %v903_v46  ;;  %v7340_v34 = vpack.c.bf16 %v909_v29, %v905_v17 }
 0x13d   : > { %v1028_v55 = vpack.c.bf16 %v908_v51, %v904_v50  ;;  %v563_v56 = vpop.f32.mrb[8].mxu0  ;;  %2073 = vmatpush1.bf16.msra.mxu0 %v6558_v37  ;;  %2459 = vmatpush1.bf16.msra.mxu1 %v6585_v43  ;;  %v6567_v37 = vld [vmem:[#allocation2 + $0x280] ss:$16 sps:$4 sm:$0xff]   ;;  %v7342_v39 = vpack.c.bf16 %v910_v32, %v906_v24  ;;  %v756_v40 = vpop.f32.mrb[8].mxu1  ;;  %v6572_v43 = vld [vmem:[#allocation2 + $0x2a4] ss:$16 sps:$4 sm:$0xff]  }
 0x13e   : > { %v564_v61 = vadd.f32 %v563_v56, %v7301_v2  ;;  %v565_v63 = vpop.f32.mrb[9].mxu0  ;;  %2074 = vmatprep.subr.bf16.mxu0 %v6563_v42  ;;  %2460 = vmatprep.subr.bf16.mxu1 %v6593_v48  ;;  %v757_v45 = vadd.f32 %v756_v40, %v7315_v15  ;;  %v758_v46 = vpop.f32.mrb[9].mxu1 }
 0x13f   : > { %v566_v8 = vadd.f32 %v565_v63, %v7304_v3  ;;  %v567_v10 = vpop.f32.mrb[10].mxu0  ;;  %1919 = vmatprep.mubr.bf16.mxu0 %v1028_v55  ;;  %2305 = vmatprep.mubr.bf16.mxu1 %v1028_v55  ;;  %v759_v49 = vadd.f32 %v758_v46, %v7318_v18  ;;  %v760_v50 = vpop.f32.mrb[10].mxu1 }
 0x140   : > { %v568_v13 = vadd.f32 %v567_v10, %v7301_v2  ;;  %v569_v14 = vpop.f32.mrb[11].mxu0  ;;  %1920 = vmatmul.mubr.bf16.gmra.mrb[68].mxu0 %v1027_v53  ;;  %2306 = vmatmul.mubr.bf16.gmra.mrb[68].mxu1 %v1027_v53  ;;  %v911_v26 = vmax.f32 %v564_v61, 0.0  ;;  %v6570_v53 = vld [vmem:[#allocation2 + $0x2a0] ss:$16 sps:$4 sm:$0xff]   ;;  %v913_v55 = vmax.f32 %v757_v45, 0.0  ;;  %v761_v56 = vadd.f32 %v760_v50, %v7315_v15 }
 0x141   : > { %v570_v21 = vadd.f32 %v569_v14, %v7304_v3  ;;  %2075 = vmatpush1.bf16.msra.mxu0 %v6561_v57  ;;  %2461 = vmatpush1.bf16.msra.mxu1 %v6591_v58  ;;  %v912_v30 = vmax.f32 %v566_v8, 0.0  ;;  %v762_v57 = vpop.f32.mrb[11].mxu1  ;;  %v6603_v61 = vld [vmem:[#allocation2 + $0x2a8] ss:$16 sps:$4 sm:$0xff]   ;;  %v914_v63 = vmax.f32 %v759_v49, 0.0 }
 0x142   : > { %v915_v27 = vmax.f32 %v568_v13, 0.0  ;;  %2076 = vmatprep.subr.bf16.mxu0 %v6566_v0  ;;  %2462 = vmatprep.subr.bf16.mxu1 %v6596_v4  ;;  %v763_v0 = vadd.f32 %v762_v57, %v7318_v18  ;;  %v917_v8 = vmax.f32 %v761_v56, 0.0 }
 0x143   : > { %v916_v31 = vmax.f32 %v570_v21, 0.0 }
 0x144   : > { %v1031_v33 = vpack.c.bf16 %v915_v27, %v911_v26  ;;  %v918_v12 = vmax.f32 %v763_v0, 0.0  ;;  %v7352_v14 = vpack.c.bf16 %v917_v8, %v913_v55  ;;  %v6614_v26 = vld [vmem:[#allocation2 + $0x2ec] ss:$16 sps:$4 sm:$0xff]  }
 0x145   : > { %v1032_v35 = vpack.c.bf16 %v916_v31, %v912_v30  ;;  %v573_v36 = vpop.f32.mrb[12].mxu0  ;;  %2077 = vmatpush1.bf16.msra.mxu0 %v6564_v16  ;;  %2463 = vmatpush1.bf16.msra.mxu1 %v6594_v23 }
 0x146   : > { %v574_v41 = vadd.f32 %v573_v36, %v7301_v2  ;;  %v575_v42 = vpop.f32.mrb[13].mxu0  ;;  %2078 = vmatprep.subr.bf16.mxu0 %v6569_v22  ;;  %2464 = vmatprep.subr.bf16.mxu1 %v6602_v28  ;;  %v7354_v21 = vpack.c.bf16 %v918_v12, %v914_v63  ;;  %v766_v22 = vpop.f32.mrb[12].mxu1  ;;  %v6576_v36 = vld [vmem:[#allocation2 + $0x2e0] ss:$16 sps:$4 sm:$0xff]  }
 0x147   : > { %v576_v47 = vadd.f32 %v575_v42, %v7304_v3  ;;  %v577_v48 = vpop.f32.mrb[14].mxu0  ;;  %1929 = vmatprep.mubr.bf16.mxu0 %v1032_v35  ;;  %2315 = vmatprep.mubr.bf16.mxu1 %v1032_v35  ;;  %v767_v27 = vadd.f32 %v766_v22, %v7315_v15  ;;  %v768_v28 = vpop.f32.mrb[13].mxu1  ;;  %v6581_v42 = vld [vmem:[#allocation2 + $0x304] ss:$16 sps:$4 sm:$0xff]  }
 0x148   : > { %v578_v51 = vadd.f32 %v577_v48, %v7301_v2  ;;  %v579_v52 = vpop.f32.mrb[15].mxu0  ;;  %1930 = vmatmul.mubr.bf16.gmra.mrb[72].mxu0 %v1031_v33  ;;  %2316 = vmatmul.mubr.bf16.gmra.mrb[72].mxu1 %v1031_v33  ;;  %v919_v4 = vmax.f32 %v574_v41, 0.0  ;;  %v769_v31 = vadd.f32 %v768_v28, %v7318_v18  ;;  %v770_v32 = vpop.f32.mrb[14].mxu1  ;;  %v6620_v48 = vld [vmem:[#allocation2 + $0x30c] ss:$16 sps:$4 sm:$0xff]  }
 0x149   : > { %v580_v58 = vadd.f32 %v579_v52, %v7304_v3  ;;  %2079 = vmatpush1.bf16.msra.mxu0 %v6567_v37  ;;  %2465 = vmatpush1.bf16.msra.mxu1 %v6600_v38  ;;  %v920_v10 = vmax.f32 %v576_v47, 0.0  ;;  %v921_v37 = vmax.f32 %v767_v27, 0.0  ;;  %v771_v38 = vadd.f32 %v770_v32, %v7315_v15  ;;  %v772_v40 = vpop.f32.mrb[15].mxu1  ;;  %v6621_v27 = vld [vmem:[#allocation2 + $0x328] ss:$16 sps:$4 sm:$0xff]  }
 0x14a   : > { %v923_v5 = vmax.f32 %v578_v51, 0.0  ;;  %2080 = vmatprep.subr.bf16.mxu0 %v6572_v43  ;;  %2466 = vmatprep.subr.bf16.mxu1 %v6605_v44  ;;  %v6612_v43 = vld [vmem:[#allocation2 + $0x2e8] ss:$16 sps:$4 sm:$0xff]   ;;  %v922_v44 = vmax.f32 %v769_v31, 0.0  ;;  %v773_v45 = vadd.f32 %v772_v40, %v7318_v18  ;;  %v6629_v32 = vld [vmem:[#allocation2 + $0x34c] ss:$16 sps:$4 sm:$0xff]  }
 0x14b   : > { %v924_v11 = vmax.f32 %v580_v58, 0.0  ;;  %v925_v49 = vmax.f32 %v771_v38, 0.0  ;;  %v6579_v58 = vld [vmem:[#allocation2 + $0x300] ss:$16 sps:$4 sm:$0xff]  }
 0x14c   : > { %v1035_v13 = vpack.c.bf16 %v923_v5, %v919_v4  ;;  %v926_v52 = vmax.f32 %v773_v45, 0.0  ;;  %v6590_v5 = vld [vmem:[#allocation2 + $0x324] ss:$16 sps:$4 sm:$0xff]  }
 0x14d   : > { %v1036_v16 = vpack.c.bf16 %v924_v11, %v920_v10  ;;  %v583_v17 = vpop.f32.mrb[16].mxu0  ;;  %2081 = vmatpush1.bf16.msra.mxu0 %v6570_v53  ;;  %2467 = vmatpush1.bf16.msra.mxu1 %v6603_v61  ;;  %v7364_v55 = vpack.c.bf16 %v925_v49, %v921_v37  ;;  %v776_v63 = vpop.f32.mrb[16].mxu1  ;;  %v6608_v49 = vld [vmem:[#allocation2 + $0x364] ss:$16 sps:$4 sm:$0xff]  }
 0x14e   : > { %v584_v23 = vadd.f32 %v583_v17, %v7301_v2  ;;  %v585_v24 = vpop.f32.mrb[17].mxu0  ;;  %2082 = vmatprep.subr.bf16.mxu0 %v6575_v60  ;;  %2468 = vmatprep.subr.bf16.mxu1 %v6611_v7  ;;  %v6618_v60 = vld [vmem:[#allocation2 + $0x308] ss:$16 sps:$4 sm:$0xff]   ;;  %v7366_v61 = vpack.c.bf16 %v926_v52, %v922_v44  ;;  %v6623_v7 = vld [vmem:[#allocation2 + $0x32c] ss:$16 sps:$4 sm:$0xff]   ;;  %v777_v8 = vadd.f32 %v776_v63, %v7315_v15  ;;  %v778_v10 = vpop.f32.mrb[17].mxu1 }
 0x14f   : > { %v586_v29 = vadd.f32 %v585_v24, %v7304_v3  ;;  %v587_v30 = vpop.f32.mrb[18].mxu0  ;;  %1939 = vmatprep.mubr.bf16.mxu0 %v1036_v16  ;;  %2325 = vmatprep.mubr.bf16.mxu1 %v1036_v16  ;;  %v780_v16 = vpop.f32.mrb[18].mxu1  ;;  %v6627_v44 = vld [vmem:[#allocation2 + $0x348] ss:$16 sps:$4 sm:$0xff]  }
 0x150   : > { %v588_v33 = vadd.f32 %v587_v30, %v7301_v2  ;;  %v589_v35 = vpop.f32.mrb[19].mxu0  ;;  %1940 = vmatmul.mubr.bf16.gmra.mrb[76].mxu0 %v1035_v13  ;;  %2326 = vmatmul.mubr.bf16.gmra.mrb[76].mxu1 %v1035_v13  ;;  %v927_v46 = vmax.f32 %v584_v23, 0.0  ;;  %v779_v13 = vadd.f32 %v778_v10, %v7318_v18  ;;  %v929_v22 = vmax.f32 %v777_v8, 0.0  ;;  %v782_v24 = vpop.f32.mrb[19].mxu1  ;;  %v6617_v10 = vld [vmem:[#allocation2 + $0x384] ss:$16 sps:$4 sm:$0xff]  }
 0x151   : > { %v590_v41 = vadd.f32 %v589_v35, %v7304_v3  ;;  %2083 = vmatpush1.bf16.msra.mxu0 %v6573_v19  ;;  %2469 = vmatpush1.bf16.msra.mxu1 %v6609_v20  ;;  %v928_v50 = vmax.f32 %v586_v29, 0.0  ;;  %v6588_v20 = vld [vmem:[#allocation2 + $0x320] ss:$16 sps:$4 sm:$0xff]   ;;  %v781_v23 = vadd.f32 %v780_v16, %v7315_v15  ;;  %v783_v29 = vadd.f32 %v782_v24, %v7318_v18 }
 0x152   : > { %v931_v47 = vmax.f32 %v588_v33, 0.0  ;;  %2084 = vmatprep.subr.bf16.mxu0 %v6578_v25  ;;  %2470 = vmatprep.subr.bf16.mxu1 %v6614_v26  ;;  %v6599_v26 = vld [vmem:[#allocation2 + $0x344] ss:$16 sps:$4 sm:$0xff]   ;;  %v930_v28 = vmax.f32 %v779_v13, 0.0 }
 0x153   : > { %v932_v51 = vmax.f32 %v590_v41, 0.0  ;;  %v933_v33 = vmax.f32 %v781_v23, 0.0  ;;  %v934_v37 = vmax.f32 %v783_v29, 0.0  ;;  %v6615_v29 = vld [vmem:[#allocation2 + $0x380] ss:$16 sps:$4 sm:$0xff]  }
 0x154   : > { %v1039_v53 = vpack.c.bf16 %v931_v47, %v927_v46 }
 0x155   : > { %v1040_v56 = vpack.c.bf16 %v932_v51, %v928_v50  ;;  %v593_v57 = vpop.f32.mrb[20].mxu0  ;;  %2085 = vmatpush1.bf16.msra.mxu0 %v6576_v36  ;;  %2471 = vmatpush1.bf16.msra.mxu1 %v6612_v43  ;;  %v7376_v40 = vpack.c.bf16 %v933_v33, %v929_v22  ;;  %v6597_v43 = vld [vmem:[#allocation2 + $0x340] ss:$16 sps:$4 sm:$0xff]   ;;  %v7378_v45 = vpack.c.bf16 %v934_v37, %v930_v28  ;;  %v786_v46 = vpop.f32.mrb[20].mxu1  ;;  %v6632_v50 = vld [vmem:[#allocation2 + $0x36c] ss:$16 sps:$4 sm:$0xff]  }
 0x156   : > { %v594_v0 = vadd.f32 %v593_v57, %v7301_v2  ;;  %v595_v4 = vpop.f32.mrb[21].mxu0  ;;  %2086 = vmatprep.subr.bf16.mxu0 %v6581_v42  ;;  %2472 = vmatprep.subr.bf16.mxu1 %v6620_v48  ;;  %v787_v51 = vadd.f32 %v786_v46, %v7315_v15  ;;  %v788_v52 = vpop.f32.mrb[21].mxu1  ;;  %v6641_v37 = vld [vmem:[#allocation2 + $0x3ac] ss:$16 sps:$4 sm:$0xff]  }
 0x157   : > { %v596_v11 = vadd.f32 %v595_v4, %v7304_v3  ;;  %v597_v12 = vpop.f32.mrb[22].mxu0  ;;  %1949 = vmatprep.mubr.bf16.mxu0 %v1040_v56  ;;  %2335 = vmatprep.mubr.bf16.mxu1 %v1040_v56  ;;  %v789_v57 = vadd.f32 %v788_v52, %v7318_v18 }
 0x158   : > { %v598_v17 = vadd.f32 %v597_v12, %v7301_v2  ;;  %v599_v19 = vpop.f32.mrb[23].mxu0  ;;  %1950 = vmatmul.mubr.bf16.gmra.mrb[80].mxu0 %v1039_v53  ;;  %2336 = vmatmul.mubr.bf16.gmra.mrb[80].mxu1 %v1039_v53  ;;  %v935_v30 = vmax.f32 %v594_v0, 0.0  ;;  %v6606_v0 = vld [vmem:[#allocation2 + $0x360] ss:$16 sps:$4 sm:$0xff]   ;;  %v937_v4 = vmax.f32 %v787_v51, 0.0 }
 0x159   : > { %v600_v25 = vadd.f32 %v599_v19, %v7304_v3  ;;  %2087 = vmatpush1.bf16.msra.mxu0 %v6579_v58  ;;  %2473 = vmatpush1.bf16.msra.mxu1 %v6618_v60  ;;  %v936_v35 = vmax.f32 %v596_v11, 0.0  ;;  %v790_v58 = vpop.f32.mrb[22].mxu1  ;;  %v6630_v11 = vld [vmem:[#allocation2 + $0x368] ss:$16 sps:$4 sm:$0xff]   ;;  %v938_v12 = vmax.f32 %v789_v57, 0.0 }
 0x15a   : > { %v939_v31 = vmax.f32 %v598_v17, 0.0  ;;  %2088 = vmatprep.subr.bf16.mxu0 %v6590_v5  ;;  %2474 = vmatprep.subr.bf16.mxu1 %v6623_v7  ;;  %v791_v5 = vadd.f32 %v790_v58, %v7315_v15  ;;  %v792_v7 = vpop.f32.mrb[23].mxu1  ;;  %v6638_v19 = vld [vmem:[#allocation2 + $0x38c] ss:$16 sps:$4 sm:$0xff]   ;;  %v6639_v57 = vld [vmem:[#allocation2 + $0x3a8] ss:$16 sps:$4 sm:$0xff]  }
 0x15b   : > { %v940_v36 = vmax.f32 %v600_v25, 0.0  ;;  %v793_v13 = vadd.f32 %v792_v7, %v7318_v18 }
 0x15c   : > { %v1043_v38 = vpack.c.bf16 %v939_v31, %v935_v30  ;;  %v6636_v30 = vld [vmem:[#allocation2 + $0x388] ss:$16 sps:$4 sm:$0xff]  }
 0x15d   : > { %v1044_v41 = vpack.c.bf16 %v940_v36, %v936_v35  ;;  %v603_v42 = vpop.f32.mrb[24].mxu0  ;;  %2089 = vmatpush1.bf16.msra.mxu0 %v6588_v20  ;;  %2475 = vmatpush1.bf16.msra.mxu1 %v6621_v27  ;;  %v941_v20 = vmax.f32 %v791_v5, 0.0  ;;  %v942_v24 = vmax.f32 %v793_v13, 0.0  ;;  %v6626_v36 = vld [vmem:[#allocation2 + $0x3a4] ss:$16 sps:$4 sm:$0xff]  }
 0x15e   : > { %v604_v47 = vadd.f32 %v603_v42, %v7301_v2  ;;  %v605_v48 = vpop.f32.mrb[25].mxu0  ;;  %2090 = vmatprep.subr.bf16.mxu0 %v6599_v26  ;;  %2476 = vmatprep.subr.bf16.mxu1 %v6629_v32  ;;  %v796_v32 = vpop.f32.mrb[24].mxu1 }
 0x15f   : > { %v606_v53 = vadd.f32 %v605_v48, %v7304_v3  ;;  %v607_v56 = vpop.f32.mrb[26].mxu0  ;;  %1959 = vmatprep.mubr.bf16.mxu0 %v1044_v41  ;;  %2345 = vmatprep.mubr.bf16.mxu1 %v1044_v41  ;;  %v7388_v26 = vpack.c.bf16 %v941_v20, %v937_v4  ;;  %v7390_v31 = vpack.c.bf16 %v942_v24, %v938_v12  ;;  %v798_v41 = vpop.f32.mrb[25].mxu1  ;;  %v6647_v4 = vld [vmem:[#allocation2 + $0x3cc] ss:$16 sps:$4 sm:$0xff]  }
 0x160   : > { %v608_v60 = vadd.f32 %v607_v56, %v7301_v2  ;;  %v609_v63 = vpop.f32.mrb[27].mxu0  ;;  %1960 = vmatmul.mubr.bf16.gmra.mrb[84].mxu0 %v1043_v38  ;;  %2346 = vmatmul.mubr.bf16.gmra.mrb[84].mxu1 %v1043_v38  ;;  %v943_v16 = vmax.f32 %v604_v47, 0.0  ;;  %v797_v38 = vadd.f32 %v796_v32, %v7315_v15  ;;  %v800_v46 = vpop.f32.mrb[26].mxu1  ;;  %v6635_v56 = vld [vmem:[#allocation2 + $0x3c4] ss:$16 sps:$4 sm:$0xff]  }
 0x161   : > { %v610_v8 = vadd.f32 %v609_v63, %v7304_v3  ;;  %2091 = vmatpush1.bf16.msra.mxu0 %v6597_v43  ;;  %2477 = vmatpush1.bf16.msra.mxu1 %v6627_v44  ;;  %v944_v22 = vmax.f32 %v606_v53, 0.0  ;;  %v799_v44 = vadd.f32 %v798_v41, %v7318_v18  ;;  %v801_v51 = vadd.f32 %v800_v46, %v7315_v15  ;;  %v802_v52 = vpop.f32.mrb[27].mxu1  ;;  %v6648_v46 = vld [vmem:[#allocation2 + $0x3e8] ss:$16 sps:$4 sm:$0xff]  }
 0x162   : > { %v947_v17 = vmax.f32 %v608_v60, 0.0  ;;  %2092 = vmatprep.subr.bf16.mxu0 %v6608_v49  ;;  %2478 = vmatprep.subr.bf16.mxu1 %v6632_v50  ;;  %v6624_v49 = vld [vmem:[#allocation2 + $0x3a0] ss:$16 sps:$4 sm:$0xff]   ;;  %v945_v50 = vmax.f32 %v797_v38, 0.0  ;;  %v803_v60 = vadd.f32 %v802_v52, %v7318_v18 }
 0x163   : > { %v948_v23 = vmax.f32 %v610_v8, 0.0  ;;  %v946_v58 = vmax.f32 %v799_v44, 0.0  ;;  %v949_v5 = vmax.f32 %v801_v51, 0.0  ;;  %v6642_v44 = vld [vmem:[#allocation2 + $0x3e0] ss:$16 sps:$4 sm:$0xff]  }
 0x164   : > { %v1047_v25 = vpack.c.bf16 %v947_v17, %v943_v16  ;;  %v6633_v17 = vld [vmem:[#allocation2 + $0x3c0] ss:$16 sps:$4 sm:$0xff]  }
 0x165   : > { %v1048_v27 = vpack.c.bf16 %v948_v23, %v944_v22  ;;  %v613_v28 = vpop.f32.mrb[28].mxu0  ;;  %2093 = vmatpush1.bf16.msra.mxu0 %v6606_v0  ;;  %2479 = vmatpush1.bf16.msra.mxu1 %v6630_v11  ;;  %v7400_v12 = vpack.c.bf16 %v949_v5, %v945_v50 }
 0x166   : > { %v614_v33 = vadd.f32 %v613_v28, %v7301_v2  ;;  %v615_v35 = vpop.f32.mrb[29].mxu0  ;;  %2094 = vmatprep.subr.bf16.mxu0 %v6617_v10  ;;  %2480 = vmatprep.subr.bf16.mxu1 %v6638_v19  ;;  %v950_v10 = vmax.f32 %v803_v60, 0.0  ;;  %v6645_v19 = vld [vmem:[#allocation2 + $0x3c8] ss:$16 sps:$4 sm:$0xff]  }
 0x167   : > { %v616_v42 = vadd.f32 %v615_v35, %v7304_v3  ;;  %v617_v43 = vpop.f32.mrb[30].mxu0  ;;  %1969 = vmatprep.mubr.bf16.mxu0 %v1048_v27  ;;  %2355 = vmatprep.mubr.bf16.mxu1 %v1048_v27  ;;  %v806_v22 = vpop.f32.mrb[28].mxu1  ;;  %v6650_v27 = vld [vmem:[#allocation2 + $0x3ec] ss:$16 sps:$4 sm:$0xff]  }
 0x168   : > { %v618_v47 = vadd.f32 %v617_v43, %v7301_v2  ;;  %v619_v48 = vpop.f32.mrb[31].mxu0  ;;  %1970 = vmatmul.mubr.bf16.gmra.mrb[88].mxu0 %v1047_v25  ;;  %2356 = vmatmul.mubr.bf16.gmra.mrb[88].mxu1 %v1047_v25  ;;  %v951_v63 = vmax.f32 %v614_v33, 0.0  ;;  %v7402_v20 = vpack.c.bf16 %v950_v10, %v946_v58  ;;  %v6644_v25 = vld [vmem:[#allocation2 + $0x3e4] ss:$16 sps:$4 sm:$0xff]   ;;  %v807_v28 = vadd.f32 %v806_v22, %v7315_v15 }
 0x169   : > { %v620_v53 = vadd.f32 %v619_v48, %v7304_v3  ;;  %2095 = vmatpush1.bf16.msra.mxu0 %v6615_v29  ;;  %2481 = vmatpush1.bf16.msra.mxu1 %v6636_v30  ;;  %v952_v7 = vmax.f32 %v616_v42, 0.0  ;;  %v808_v29 = vpop.f32.mrb[29].mxu1 }
 0x16a   : > { %v955_v0 = vmax.f32 %v618_v47, 0.0  ;;  %2096 = vmatprep.subr.bf16.mxu0 %v6626_v36  ;;  %2482 = vmatprep.subr.bf16.mxu1 %v6641_v37  ;;  %v809_v33 = vadd.f32 %v808_v29, %v7318_v18  ;;  %v810_v35 = vpop.f32.mrb[30].mxu1  ;;  %v953_v38 = vmax.f32 %v807_v28, 0.0 }
 0x16b   : > { %v956_v8 = vmax.f32 %v620_v53, 0.0  ;;  %v811_v41 = vadd.f32 %v810_v35, %v7315_v15  ;;  %v812_v42 = vpop.f32.mrb[31].mxu1 }
 0x16c   : > { %v1051_v11 = vpack.c.bf16 %v955_v0, %v951_v63  ;;  %v954_v47 = vmax.f32 %v809_v33, 0.0  ;;  %v813_v48 = vadd.f32 %v812_v42, %v7318_v18 }
 0x16d   : > { %v1052_v13 = vpack.c.bf16 %v956_v8, %v952_v7  ;;  %v623_v16 = vpop.f32.mrb[32].mxu0  ;;  %2097 = vmatpush1.bf16.msra.mxu0 %v6624_v49  ;;  %2483 = vmatpush1.bf16.msra.mxu1 %v6639_v57  ;;  %v957_v51 = vmax.f32 %v811_v41, 0.0 }
 0x16e   : > { %v624_v23 = vadd.f32 %v623_v16, %v7301_v2  ;;  %v625_v24 = vpop.f32.mrb[33].mxu0  ;;  %2098 = vmatprep.subr.bf16.mxu0 %v6635_v56  ;;  %2484 = vmatprep.subr.bf16.mxu1 %v6647_v4  ;;  %v958_v56 = vmax.f32 %v813_v48, 0.0 }
 0x16f   : > { %v626_v30 = vadd.f32 %v625_v24, %v7304_v3  ;;  %v627_v32 = vpop.f32.mrb[34].mxu0  ;;  %1979 = vmatprep.mubr.bf16.mxu0 %v1052_v13  ;;  %2365 = vmatprep.mubr.bf16.mxu1 %v1052_v13  ;;  %v7412_v58 = vpack.c.bf16 %v957_v51, %v953_v38  ;;  %v816_v4 = vpop.f32.mrb[32].mxu1 }
 0x170   : > { %v628_v36 = vadd.f32 %v627_v32, %v7301_v2  ;;  %v629_v37 = vpop.f32.mrb[35].mxu0  ;;  %1980 = vmatmul.mubr.bf16.gmra.mrb[92].mxu0 %v1051_v11  ;;  %2366 = vmatmul.mubr.bf16.gmra.mrb[92].mxu1 %v1051_v11  ;;  %v959_v49 = vmax.f32 %v624_v23, 0.0  ;;  %v7414_v0 = vpack.c.bf16 %v958_v56, %v954_v47  ;;  %v817_v8 = vadd.f32 %v816_v4, %v7315_v15  ;;  %v818_v10 = vpop.f32.mrb[33].mxu1 }
 0x171   : > { %v630_v43 = vadd.f32 %v629_v37, %v7304_v3  ;;  %2099 = vmatpush1.bf16.msra.mxu0 %v6633_v17  ;;  %2485 = vmatpush1.bf16.msra.mxu1 %v6645_v19  ;;  %v960_v52 = vmax.f32 %v626_v30, 0.0  ;;  %v819_v16 = vadd.f32 %v818_v10, %v7318_v18  ;;  %v820_v17 = vpop.f32.mrb[34].mxu1 }
 0x172   : > { %v963_v50 = vmax.f32 %v628_v36, 0.0  ;;  %2100 = vmatprep.subr.bf16.mxu0 %v6644_v25  ;;  %2486 = vmatprep.subr.bf16.mxu1 %v6650_v27  ;;  %v961_v23 = vmax.f32 %v817_v8, 0.0  ;;  %v821_v24 = vadd.f32 %v820_v17, %v7315_v15  ;;  %v822_v25 = vpop.f32.mrb[35].mxu1 }
 0x173   : > { %v964_v53 = vmax.f32 %v630_v43, 0.0  ;;  %v962_v28 = vmax.f32 %v819_v16, 0.0  ;;  %v823_v29 = vadd.f32 %v822_v25, %v7318_v18 }
 0x174   : > { %v1055_v57 = vpack.c.bf16 %v963_v50, %v959_v49  ;;  %v965_v33 = vmax.f32 %v821_v24, 0.0 }
 0x175   : > { %v1056_v60 = vpack.c.bf16 %v964_v53, %v960_v52  ;;  %v633_v63 = vpop.f32.mrb[36].mxu0  ;;  %2101 = vmatpush1.bf16.msra.mxu0 %v6642_v44  ;;  %2487 = vmatpush1.bf16.msra.mxu1 %v6648_v46  ;;  %v966_v37 = vmax.f32 %v823_v29, 0.0 }
 0x176   : > { %v634_v5 = vadd.f32 %v633_v63, %v7301_v2  ;;  %v635_v7 = vpop.f32.mrb[37].mxu0  ;;  %v7424_v41 = vpack.c.bf16 %v965_v33, %v961_v23 }
 0x177   : > { %v636_v11 = vadd.f32 %v635_v7, %v7304_v3  ;;  %v637_v13 = vpop.f32.mrb[38].mxu0  ;;  %1989 = vmatprep.mubr.bf16.mxu0 %v1056_v60  ;;  %2375 = vmatprep.mubr.bf16.mxu1 %v1056_v60  ;;  %v7426_v44 = vpack.c.bf16 %v966_v37, %v962_v28  ;;  %v826_v46 = vpop.f32.mrb[36].mxu1 }
 0x178   : > { %v638_v19 = vadd.f32 %v637_v13, %v7301_v2  ;;  %v639_v22 = vpop.f32.mrb[39].mxu0  ;;  %1990 = vmatmul.mubr.bf16.gmra.mrb[96].mxu0 %v1055_v57  ;;  %2376 = vmatmul.mubr.bf16.gmra.mrb[96].mxu1 %v1055_v57  ;;  %v967_v30 = vmax.f32 %v634_v5, 0.0  ;;  %v827_v49 = vadd.f32 %v826_v46, %v7315_v15  ;;  %v828_v50 = vpop.f32.mrb[37].mxu1 }
 0x179   : > { %v640_v27 = vadd.f32 %v639_v22, %v7304_v3  ;;  %v968_v35 = vmax.f32 %v636_v11, 0.0  ;;  %v829_v53 = vadd.f32 %v828_v50, %v7318_v18  ;;  %v830_v56 = vpop.f32.mrb[38].mxu1 }
 0x17a   : > { %v971_v32 = vmax.f32 %v638_v19, 0.0  ;;  %v969_v63 = vmax.f32 %v827_v49, 0.0  ;;  %v831_v4 = vadd.f32 %v830_v56, %v7315_v15  ;;  %v832_v5 = vpop.f32.mrb[39].mxu1 }
 0x17b   : > { %v972_v36 = vmax.f32 %v640_v27, 0.0  ;;  %v970_v8 = vmax.f32 %v829_v53, 0.0  ;;  %v833_v10 = vadd.f32 %v832_v5, %v7318_v18 }
 0x17c   : > { %v1059_v38 = vpack.c.bf16 %v971_v32, %v967_v30  ;;  %v973_v16 = vmax.f32 %v831_v4, 0.0 }
 0x17d   : > { %v1060_v42 = vpack.c.bf16 %v972_v36, %v968_v35  ;;  %v643_v43 = vpop.f32.mrb[40].mxu0  ;;  %v974_v22 = vmax.f32 %v833_v10, 0.0 }
 0x17e   : > { %v644_v47 = vadd.f32 %v643_v43, %v7301_v2  ;;  %v645_v48 = vpop.f32.mrb[41].mxu0  ;;  %v7436_v24 = vpack.c.bf16 %v973_v16, %v969_v63 }
 0x17f   : > { %v646_v51 = vadd.f32 %v645_v48, %v7304_v3  ;;  %v647_v52 = vpop.f32.mrb[42].mxu0  ;;  %1999 = vmatprep.mubr.bf16.mxu0 %v1060_v42  ;;  %2385 = vmatprep.mubr.bf16.mxu1 %v1060_v42  ;;  %v7438_v28 = vpack.c.bf16 %v974_v22, %v970_v8  ;;  %v836_v29 = vpop.f32.mrb[40].mxu1 }
 0x180   : > { %v648_v57 = vadd.f32 %v647_v52, %v7301_v2  ;;  %v649_v60 = vpop.f32.mrb[43].mxu0  ;;  %2000 = vmatmul.mubr.bf16.gmra.mrb[100].mxu0 %v1059_v38  ;;  %2386 = vmatmul.mubr.bf16.gmra.mrb[100].mxu1 %v1059_v38  ;;  %v975_v11 = vmax.f32 %v644_v47, 0.0  ;;  %v837_v33 = vadd.f32 %v836_v29, %v7315_v15  ;;  %v838_v35 = vpop.f32.mrb[41].mxu1 }
 0x181   : > { %v650_v7 = vadd.f32 %v649_v60, %v7304_v3  ;;  %v976_v17 = vmax.f32 %v646_v51, 0.0  ;;  %v839_v38 = vadd.f32 %v838_v35, %v7318_v18  ;;  %v840_v42 = vpop.f32.mrb[42].mxu1 }
 0x182   : > { %v979_v13 = vmax.f32 %v648_v57, 0.0  ;;  %v977_v47 = vmax.f32 %v837_v33, 0.0  ;;  %v841_v48 = vadd.f32 %v840_v42, %v7315_v15  ;;  %v842_v49 = vpop.f32.mrb[43].mxu1 }
 0x183   : > { %v980_v19 = vmax.f32 %v650_v7, 0.0  ;;  %v978_v51 = vmax.f32 %v839_v38, 0.0  ;;  %v843_v52 = vadd.f32 %v842_v49, %v7318_v18  ;;  %v6656_v49 = vld [vmem:[#allocation5 + $0xc] ss:$16 sps:$4 sm:$0xff]  }
 0x184   : > { %v1063_v23 = vpack.c.bf16 %v979_v13, %v975_v11  ;;  %v981_v57 = vmax.f32 %v841_v48, 0.0  ;;  %4017 = vmatprep.subr.bf16.mxu1 %v6656_v49 }
 0x185   : > { %v1064_v25 = vpack.c.bf16 %v980_v19, %v976_v17  ;;  %v653_v27 = vpop.f32.mrb[44].mxu0  ;;  %v982_v4 = vmax.f32 %v843_v52, 0.0 }
 0x186   : > { %v654_v30 = vadd.f32 %v653_v27, %v7301_v2  ;;  %v655_v32 = vpop.f32.mrb[45].mxu0  ;;  %v7448_v7 = vpack.c.bf16 %v981_v57, %v977_v47 }
 0x187   : > { %v656_v36 = vadd.f32 %v655_v32, %v7304_v3  ;;  %v657_v37 = vpop.f32.mrb[46].mxu0  ;;  %2009 = vmatprep.mubr.bf16.mxu0 %v1064_v25  ;;  %2395 = vmatprep.mubr.bf16.mxu1 %v1064_v25  ;;  %v7450_v11 = vpack.c.bf16 %v982_v4, %v978_v51  ;;  %v846_v13 = vpop.f32.mrb[44].mxu1 }
 0x188   : > { %v658_v43 = vadd.f32 %v657_v37, %v7301_v2  ;;  %v659_v46 = vpop.f32.mrb[47].mxu0  ;;  %2010 = vmatmul.mubr.bf16.gmra.mrb[104].mxu0 %v1063_v23  ;;  %2396 = vmatmul.mubr.bf16.gmra.mrb[104].mxu1 %v1063_v23  ;;  %v983_v53 = vmax.f32 %v654_v30, 0.0  ;;  %v847_v19 = vadd.f32 %v846_v13, %v7315_v15  ;;  %v848_v22 = vpop.f32.mrb[45].mxu1 }
 0x189   : > { %v660_v50 = vadd.f32 %v659_v46, %v7304_v3  ;;  %v984_v60 = vmax.f32 %v656_v36, 0.0  ;;  %v849_v27 = vadd.f32 %v848_v22, %v7318_v18  ;;  %v850_v29 = vpop.f32.mrb[46].mxu1 }
 0x18a   : > { %v987_v56 = vmax.f32 %v658_v43, 0.0  ;;  %v985_v33 = vmax.f32 %v847_v19, 0.0  ;;  %v851_v35 = vadd.f32 %v850_v29, %v7315_v15  ;;  %v852_v36 = vpop.f32.mrb[47].mxu1  ;;  %v6653_v43 = vld [vmem:[#allocation5 + $0x4] ss:$16 sps:$4 sm:$0xff]  }
 0x18b   : > { %v988_v63 = vmax.f32 %v660_v50, 0.0  ;;  %v986_v38 = vmax.f32 %v849_v27, 0.0  ;;  %v853_v42 = vadd.f32 %v852_v36, %v7318_v18  ;;  %3631 = vmatprep.subr.bf16.mxu0 %v6653_v43 }
 0x18c   : > { %v1067_v5 = vpack.c.bf16 %v987_v56, %v983_v53  ;;  %v989_v48 = vmax.f32 %v851_v35, 0.0 }
 0x18d   : > { %v1068_v8 = vpack.c.bf16 %v988_v63, %v984_v60  ;;  %v663_v10 = vpop.f32.mrb[48].mxu0  ;;  %v990_v52 = vmax.f32 %v853_v42, 0.0 }
 0x18e   : > { %v664_v16 = vadd.f32 %v663_v10, %v7301_v2  ;;  %v665_v17 = vpop.f32.mrb[49].mxu0  ;;  %v7460_v56 = vpack.c.bf16 %v989_v48, %v985_v33 }
 0x18f   : > { %v666_v23 = vadd.f32 %v665_v17, %v7304_v3  ;;  %v667_v25 = vpop.f32.mrb[50].mxu0  ;;  %2019 = vmatprep.mubr.bf16.mxu0 %v1068_v8  ;;  %2405 = vmatprep.mubr.bf16.mxu1 %v1068_v8  ;;  %v7462_v63 = vpack.c.bf16 %v990_v52, %v986_v38  ;;  %v856_v4 = vpop.f32.mrb[48].mxu1 }
 0x190   : > { %v668_v30 = vadd.f32 %v667_v25, %v7301_v2  ;;  %v669_v32 = vpop.f32.mrb[51].mxu0  ;;  %2020 = vmatmul.mubr.bf16.gmra.mrb[108].mxu0 %v1067_v5  ;;  %2406 = vmatmul.mubr.bf16.gmra.mrb[108].mxu1 %v1067_v5  ;;  %v991_v46 = vmax.f32 %v664_v16, 0.0  ;;  %v857_v10 = vadd.f32 %v856_v4, %v7315_v15  ;;  %v858_v13 = vpop.f32.mrb[49].mxu1 }
 0x191   : > { %v670_v37 = vadd.f32 %v669_v32, %v7304_v3  ;;  %v992_v50 = vmax.f32 %v666_v23, 0.0  ;;  %v859_v19 = vadd.f32 %v858_v13, %v7318_v18  ;;  %v860_v22 = vpop.f32.mrb[50].mxu1 }
 0x192   : > { %v995_v47 = vmax.f32 %v668_v30, 0.0  ;;  %v993_v27 = vmax.f32 %v857_v10, 0.0  ;;  %v861_v29 = vadd.f32 %v860_v22, %v7315_v15  ;;  %v862_v30 = vpop.f32.mrb[51].mxu1 }
 0x193   : > { %v996_v51 = vmax.f32 %v670_v37, 0.0  ;;  %v994_v33 = vmax.f32 %v859_v19, 0.0  ;;  %v863_v35 = vadd.f32 %v862_v30, %v7318_v18 }
 0x194   : > { %v1071_v53 = vpack.c.bf16 %v995_v47, %v991_v46  ;;  %v997_v38 = vmax.f32 %v861_v29, 0.0 }
 0x195   : > { %v1072_v57 = vpack.c.bf16 %v996_v51, %v992_v50  ;;  %v673_v60 = vpop.f32.mrb[52].mxu0  ;;  %v998_v46 = vmax.f32 %v863_v35, 0.0 }
 0x196   : > { %v674_v5 = vadd.f32 %v673_v60, %v7301_v2  ;;  %v675_v8 = vpop.f32.mrb[53].mxu0  ;;  %v7472_v48 = vpack.c.bf16 %v997_v38, %v993_v27 }
 0x197   : > { %v676_v16 = vadd.f32 %v675_v8, %v7304_v3  ;;  %v677_v17 = vpop.f32.mrb[54].mxu0  ;;  %2029 = vmatprep.mubr.bf16.mxu0 %v1072_v57  ;;  %2415 = vmatprep.mubr.bf16.mxu1 %v1072_v57  ;;  %v7474_v51 = vpack.c.bf16 %v998_v46, %v994_v33  ;;  %v866_v52 = vpop.f32.mrb[52].mxu1 }
 0x198   : > { %v678_v23 = vadd.f32 %v677_v17, %v7301_v2  ;;  %v679_v25 = vpop.f32.mrb[55].mxu0  ;;  %2030 = vmatmul.mubr.bf16.gmra.mrb[112].mxu0 %v1071_v53  ;;  %2416 = vmatmul.mubr.bf16.gmra.mrb[112].mxu1 %v1071_v53  ;;  %v999_v36 = vmax.f32 %v674_v5, 0.0  ;;  %v867_v60 = vadd.f32 %v866_v52, %v7315_v15  ;;  %v868_v4 = vpop.f32.mrb[53].mxu1 }
 0x199   : > { %v680_v32 = vadd.f32 %v679_v25, %v7304_v3  ;;  %v1000_v42 = vmax.f32 %v676_v16, 0.0  ;;  %v869_v10 = vadd.f32 %v868_v4, %v7318_v18  ;;  %v870_v13 = vpop.f32.mrb[54].mxu1 }
 0x19a   : > { %v1003_v37 = vmax.f32 %v678_v23, 0.0  ;;  %v1001_v19 = vmax.f32 %v867_v60, 0.0  ;;  %v871_v22 = vadd.f32 %v870_v13, %v7315_v15  ;;  %v872_v23 = vpop.f32.mrb[55].mxu1 }
 0x19b   : > { %v1004_v43 = vmax.f32 %v680_v32, 0.0  ;;  %v1002_v27 = vmax.f32 %v869_v10, 0.0  ;;  %v873_v29 = vadd.f32 %v872_v23, %v7318_v18 }
 0x19c   : > { %v1075_v47 = vpack.c.bf16 %v1003_v37, %v999_v36  ;;  %v1005_v33 = vmax.f32 %v871_v22, 0.0 }
 0x19d   : > { %v1076_v49 = vpack.c.bf16 %v1004_v43, %v1000_v42  ;;  %v683_v50 = vpop.f32.mrb[56].mxu0  ;;  %v1006_v37 = vmax.f32 %v873_v29, 0.0 }
 0x19e   : > { %v684_v53 = vadd.f32 %v683_v50, %v7301_v2  ;;  %v685_v57 = vpop.f32.mrb[57].mxu0  ;;  %v7484_v42 = vpack.c.bf16 %v1005_v33, %v1001_v19 }
 0x19f   : > { %v686_v5 = vadd.f32 %v685_v57, %v7304_v3  ;;  %v687_v8 = vpop.f32.mrb[58].mxu0  ;;  %2039 = vmatprep.mubr.bf16.mxu0 %v1076_v49  ;;  %2425 = vmatprep.mubr.bf16.mxu1 %v1076_v49  ;;  %v876_v49 = vpop.f32.mrb[56].mxu1 }
 0x1a0   : > { %v688_v16 = vadd.f32 %v687_v8, %v7301_v2  ;;  %v689_v17 = vpop.f32.mrb[59].mxu0  ;;  %2040 = vmatmul.mubr.bf16.gmra.mrb[116].mxu0 %v1075_v47  ;;  %2426 = vmatmul.mubr.bf16.gmra.mrb[116].mxu1 %v1075_v47  ;;  %v1007_v30 = vmax.f32 %v684_v53, 0.0  ;;  %v7486_v47 = vpack.c.bf16 %v1006_v37, %v1002_v27  ;;  %v877_v57 = vadd.f32 %v876_v49, %v7315_v15  ;;  %v878_v60 = vpop.f32.mrb[57].mxu1 }
 0x1a1   : > { %v690_v25 = vadd.f32 %v689_v17, %v7304_v3  ;;  %v1008_v35 = vmax.f32 %v686_v5, 0.0  ;;  %v879_v5 = vadd.f32 %v878_v60, %v7318_v18  ;;  %v880_v8 = vpop.f32.mrb[58].mxu1 }
 0x1a2   : > { %v1011_v32 = vmax.f32 %v688_v16, 0.0  ;;  %v1009_v16 = vmax.f32 %v877_v57, 0.0  ;;  %v881_v17 = vadd.f32 %v880_v8, %v7315_v15  ;;  %v882_v19 = vpop.f32.mrb[59].mxu1 }
 0x1a3   : > { %v1012_v36 = vmax.f32 %v690_v25, 0.0  ;;  %v1010_v23 = vmax.f32 %v879_v5, 0.0  ;;  %v883_v25 = vadd.f32 %v882_v19, %v7318_v18  ;;  %v6659_v19 = vld [vmem:[#allocation5 + $0x24] ss:$16 sps:$4 sm:$0xff]  }
 0x1a4   : > { %v1079_v38 = vpack.c.bf16 %v1011_v32, %v1007_v30  ;;  %v1013_v30 = vmax.f32 %v881_v17, 0.0  ;;  %v6654_v17 = vld [vmem:[#allocation5 + $0x8] ss:$16 sps:$4 sm:$0xff]  }
 0x1a5   : > { %v1080_v43 = vpack.c.bf16 %v1012_v36, %v1008_v35  ;;  %v693_v46 = vpop.f32.mrb[60].mxu0  ;;  %v1014_v35 = vmax.f32 %v883_v25, 0.0  ;;  %v6663_v25 = vld [vmem:[#allocation5 + $0x40] ss:$16 sps:$4 sm:$0xff]  }
 0x1a6   : > { %v694_v50 = vadd.f32 %v693_v46, %v7301_v2  ;;  %v695_v52 = vpop.f32.mrb[61].mxu0 }
 0x1a7   : > { %v696_v53 = vadd.f32 %v695_v52, %v7304_v3  ;;  %v697_v4 = vpop.f32.mrb[62].mxu0  ;;  %2049 = vmatprep.mubr.bf16.mxu0 %v1080_v43  ;;  %2435 = vmatprep.mubr.bf16.mxu1 %v1080_v43  ;;  %v886_v43 = vpop.f32.mrb[60].mxu1 }
 0x1a8   : > { %v698_v10 = vadd.f32 %v697_v4, %v7301_v2  ;;  %v699_v13 = vpop.f32.mrb[63].mxu0  ;;  %2050 = vmatmul.mubr.bf16.gmra.mrb[120].mxu0 %v1079_v38  ;;  %2436 = vmatmul.mubr.bf16.gmra.mrb[120].mxu1 %v1079_v38  ;;  %v1015_v27 = vmax.f32 %v694_v50, 0.0  ;;  %v7496_v2 = vpack.c.bf16 %v1013_v30, %v1009_v16  ;;  %v7498_v38 = vpack.c.bf16 %v1014_v35, %v1010_v23  ;;  %v888_v49 = vpop.f32.mrb[61].mxu1  ;;  %v6651_v16 = vld [vmem:[#allocation5] ss:$16 sps:$4 sm:$0xff]  }
 0x1a9   : > { %v700_v22 = vadd.f32 %v699_v13, %v7304_v3  ;;  %v1016_v32 = vmax.f32 %v696_v53, 0.0  ;;  %v887_v46 = vadd.f32 %v886_v43, %v7315_v15  ;;  %v889_v3 = vadd.f32 %v888_v49, %v7318_v18  ;;  %v890_v50 = vpop.f32.mrb[62].mxu1  ;;  %v6668_v23 = vld [vmem:[#allocation5 + $0x4c] ss:$16 sps:$4 sm:$0xff]   ;;  %v6672_v30 = vld [vmem:[#allocation5 + $0x68] ss:$16 sps:$4 sm:$0xff]  }
 0x1aa   : > { %v1019_v29 = vmax.f32 %v698_v10, 0.0  ;;  %v891_v57 = vadd.f32 %v890_v50, %v7315_v15  ;;  %v892_v60 = vpop.f32.mrb[63].mxu1  ;;  %v6657_v15 = vld [vmem:[#allocation5 + $0x20] ss:$16 sps:$4 sm:$0xff]   ;;  %v6684_v43 = vld [vmem:[#allocation5 + $0xa8] ss:$16 sps:$4 sm:$0xff]  }
 0x1ab   : > { %v1020_v33 = vmax.f32 %v700_v22, 0.0  ;;  %v1017_v52 = vmax.f32 %v887_v46, 0.0  ;;  %v1018_v53 = vmax.f32 %v889_v3, 0.0  ;;  %v893_v4 = vadd.f32 %v892_v60, %v7318_v18  ;;  %v6662_v22 = vld [vmem:[#allocation5 + $0x2c] ss:$16 sps:$4 sm:$0xff]  }
 0x1ac   : > { %v1083_v36 = vpack.c.bf16 %v1019_v29, %v1015_v27  ;;  %v1021_v5 = vmax.f32 %v891_v57, 0.0  ;;  %v6660_v18 = vld [vmem:[#allocation5 + $0x28] ss:$16 sps:$4 sm:$0xff]   ;;  %v6671_v29 = vld [vmem:[#allocation5 + $0x64] ss:$16 sps:$4 sm:$0xff]  }
 0x1ad   : > { %v1084_v37 = vpack.c.bf16 %v1020_v33, %v1016_v32  ;;  %v1022_v8 = vmax.f32 %v893_v4, 0.0  ;;  %v6666_v27 = vld [vmem:[#allocation5 + $0x48] ss:$16 sps:$4 sm:$0xff]   ;;  %v6677_v32 = vld [vmem:[#allocation5 + $0x84] ss:$16 sps:$4 sm:$0xff]  }
 0x1ae   : > { %v7506_v10 = vpack.c.bf16 %v1021_v5, %v1017_v52  ;;  %v6680_v33 = vld [vmem:[#allocation5 + $0x8c] ss:$16 sps:$4 sm:$0xff]   ;;  %v6675_v35 = vld [vmem:[#allocation5 + $0x80] ss:$16 sps:$4 sm:$0xff]   ;;  %v6689_v46 = vld [vmem:[#allocation5 + $0xc4] ss:$16 sps:$4 sm:$0xff]  }
 0x1af   : > { %2059 = vmatprep.mubr.bf16.mxu0 %v1084_v37  ;;  %2445 = vmatprep.mubr.bf16.mxu1 %v1084_v37  ;;  %v7508_v13 = vpack.c.bf16 %v1022_v8, %v1018_v53  ;;  %v6683_v37 = vld [vmem:[#allocation5 + $0xa4] ss:$16 sps:$4 sm:$0xff]   ;;  %v6692_v49 = vld [vmem:[#allocation5 + $0xcc] ss:$16 sps:$4 sm:$0xff]   ;;  %v6687_v3 = vld [vmem:[#allocation5 + $0xc0] ss:$16 sps:$4 sm:$0xff]  }
 0x1b0   : > { %2060 = vmatmul.mubr.bf16.gmra.mrb[124].mxu0 %v1083_v36  ;;  %2446 = vmatmul.mubr.bf16.gmra.mrb[124].mxu1 %v1083_v36  ;;  %v6678_v36 = vld [vmem:[#allocation5 + $0x88] ss:$16 sps:$4 sm:$0xff]   ;;  %v6695_v52 = vld [vmem:[#allocation5 + $0xe4] ss:$16 sps:$4 sm:$0xff]   ;;  %v6704_v53 = vld [vmem:[#allocation5 + $0x10c] ss:$16 sps:$4 sm:$0xff]  }
 0x1b1   : > { %2102 = vmatprep.mubr.bf16.mxu0 %v7330_v59  ;;  %2488 = vmatprep.mubr.bf16.mxu1 %v7330_v59  ;;  %v6665_v59 = vld [vmem:[#allocation5 + $0x44] ss:$16 sps:$4 sm:$0xff]   ;;  %v6690_v50 = vld [vmem:[#allocation5 + $0xc8] ss:$16 sps:$4 sm:$0xff]   ;;  %v6699_v4 = vld [vmem:[#allocation5 + $0x100] ss:$16 sps:$4 sm:$0xff]  }
 0x1b2   : > { %v6696_v57 = vld [vmem:[#allocation5 + $0xe8] ss:$16 sps:$4 sm:$0xff]   ;;  %v6701_v60 = vld [vmem:[#allocation5 + $0x104] ss:$16 sps:$4 sm:$0xff]  }
 0x1b3   : > { %v6702_v5 = vld [vmem:[#allocation5 + $0x108] ss:$16 sps:$4 sm:$0xff]   ;;  %v6707_v8 = vld [vmem:[#allocation5 + $0x124] ss:$16 sps:$4 sm:$0xff]  }
 0x1b8   : > { %2103 = vmatmul.mubr.bf16.vlgmr.msra.gmra.mrb[64].mxu0 %v7328_v54  ;;  %2489 = vmatmul.mubr.bf16.vlgmr.msra.gmra.mrb[64].mxu1 %v7328_v54  ;;  %v6674_v54 = vld [vmem:[#allocation5 + $0x6c] ss:$16 sps:$4 sm:$0xff]  }
 0x1b9   : > { %2112 = vmatprep.mubr.bf16.mxu0 %v7342_v39  ;;  %2498 = vmatprep.mubr.bf16.mxu1 %v7342_v39  ;;  %v6669_v39 = vld [vmem:[#allocation5 + $0x60] ss:$16 sps:$4 sm:$0xff]  }
 0x1ba   : > { %3632 = vmatpush1.bf16.msra.mxu0 %v6651_v16  ;;  %4018 = vmatpush1.bf16.msra.mxu1 %v6654_v17  ;;  %v6708_v16 = vld [vmem:[#allocation5 + $0x128] ss:$16 sps:$4 sm:$0xff]   ;;  %v6713_v17 = vld [vmem:[#allocation5 + $0x144] ss:$16 sps:$4 sm:$0xff]  }
 0x1bb   : > { %3633 = vmatprep.subr.bf16.mxu0 %v6659_v19  ;;  %4019 = vmatprep.subr.bf16.mxu1 %v6662_v22  ;;  %v6716_v19 = vld [vmem:[#allocation5 + $0x14c] ss:$16 sps:$4 sm:$0xff]   ;;  %v6711_v22 = vld [vmem:[#allocation5 + $0x140] ss:$16 sps:$4 sm:$0xff]  }
 0x1be   : > { %3634 = vmatpush1.bf16.msra.mxu0 %v6657_v15  ;;  %4020 = vmatpush1.bf16.msra.mxu1 %v6660_v18  ;;  %v6714_v15 = vld [vmem:[#allocation5 + $0x148] ss:$16 sps:$4 sm:$0xff]   ;;  %v6719_v18 = vld [vmem:[#allocation5 + $0x164] ss:$16 sps:$4 sm:$0xff]  }
 0x1bf   : > { %3635 = vmatprep.subr.bf16.mxu0 %v6665_v59  ;;  %4021 = vmatprep.subr.bf16.mxu1 %v6668_v23  ;;  %v6720_v59 = vld [vmem:[#allocation5 + $0x168] ss:$16 sps:$4 sm:$0xff]   ;;  %v6725_v23 = vld [vmem:[#allocation5 + $0x184] ss:$16 sps:$4 sm:$0xff]  }
 0x1c0   : > { %2113 = vmatmul.mubr.bf16.gmra.mrb[68].mxu0 %v7340_v34  ;;  %2499 = vmatmul.mubr.bf16.gmra.mrb[68].mxu1 %v7340_v34  ;;  %v6686_v34 = vld [vmem:[#allocation5 + $0xac] ss:$16 sps:$4 sm:$0xff]  }
 0x1c1   : > { %2122 = vmatprep.mubr.bf16.mxu0 %v7354_v21  ;;  %2508 = vmatprep.mubr.bf16.mxu1 %v7354_v21  ;;  %v6681_v21 = vld [vmem:[#allocation5 + $0xa0] ss:$16 sps:$4 sm:$0xff]  }
 0x1c2   : > { %3636 = vmatpush1.bf16.msra.mxu0 %v6663_v25  ;;  %4022 = vmatpush1.bf16.msra.mxu1 %v6666_v27  ;;  %v6728_v25 = vld [vmem:[#allocation5 + $0x18c] ss:$16 sps:$4 sm:$0xff]   ;;  %v6723_v27 = vld [vmem:[#allocation5 + $0x180] ss:$16 sps:$4 sm:$0xff]  }
 0x1c3   : > { %3637 = vmatprep.subr.bf16.mxu0 %v6671_v29  ;;  %4023 = vmatprep.subr.bf16.mxu1 %v6674_v54  ;;  %v6726_v29 = vld [vmem:[#allocation5 + $0x188] ss:$16 sps:$4 sm:$0xff]   ;;  %v6731_v54 = vld [vmem:[#allocation5 + $0x1a4] ss:$16 sps:$4 sm:$0xff]  }
 0x1c6   : > { %3638 = vmatpush1.bf16.msra.mxu0 %v6669_v39  ;;  %4024 = vmatpush1.bf16.msra.mxu1 %v6672_v30  ;;  %v6732_v39 = vld [vmem:[#allocation5 + $0x1a8] ss:$16 sps:$4 sm:$0xff]   ;;  %v6737_v30 = vld [vmem:[#allocation5 + $0x1c4] ss:$16 sps:$4 sm:$0xff]  }
 0x1c7   : > { %3639 = vmatprep.subr.bf16.mxu0 %v6677_v32  ;;  %4025 = vmatprep.subr.bf16.mxu1 %v6680_v33  ;;  %v6740_v32 = vld [vmem:[#allocation5 + $0x1cc] ss:$16 sps:$4 sm:$0xff]   ;;  %v6735_v33 = vld [vmem:[#allocation5 + $0x1c0] ss:$16 sps:$4 sm:$0xff]  }
 0x1c8   : > { %2123 = vmatmul.mubr.bf16.gmra.mrb[72].mxu0 %v7352_v14  ;;  %2509 = vmatmul.mubr.bf16.gmra.mrb[72].mxu1 %v7352_v14  ;;  %v6698_v14 = vld [vmem:[#allocation5 + $0xec] ss:$16 sps:$4 sm:$0xff]  }
 0x1c9   : > { %2132 = vmatprep.mubr.bf16.mxu0 %v7366_v61  ;;  %2518 = vmatprep.mubr.bf16.mxu1 %v7366_v61  ;;  %v6693_v61 = vld [vmem:[#allocation5 + $0xe0] ss:$16 sps:$4 sm:$0xff]  }
 0x1ca   : > { %3640 = vmatpush1.bf16.msra.mxu0 %v6675_v35  ;;  %4026 = vmatpush1.bf16.msra.mxu1 %v6678_v36  ;;  %v6738_v35 = vld [vmem:[#allocation5 + $0x1c8] ss:$16 sps:$4 sm:$0xff]  }
 0x1cb   : > { %3641 = vmatprep.subr.bf16.mxu0 %v6683_v37  ;;  %4027 = vmatprep.subr.bf16.mxu1 %v6686_v34 }
 0x1ce   : > { %3642 = vmatpush1.bf16.msra.mxu0 %v6681_v21  ;;  %4028 = vmatpush1.bf16.msra.mxu1 %v6684_v43 }
 0x1cf   : > { %3643 = vmatprep.subr.bf16.mxu0 %v6689_v46  ;;  %4029 = vmatprep.subr.bf16.mxu1 %v6692_v49 }
 0x1d0   : > { %2133 = vmatmul.mubr.bf16.gmra.mrb[76].mxu0 %v7364_v55  ;;  %2519 = vmatmul.mubr.bf16.gmra.mrb[76].mxu1 %v7364_v55  ;;  %v6710_v55 = vld [vmem:[#allocation5 + $0x12c] ss:$16 sps:$4 sm:$0xff]  }
 0x1d1   : > { %2142 = vmatprep.mubr.bf16.mxu0 %v7378_v45  ;;  %2528 = vmatprep.mubr.bf16.mxu1 %v7378_v45  ;;  %v6705_v45 = vld [vmem:[#allocation5 + $0x120] ss:$16 sps:$4 sm:$0xff]  }
 0x1d2   : > { %3644 = vmatpush1.bf16.msra.mxu0 %v6687_v3  ;;  %4030 = vmatpush1.bf16.msra.mxu1 %v6690_v50 }
 0x1d3   : > { %3645 = vmatprep.subr.bf16.mxu0 %v6695_v52  ;;  %4031 = vmatprep.subr.bf16.mxu1 %v6698_v14 }
 0x1d6   : > { %3646 = vmatpush1.bf16.msra.mxu0 %v6693_v61  ;;  %4032 = vmatpush1.bf16.msra.mxu1 %v6696_v57 }
 0x1d7   : > { %3647 = vmatprep.subr.bf16.mxu0 %v6701_v60  ;;  %4033 = vmatprep.subr.bf16.mxu1 %v6704_v53 }
 0x1d8   : > { %2143 = vmatmul.mubr.bf16.gmra.mrb[80].mxu0 %v7376_v40  ;;  %2529 = vmatmul.mubr.bf16.gmra.mrb[80].mxu1 %v7376_v40  ;;  %v6722_v40 = vld [vmem:[#allocation5 + $0x16c] ss:$16 sps:$4 sm:$0xff]  }
 0x1d9   : > { %2152 = vmatprep.mubr.bf16.mxu0 %v7390_v31  ;;  %2538 = vmatprep.mubr.bf16.mxu1 %v7390_v31  ;;  %v6717_v31 = vld [vmem:[#allocation5 + $0x160] ss:$16 sps:$4 sm:$0xff]  }
 0x1da   : > { %3648 = vmatpush1.bf16.msra.mxu0 %v6699_v4  ;;  %4034 = vmatpush1.bf16.msra.mxu1 %v6702_v5 }
 0x1db   : > { %3649 = vmatprep.subr.bf16.mxu0 %v6707_v8  ;;  %4035 = vmatprep.subr.bf16.mxu1 %v6710_v55 }
 0x1de   : > { %3650 = vmatpush1.bf16.msra.mxu0 %v6705_v45  ;;  %4036 = vmatpush1.bf16.msra.mxu1 %v6708_v16 }
 0x1df   : > { %3651 = vmatprep.subr.bf16.mxu0 %v6713_v17  ;;  %4037 = vmatprep.subr.bf16.mxu1 %v6716_v19  ;;  %v6747_v19 = vld [vmem:[#allocation5 + $0x200] ss:$16 sps:$4 sm:$0xff]  }
 0x1e0   : > { %2153 = vmatmul.mubr.bf16.gmra.mrb[84].mxu0 %v7388_v26  ;;  %2539 = vmatmul.mubr.bf16.gmra.mrb[84].mxu1 %v7388_v26  ;;  %v6734_v26 = vld [vmem:[#allocation5 + $0x1ac] ss:$16 sps:$4 sm:$0xff]  }
 0x1e1   : > { %2162 = vmatprep.mubr.bf16.mxu0 %v7402_v20  ;;  %2548 = vmatprep.mubr.bf16.mxu1 %v7402_v20  ;;  %v6729_v20 = vld [vmem:[#allocation5 + $0x1a0] ss:$16 sps:$4 sm:$0xff]  }
 0x1e2   : > { %3652 = vmatpush1.bf16.msra.mxu0 %v6711_v22  ;;  %4038 = vmatpush1.bf16.msra.mxu1 %v6714_v15  ;;  %v6750_v22 = vld [vmem:[#allocation5 + $0x208] ss:$16 sps:$4 sm:$0xff]  }
 0x1e3   : > { %3653 = vmatprep.subr.bf16.mxu0 %v6719_v18  ;;  %4039 = vmatprep.subr.bf16.mxu1 %v6722_v40 }
 0x1e6   : > { %3654 = vmatpush1.bf16.msra.mxu0 %v6717_v31  ;;  %4040 = vmatpush1.bf16.msra.mxu1 %v6720_v59  ;;  %v6755_v59 = vld [vmem:[#allocation5 + $0x224] ss:$16 sps:$4 sm:$0xff]  }
 0x1e7   : > { %3655 = vmatprep.subr.bf16.mxu0 %v6725_v23  ;;  %4041 = vmatprep.subr.bf16.mxu1 %v6728_v25  ;;  %v6758_v23 = vld [vmem:[#allocation5 + $0x22c] ss:$16 sps:$4 sm:$0xff]  }
 0x1e8   : > { %2163 = vmatmul.mubr.bf16.gmra.mrb[88].mxu0 %v7400_v12  ;;  %2549 = vmatmul.mubr.bf16.gmra.mrb[88].mxu1 %v7400_v12  ;;  %v6743_v12 = vld [vmem:[#allocation5 + $0x1e4] ss:$16 sps:$4 sm:$0xff]  }
 0x1e9   : > { %2172 = vmatprep.mubr.bf16.mxu0 %v7414_v0  ;;  %2558 = vmatprep.mubr.bf16.mxu1 %v7414_v0  ;;  %v6741_v0 = vld [vmem:[#allocation5 + $0x1e0] ss:$16 sps:$4 sm:$0xff]  }
 0x1ea   : > { %3656 = vmatpush1.bf16.msra.mxu0 %v6723_v27  ;;  %4042 = vmatpush1.bf16.msra.mxu1 %v6726_v29 }
 0x1eb   : > { %3657 = vmatprep.subr.bf16.mxu0 %v6731_v54  ;;  %4043 = vmatprep.subr.bf16.mxu1 %v6734_v26 }
 0x1ee   : > { %3658 = vmatpush1.bf16.msra.mxu0 %v6729_v20  ;;  %4044 = vmatpush1.bf16.msra.mxu1 %v6732_v39 }
 0x1ef   : > { %3659 = vmatprep.subr.bf16.mxu0 %v6737_v30  ;;  %4045 = vmatprep.subr.bf16.mxu1 %v6740_v32 }
 0x1f0   : > { %2173 = vmatmul.mubr.bf16.gmra.mrb[92].mxu0 %v7412_v58  ;;  %2559 = vmatmul.mubr.bf16.gmra.mrb[92].mxu1 %v7412_v58  ;;  %v6746_v58 = vld [vmem:[#allocation5 + $0x1ec] ss:$16 sps:$4 sm:$0xff]  }
 0x1f1   : > { %2182 = vmatprep.mubr.bf16.mxu0 %v7426_v44  ;;  %2568 = vmatprep.mubr.bf16.mxu1 %v7426_v44  ;;  %v6749_v44 = vld [vmem:[#allocation5 + $0x204] ss:$16 sps:$4 sm:$0xff]  }
 0x1f2   : > { %3660 = vmatpush1.bf16.msra.mxu0 %v6735_v33  ;;  %4046 = vmatpush1.bf16.msra.mxu1 %v6738_v35  ;;  %v6753_v35 = vld [vmem:[#allocation5 + $0x220] ss:$16 sps:$4 sm:$0xff]  }
 0x1f3   : > { %3661 = vmatprep.subr.bf16.mxu0 %v6743_v12  ;;  %4047 = vmatprep.subr.bf16.mxu1 %v6746_v58  ;;  %v6756_v12 = vld [vmem:[#allocation5 + $0x228] ss:$16 sps:$4 sm:$0xff]   ;;  %v6761_v58 = vld [vmem:[#allocation5 + $0x244] ss:$16 sps:$4 sm:$0xff]  }
 0x1f6   : > { %3662 = vmatpush1.bf16.msra.mxu0 %v6741_v0 }
 0x1f7   : > { %3824 = vmatprep.subr.bf16.mxu0 %v6749_v44 }
 0x1f8   : > { %2183 = vmatmul.mubr.bf16.gmra.mrb[96].mxu0 %v7424_v41  ;;  %2569 = vmatmul.mubr.bf16.gmra.mrb[96].mxu1 %v7424_v41  ;;  %v6744_v41 = vld [vmem:[#allocation5 + $0x1e8] ss:$16 sps:$4 sm:$0xff]  }
 0x1f9   : > { %2192 = vmatprep.mubr.bf16.mxu0 %v7438_v28  ;;  %2578 = vmatprep.mubr.bf16.mxu1 %v7438_v28  ;;  %v1215_v28 = vld [vmem:[%s8212_s4] sm:$0xf] }
 0x1fa   : > { %4048 = vmatpush1.bf16.msra.mxu1 %v6744_v41 }
 0x200   : > { %2193 = vmatmul.mubr.bf16.gmra.mrb[100].mxu0 %v7436_v24  ;;  %2579 = vmatmul.mubr.bf16.gmra.mrb[100].mxu1 %v7436_v24  ;;  %v6752_v24 = vld [vmem:[#allocation5 + $0x20c] ss:$16 sps:$4 sm:$0xff]  }
 0x201   : > { %2202 = vmatprep.mubr.bf16.mxu0 %v7450_v11  ;;  %2588 = vmatprep.mubr.bf16.mxu1 %v7450_v11  ;;  %v7579_v11 = vrot.slane %v1215_v28, %v7307_v6 }
 0x202   : > { %4210 = vmatprep.subr.bf16.mxu1 %v6752_v24 }
 0x208   : > { %2203 = vmatmul.mubr.bf16.gmra.mrb[104].mxu0 %v7448_v7  ;;  %2589 = vmatmul.mubr.bf16.gmra.mrb[104].mxu1 %v7448_v7  ;;  %v7576_v7 = vrot.slane %v1215_v28, %v7293_v62 }
 0x209   : > { %2212 = vmatprep.mubr.bf16.mxu0 %v7462_v63  ;;  %2598 = vmatprep.mubr.bf16.mxu1 %v7462_v63  ;;  %v7585_v63 = vrot.slane %v1215_v28, %v7310_v9 }
 0x210   : > { %2213 = vmatmul.mubr.bf16.gmra.mrb[108].mxu0 %v7460_v56  ;;  %2599 = vmatmul.mubr.bf16.gmra.mrb[108].mxu1 %v7460_v56  ;;  %v7582_v56 = vrot.slane %v1215_v28, %v7298_v1  ;;  %v6764_v28 = vld [vmem:[#allocation5 + $0x24c] ss:$16 sps:$4 sm:$0xff]  }
 0x211   : > { %2222 = vmatprep.mubr.bf16.mxu0 %v7474_v51  ;;  %2608 = vmatprep.mubr.bf16.mxu1 %v7474_v51 }
 0x218   : > { %2223 = vmatmul.mubr.bf16.gmra.mrb[112].mxu0 %v7472_v48  ;;  %2609 = vmatmul.mubr.bf16.gmra.mrb[112].mxu1 %v7472_v48 }
 0x219   : > { %2232 = vmatprep.mubr.bf16.mxu0 %v7486_v47  ;;  %2618 = vmatprep.mubr.bf16.mxu1 %v7486_v47 }
 0x220   : > { %2233 = vmatmul.mubr.bf16.gmra.mrb[116].mxu0 %v7484_v42  ;;  %2619 = vmatmul.mubr.bf16.gmra.mrb[116].mxu1 %v7484_v42 }
 0x221   : > { %2242 = vmatprep.mubr.bf16.mxu0 %v7498_v38  ;;  %2628 = vmatprep.mubr.bf16.mxu1 %v7498_v38 }
 0x228   : > { %2243 = vmatmul.mubr.bf16.gmra.mrb[120].mxu0 %v7496_v2  ;;  %2629 = vmatmul.mubr.bf16.gmra.mrb[120].mxu1 %v7496_v2 }
 0x229   : > { %2252 = vmatprep.mubr.bf16.mxu0 %v7508_v13  ;;  %2638 = vmatprep.mubr.bf16.mxu1 %v7508_v13 }
 0x230   : > { %2253 = vmatmul.mubr.bf16.gmra.mrb[124].mxu0 %v7506_v10  ;;  %2639 = vmatmul.mubr.bf16.gmra.mrb[124].mxu1 %v7506_v10 }
 0x28b   : > { %v2104_v48 = vpop.f32.mrb[64].mxu0  ;;  %v2490_v51 = vpop.f32.mrb[64].mxu1 }
 0x28c   : > { %v5878_v42 = vadd.f32 %v2104_v48, %v7576_v7  ;;  %v5942_v47 = vadd.f32 %v2490_v51, %v7579_v11  ;;  %v2106_v2 = vpop.f32.mrb[65].mxu0  ;;  %v2492_v38 = vpop.f32.mrb[65].mxu1 }
 0x28d   : > { %v5879_v10 = vadd.f32 %v2106_v2, %v7582_v56  ;;  %v5943_v13 = vadd.f32 %v2492_v38, %v7585_v63  ;;  %v2108_v36 = vpop.f32.mrb[66].mxu0  ;;  %v2494_v37 = vpop.f32.mrb[66].mxu1 }
 0x28e   : > { %v5880_v34 = vadd.f32 %v2108_v36, %v7576_v7  ;;  %v5944_v21 = vadd.f32 %v2494_v37, %v7579_v11  ;;  %v2110_v43 = vpop.f32.mrb[67].mxu0  ;;  %v2496_v46 = vpop.f32.mrb[67].mxu1  ;;  %v2649_v50 = vmax.f32 %v5878_v42, 0.0  ;;  %v2651_v52 = vmax.f32 %v5942_v47, 0.0 }
 0x28f   : > { %v5881_v49 = vadd.f32 %v2110_v43, %v7582_v56  ;;  %v5945_v3 = vadd.f32 %v2496_v46, %v7585_v63  ;;  %v2650_v57 = vmax.f32 %v5879_v10, 0.0  ;;  %v2652_v60 = vmax.f32 %v5943_v13, 0.0 }
 0x290   : > { %v2653_v14 = vmax.f32 %v5880_v34, 0.0  ;;  %v2655_v61 = vmax.f32 %v5944_v21, 0.0  ;;  %v6759_v34 = vld [vmem:[#allocation5 + $0x240] ss:$16 sps:$4 sm:$0xff]   ;;  %v6762_v21 = vld [vmem:[#allocation5 + $0x248] ss:$16 sps:$4 sm:$0xff]  }
 0x291   : > { %v2654_v53 = vmax.f32 %v5881_v49, 0.0  ;;  %v2656_v4 = vmax.f32 %v5945_v3, 0.0 }
 0x292   : > { %v2777_v5 = vpack.c.bf16 %v2653_v14, %v2649_v50  ;;  %v7595_v8 = vpack.c.bf16 %v2655_v61, %v2651_v52  ;;  %v6767_v50 = vld [vmem:[#allocation5 + $0x264] ss:$16 sps:$4 sm:$0xff]   ;;  %v6770_v52 = vld [vmem:[#allocation5 + $0x26c] ss:$16 sps:$4 sm:$0xff]  }
 0x293   : > { %v2778_v55 = vpack.c.bf16 %v2654_v53, %v2650_v57  ;;  %v7597_v45 = vpack.c.bf16 %v2656_v4, %v2652_v60  ;;  %v2114_v16 = vpop.f32.mrb[68].mxu0  ;;  %v2500_v17 = vpop.f32.mrb[68].mxu1 }
 0x294   : > { %v5882_v15 = vadd.f32 %v2114_v16, %v7576_v7  ;;  %v5946_v18 = vadd.f32 %v2500_v17, %v7579_v11  ;;  %v2116_v40 = vpop.f32.mrb[69].mxu0  ;;  %v2502_v31 = vpop.f32.mrb[69].mxu1 }
 0x295   : > { %v5883_v25 = vadd.f32 %v2116_v40, %v7582_v56  ;;  %v5947_v27 = vadd.f32 %v2502_v31, %v7585_v63  ;;  %v2118_v29 = vpop.f32.mrb[70].mxu0  ;;  %v2504_v54 = vpop.f32.mrb[70].mxu1  ;;  %3663 = vmatprep.mubr.bf16.mxu0 %v2778_v55  ;;  %4049 = vmatprep.mubr.bf16.mxu1 %v2778_v55 }
 0x296   : > { %v5884_v26 = vadd.f32 %v2118_v29, %v7576_v7  ;;  %v5948_v20 = vadd.f32 %v2504_v54, %v7579_v11  ;;  %v2120_v39 = vpop.f32.mrb[71].mxu0  ;;  %v2506_v30 = vpop.f32.mrb[71].mxu1  ;;  %3664 = vmatmul.mubr.bf16.vlgmr.msra.gmra.mrb[128].mxu0 %v2777_v5  ;;  %4050 = vmatmul.mubr.bf16.vlgmr.msra.gmra.mrb[128].mxu1 %v2777_v5  ;;  %v2657_v0 = vmax.f32 %v5882_v15, 0.0  ;;  %v2659_v41 = vmax.f32 %v5946_v18, 0.0  ;;  %v6773_v15 = vld [vmem:[#allocation5 + $0x284] ss:$16 sps:$4 sm:$0xff]  }
 0x297   : > { %v5885_v32 = vadd.f32 %v2120_v39, %v7582_v56  ;;  %v5949_v33 = vadd.f32 %v2506_v30, %v7585_v63  ;;  %3825 = vmatpush1.bf16.msra.mxu0 %v6747_v19  ;;  %4211 = vmatpush1.bf16.msra.mxu1 %v6750_v22  ;;  %v2658_v48 = vmax.f32 %v5883_v25, 0.0  ;;  %v2660_v51 = vmax.f32 %v5947_v27, 0.0  ;;  %v6765_v19 = vld [vmem:[#allocation5 + $0x260] ss:$16 sps:$4 sm:$0xff]   ;;  %v6768_v22 = vld [vmem:[#allocation5 + $0x268] ss:$16 sps:$4 sm:$0xff]  }
 0x298   : > { %v2661_v44 = vmax.f32 %v5884_v26, 0.0  ;;  %v2663_v24 = vmax.f32 %v5948_v20, 0.0  ;;  %3826 = vmatprep.subr.bf16.mxu0 %v6755_v59  ;;  %4212 = vmatprep.subr.bf16.mxu1 %v6758_v23  ;;  %v6776_v23 = vld [vmem:[#allocation5 + $0x28c] ss:$16 sps:$4 sm:$0xff]  }
 0x299   : > { %v2662_v42 = vmax.f32 %v5885_v32, 0.0  ;;  %v2664_v47 = vmax.f32 %v5949_v33, 0.0 }
 0x29a   : > { %v2781_v2 = vpack.c.bf16 %v2661_v44, %v2657_v0  ;;  %v7607_v38 = vpack.c.bf16 %v2663_v24, %v2659_v41  ;;  %v6779_v24 = vld [vmem:[#allocation5 + $0x2a4] ss:$16 sps:$4 sm:$0xff]  }
 0x29b   : > { %v2782_v10 = vpack.c.bf16 %v2662_v42, %v2658_v48  ;;  %v7609_v13 = vpack.c.bf16 %v2664_v47, %v2660_v51  ;;  %v2124_v36 = vpop.f32.mrb[72].mxu0  ;;  %v2510_v37 = vpop.f32.mrb[72].mxu1  ;;  %3827 = vmatpush1.bf16.msra.mxu0 %v6753_v35  ;;  %4213 = vmatpush1.bf16.msra.mxu1 %v6756_v12  ;;  %v6771_v35 = vld [vmem:[#allocation5 + $0x280] ss:$16 sps:$4 sm:$0xff]   ;;  %v6774_v12 = vld [vmem:[#allocation5 + $0x288] ss:$16 sps:$4 sm:$0xff]  }
 0x29c   : > { %v5886_v43 = vadd.f32 %v2124_v36, %v7576_v7  ;;  %v5950_v46 = vadd.f32 %v2510_v37, %v7579_v11  ;;  %v2126_v49 = vpop.f32.mrb[73].mxu0  ;;  %v2512_v3 = vpop.f32.mrb[73].mxu1  ;;  %3828 = vmatprep.subr.bf16.mxu0 %v6761_v58  ;;  %4214 = vmatprep.subr.bf16.mxu1 %v6764_v28  ;;  %v6782_v28 = vld [vmem:[#allocation5 + $0x2ac] ss:$16 sps:$4 sm:$0xff]  }
 0x29d   : > { %v5887_v14 = vadd.f32 %v2126_v49, %v7582_v56  ;;  %v5951_v61 = vadd.f32 %v2512_v3, %v7585_v63  ;;  %v2128_v57 = vpop.f32.mrb[74].mxu0  ;;  %v2514_v60 = vpop.f32.mrb[74].mxu1  ;;  %3673 = vmatprep.mubr.bf16.mxu0 %v2782_v10  ;;  %4059 = vmatprep.mubr.bf16.mxu1 %v2782_v10  ;;  %v6785_v49 = vld [vmem:[#allocation5 + $0x2c4] ss:$16 sps:$4 sm:$0xff]  }
 0x29e   : > { %v5888_v53 = vadd.f32 %v2128_v57, %v7576_v7  ;;  %v5952_v4 = vadd.f32 %v2514_v60, %v7579_v11  ;;  %v2130_v5 = vpop.f32.mrb[75].mxu0  ;;  %v2516_v55 = vpop.f32.mrb[75].mxu1  ;;  %3674 = vmatmul.mubr.bf16.gmra.mrb[132].mxu0 %v2781_v2  ;;  %4060 = vmatmul.mubr.bf16.gmra.mrb[132].mxu1 %v2781_v2  ;;  %v2665_v18 = vmax.f32 %v5886_v43, 0.0  ;;  %v2667_v40 = vmax.f32 %v5950_v46, 0.0  ;;  %v6777_v43 = vld [vmem:[#allocation5 + $0x2a0] ss:$16 sps:$4 sm:$0xff]  }
 0x29f   : > { %v5889_v16 = vadd.f32 %v2130_v5, %v7582_v56  ;;  %v5953_v17 = vadd.f32 %v2516_v55, %v7585_v63  ;;  %3829 = vmatpush1.bf16.msra.mxu0 %v6759_v34  ;;  %4215 = vmatpush1.bf16.msra.mxu1 %v6762_v21  ;;  %v2666_v25 = vmax.f32 %v5887_v14, 0.0  ;;  %v2668_v27 = vmax.f32 %v5951_v61, 0.0  ;;  %v6780_v46 = vld [vmem:[#allocation5 + $0x2a8] ss:$16 sps:$4 sm:$0xff]   ;;  %v6788_v61 = vld [vmem:[#allocation5 + $0x2cc] ss:$16 sps:$4 sm:$0xff]  }
 0x2a0   : > { %v2669_v31 = vmax.f32 %v5888_v53, 0.0  ;;  %v2671_v59 = vmax.f32 %v5952_v4, 0.0  ;;  %3830 = vmatprep.subr.bf16.mxu0 %v6767_v50  ;;  %4216 = vmatprep.subr.bf16.mxu1 %v6770_v52 }
 0x2a1   : > { %v2670_v29 = vmax.f32 %v5889_v16, 0.0  ;;  %v2672_v54 = vmax.f32 %v5953_v17, 0.0 }
 0x2a2   : > { %v2785_v26 = vpack.c.bf16 %v2669_v31, %v2665_v18  ;;  %v7619_v20 = vpack.c.bf16 %v2671_v59, %v2667_v40  ;;  %v6786_v18 = vld [vmem:[#allocation5 + $0x2c8] ss:$16 sps:$4 sm:$0xff]  }
 0x2a3   : > { %v2786_v39 = vpack.c.bf16 %v2670_v29, %v2666_v25  ;;  %v7621_v30 = vpack.c.bf16 %v2672_v54, %v2668_v27  ;;  %v2134_v32 = vpop.f32.mrb[76].mxu0  ;;  %v2520_v33 = vpop.f32.mrb[76].mxu1  ;;  %3831 = vmatpush1.bf16.msra.mxu0 %v6765_v19  ;;  %4217 = vmatpush1.bf16.msra.mxu1 %v6768_v22  ;;  %v6791_v25 = vld [vmem:[#allocation5 + $0x2e4] ss:$16 sps:$4 sm:$0xff]   ;;  %v6794_v27 = vld [vmem:[#allocation5 + $0x2ec] ss:$16 sps:$4 sm:$0xff]  }
 0x2a4   : > { %v5890_v58 = vadd.f32 %v2134_v32, %v7576_v7  ;;  %v5954_v0 = vadd.f32 %v2520_v33, %v7579_v11  ;;  %v2136_v41 = vpop.f32.mrb[77].mxu0  ;;  %v2522_v44 = vpop.f32.mrb[77].mxu1  ;;  %3832 = vmatprep.subr.bf16.mxu0 %v6773_v15  ;;  %4218 = vmatprep.subr.bf16.mxu1 %v6776_v23  ;;  %v6783_v15 = vld [vmem:[#allocation5 + $0x2c0] ss:$16 sps:$4 sm:$0xff]  }
 0x2a5   : > { %v5891_v48 = vadd.f32 %v2136_v41, %v7582_v56  ;;  %v5955_v51 = vadd.f32 %v2522_v44, %v7585_v63  ;;  %v2138_v42 = vpop.f32.mrb[78].mxu0  ;;  %v2524_v47 = vpop.f32.mrb[78].mxu1  ;;  %3683 = vmatprep.mubr.bf16.mxu0 %v2786_v39  ;;  %4069 = vmatprep.mubr.bf16.mxu1 %v2786_v39  ;;  %v6789_v41 = vld [vmem:[#allocation5 + $0x2e0] ss:$16 sps:$4 sm:$0xff]   ;;  %v6792_v44 = vld [vmem:[#allocation5 + $0x2e8] ss:$16 sps:$4 sm:$0xff]  }
 0x2a6   : > { %v5892_v2 = vadd.f32 %v2138_v42, %v7576_v7  ;;  %v5956_v10 = vadd.f32 %v2524_v47, %v7579_v11  ;;  %v2140_v36 = vpop.f32.mrb[79].mxu0  ;;  %v2526_v37 = vpop.f32.mrb[79].mxu1  ;;  %3684 = vmatmul.mubr.bf16.gmra.mrb[136].mxu0 %v2785_v26  ;;  %4070 = vmatmul.mubr.bf16.gmra.mrb[136].mxu1 %v2785_v26  ;;  %v2673_v3 = vmax.f32 %v5890_v58, 0.0  ;;  %v2675_v50 = vmax.f32 %v5954_v0, 0.0  ;;  %v6800_v47 = vld [vmem:[#allocation5 + $0x30c] ss:$16 sps:$4 sm:$0xff]  }
 0x2a7   : > { %v5893_v34 = vadd.f32 %v2140_v36, %v7582_v56  ;;  %v5957_v21 = vadd.f32 %v2526_v37, %v7585_v63  ;;  %3833 = vmatpush1.bf16.msra.mxu0 %v6771_v35  ;;  %4219 = vmatpush1.bf16.msra.mxu1 %v6774_v12  ;;  %v2674_v57 = vmax.f32 %v5891_v48, 0.0  ;;  %v2676_v60 = vmax.f32 %v5955_v51, 0.0 }
 0x2a8   : > { %v2677_v52 = vmax.f32 %v5892_v2, 0.0  ;;  %v2679_v14 = vmax.f32 %v5956_v10, 0.0  ;;  %3834 = vmatprep.subr.bf16.mxu0 %v6779_v24  ;;  %4220 = vmatprep.subr.bf16.mxu1 %v6782_v28  ;;  %v6797_v24 = vld [vmem:[#allocation5 + $0x304] ss:$16 sps:$4 sm:$0xff]  }
 0x2a9   : > { %v2678_v53 = vmax.f32 %v5893_v34, 0.0  ;;  %v2680_v4 = vmax.f32 %v5957_v21, 0.0 }
 0x2aa   : > { %v2789_v5 = vpack.c.bf16 %v2677_v52, %v2673_v3  ;;  %v7631_v55 = vpack.c.bf16 %v2679_v14, %v2675_v50  ;;  %v6795_v50 = vld [vmem:[#allocation5 + $0x300] ss:$16 sps:$4 sm:$0xff]   ;;  %v6798_v52 = vld [vmem:[#allocation5 + $0x308] ss:$16 sps:$4 sm:$0xff]  }
 0x2ab   : > { %v2790_v16 = vpack.c.bf16 %v2678_v53, %v2674_v57  ;;  %v7633_v17 = vpack.c.bf16 %v2680_v4, %v2676_v60  ;;  %v2144_v19 = vpop.f32.mrb[80].mxu0  ;;  %v2530_v22 = vpop.f32.mrb[80].mxu1  ;;  %3835 = vmatpush1.bf16.msra.mxu0 %v6777_v43  ;;  %4221 = vmatpush1.bf16.msra.mxu1 %v6780_v46  ;;  %v6803_v53 = vld [vmem:[#allocation5 + $0x324] ss:$16 sps:$4 sm:$0xff]   ;;  %v6806_v4 = vld [vmem:[#allocation5 + $0x32c] ss:$16 sps:$4 sm:$0xff]  }
 0x2ac   : > { %v5894_v40 = vadd.f32 %v2144_v19, %v7576_v7  ;;  %v5958_v31 = vadd.f32 %v2530_v22, %v7579_v11  ;;  %v2146_v59 = vpop.f32.mrb[81].mxu0  ;;  %v2532_v23 = vpop.f32.mrb[81].mxu1  ;;  %3836 = vmatprep.subr.bf16.mxu0 %v6785_v49  ;;  %4222 = vmatprep.subr.bf16.mxu1 %v6788_v61 }
 0x2ad   : > { %v5895_v29 = vadd.f32 %v2146_v59, %v7582_v56  ;;  %v5959_v54 = vadd.f32 %v2532_v23, %v7585_v63  ;;  %v2148_v26 = vpop.f32.mrb[82].mxu0  ;;  %v2534_v39 = vpop.f32.mrb[82].mxu1  ;;  %3693 = vmatprep.mubr.bf16.mxu0 %v2790_v16  ;;  %4079 = vmatprep.mubr.bf16.mxu1 %v2790_v16 }
 0x2ae   : > { %v5896_v32 = vadd.f32 %v2148_v26, %v7576_v7  ;;  %v5960_v33 = vadd.f32 %v2534_v39, %v7579_v11  ;;  %v2150_v35 = vpop.f32.mrb[83].mxu0  ;;  %v2536_v12 = vpop.f32.mrb[83].mxu1  ;;  %3694 = vmatmul.mubr.bf16.gmra.mrb[140].mxu0 %v2789_v5  ;;  %4080 = vmatmul.mubr.bf16.gmra.mrb[140].mxu1 %v2789_v5  ;;  %v2681_v28 = vmax.f32 %v5894_v40, 0.0  ;;  %v2683_v48 = vmax.f32 %v5958_v31, 0.0 }
 0x2af   : > { %v5897_v58 = vadd.f32 %v2150_v35, %v7582_v56  ;;  %v5961_v0 = vadd.f32 %v2536_v12, %v7585_v63  ;;  %3837 = vmatpush1.bf16.msra.mxu0 %v6783_v15  ;;  %4223 = vmatpush1.bf16.msra.mxu1 %v6786_v18  ;;  %v2682_v2 = vmax.f32 %v5895_v29, 0.0  ;;  %v2684_v10 = vmax.f32 %v5959_v54, 0.0  ;;  %v6809_v29 = vld [vmem:[#allocation5 + $0x344] ss:$16 sps:$4 sm:$0xff]  }
 0x2b0   : > { %v2685_v51 = vmax.f32 %v5896_v32, 0.0  ;;  %v2687_v42 = vmax.f32 %v5960_v33, 0.0  ;;  %3838 = vmatprep.subr.bf16.mxu0 %v6791_v25  ;;  %4224 = vmatprep.subr.bf16.mxu1 %v6794_v27  ;;  %v6801_v25 = vld [vmem:[#allocation5 + $0x320] ss:$16 sps:$4 sm:$0xff]   ;;  %v6804_v27 = vld [vmem:[#allocation5 + $0x328] ss:$16 sps:$4 sm:$0xff]  }
 0x2b1   : > { %v2686_v36 = vmax.f32 %v5897_v58, 0.0  ;;  %v2688_v37 = vmax.f32 %v5961_v0, 0.0  ;;  %v6812_v33 = vld [vmem:[#allocation5 + $0x34c] ss:$16 sps:$4 sm:$0xff]  }
 0x2b2   : > { %v2793_v34 = vpack.c.bf16 %v2685_v51, %v2681_v28  ;;  %v7643_v21 = vpack.c.bf16 %v2687_v42, %v2683_v48  ;;  %v6807_v42 = vld [vmem:[#allocation5 + $0x340] ss:$16 sps:$4 sm:$0xff]  }
 0x2b3   : > { %v2794_v43 = vpack.c.bf16 %v2686_v36, %v2682_v2  ;;  %v7645_v46 = vpack.c.bf16 %v2688_v37, %v2684_v10  ;;  %v2154_v49 = vpop.f32.mrb[84].mxu0  ;;  %v2540_v3 = vpop.f32.mrb[84].mxu1  ;;  %3839 = vmatpush1.bf16.msra.mxu0 %v6789_v41  ;;  %4225 = vmatpush1.bf16.msra.mxu1 %v6792_v44 }
 0x2b4   : > { %v5898_v14 = vadd.f32 %v2154_v49, %v7576_v7  ;;  %v5962_v61 = vadd.f32 %v2540_v3, %v7579_v11  ;;  %v2156_v57 = vpop.f32.mrb[85].mxu0  ;;  %v2542_v60 = vpop.f32.mrb[85].mxu1  ;;  %3840 = vmatprep.subr.bf16.mxu0 %v6797_v24  ;;  %4226 = vmatprep.subr.bf16.mxu1 %v6800_v47  ;;  %v6810_v47 = vld [vmem:[#allocation5 + $0x348] ss:$16 sps:$4 sm:$0xff]  }
 0x2b5   : > { %v5899_v5 = vadd.f32 %v2156_v57, %v7582_v56  ;;  %v5963_v16 = vadd.f32 %v2542_v60, %v7585_v63  ;;  %v2158_v19 = vpop.f32.mrb[86].mxu0  ;;  %v2544_v22 = vpop.f32.mrb[86].mxu1  ;;  %3703 = vmatprep.mubr.bf16.mxu0 %v2794_v43  ;;  %4089 = vmatprep.mubr.bf16.mxu1 %v2794_v43  ;;  %v6818_v43 = vld [vmem:[#allocation5 + $0x36c] ss:$16 sps:$4 sm:$0xff]  }
 0x2b6   : > { %v5900_v15 = vadd.f32 %v2158_v19, %v7576_v7  ;;  %v5964_v18 = vadd.f32 %v2544_v22, %v7579_v11  ;;  %v2160_v40 = vpop.f32.mrb[87].mxu0  ;;  %v2546_v31 = vpop.f32.mrb[87].mxu1  ;;  %3704 = vmatmul.mubr.bf16.gmra.mrb[144].mxu0 %v2793_v34  ;;  %4090 = vmatmul.mubr.bf16.gmra.mrb[144].mxu1 %v2793_v34  ;;  %v2689_v54 = vmax.f32 %v5898_v14, 0.0  ;;  %v2691_v26 = vmax.f32 %v5962_v61, 0.0  ;;  %v6815_v34 = vld [vmem:[#allocation5 + $0x364] ss:$16 sps:$4 sm:$0xff]  }
 0x2b7   : > { %v5901_v59 = vadd.f32 %v2160_v40, %v7582_v56  ;;  %v5965_v23 = vadd.f32 %v2546_v31, %v7585_v63  ;;  %3841 = vmatpush1.bf16.msra.mxu0 %v6795_v50  ;;  %4227 = vmatpush1.bf16.msra.mxu1 %v6798_v52  ;;  %v2690_v35 = vmax.f32 %v5899_v5, 0.0  ;;  %v2692_v12 = vmax.f32 %v5963_v16, 0.0  ;;  %v6813_v5 = vld [vmem:[#allocation5 + $0x360] ss:$16 sps:$4 sm:$0xff]   ;;  %v6816_v16 = vld [vmem:[#allocation5 + $0x368] ss:$16 sps:$4 sm:$0xff]  }
 0x2b8   : > { %v2693_v39 = vmax.f32 %v5900_v15, 0.0  ;;  %v2695_v32 = vmax.f32 %v5964_v18, 0.0  ;;  %3842 = vmatprep.subr.bf16.mxu0 %v6803_v53  ;;  %4228 = vmatprep.subr.bf16.mxu1 %v6806_v4  ;;  %v6821_v19 = vld [vmem:[#allocation5 + $0x384] ss:$16 sps:$4 sm:$0xff]   ;;  %v6824_v31 = vld [vmem:[#allocation5 + $0x38c] ss:$16 sps:$4 sm:$0xff]  }
 0x2b9   : > { %v2694_v58 = vmax.f32 %v5901_v59, 0.0  ;;  %v2696_v0 = vmax.f32 %v5965_v23, 0.0 }
 0x2ba   : > { %v2797_v41 = vpack.c.bf16 %v2693_v39, %v2689_v54  ;;  %v7655_v44 = vpack.c.bf16 %v2695_v32, %v2691_v26 }
 0x2bb   : > { %v2798_v24 = vpack.c.bf16 %v2694_v58, %v2690_v35  ;;  %v7657_v28 = vpack.c.bf16 %v2696_v0, %v2692_v12  ;;  %v2164_v48 = vpop.f32.mrb[88].mxu0  ;;  %v2550_v51 = vpop.f32.mrb[88].mxu1  ;;  %3843 = vmatpush1.bf16.msra.mxu0 %v6801_v25  ;;  %4229 = vmatpush1.bf16.msra.mxu1 %v6804_v27  ;;  %v6819_v35 = vld [vmem:[#allocation5 + $0x380] ss:$16 sps:$4 sm:$0xff]   ;;  %v6822_v12 = vld [vmem:[#allocation5 + $0x388] ss:$16 sps:$4 sm:$0xff]  }
 0x2bc   : > { %v5902_v2 = vadd.f32 %v2164_v48, %v7576_v7  ;;  %v5966_v10 = vadd.f32 %v2550_v51, %v7579_v11  ;;  %v2166_v36 = vpop.f32.mrb[89].mxu0  ;;  %v2552_v37 = vpop.f32.mrb[89].mxu1  ;;  %3844 = vmatprep.subr.bf16.mxu0 %v6809_v29  ;;  %4230 = vmatprep.subr.bf16.mxu1 %v6812_v33  ;;  %v6827_v48 = vld [vmem:[#allocation5 + $0x3a4] ss:$16 sps:$4 sm:$0xff]   ;;  %v6830_v51 = vld [vmem:[#allocation5 + $0x3ac] ss:$16 sps:$4 sm:$0xff]  }
 0x2bd   : > { %v5903_v49 = vadd.f32 %v2166_v36, %v7582_v56  ;;  %v5967_v3 = vadd.f32 %v2552_v37, %v7585_v63  ;;  %v2168_v50 = vpop.f32.mrb[90].mxu0  ;;  %v2554_v52 = vpop.f32.mrb[90].mxu1  ;;  %3713 = vmatprep.mubr.bf16.mxu0 %v2798_v24  ;;  %4099 = vmatprep.mubr.bf16.mxu1 %v2798_v24 }
 0x2be   : > { %v5904_v14 = vadd.f32 %v2168_v50, %v7576_v7  ;;  %v5968_v61 = vadd.f32 %v2554_v52, %v7579_v11  ;;  %v2170_v57 = vpop.f32.mrb[91].mxu0  ;;  %v2556_v60 = vpop.f32.mrb[91].mxu1  ;;  %3714 = vmatmul.mubr.bf16.gmra.mrb[148].mxu0 %v2797_v41  ;;  %4100 = vmatmul.mubr.bf16.gmra.mrb[148].mxu1 %v2797_v41  ;;  %v2697_v22 = vmax.f32 %v5902_v2, 0.0  ;;  %v2699_v15 = vmax.f32 %v5966_v10, 0.0  ;;  %v6825_v50 = vld [vmem:[#allocation5 + $0x3a0] ss:$16 sps:$4 sm:$0xff]  }
 0x2bf   : > { %v5905_v53 = vadd.f32 %v2170_v57, %v7582_v56  ;;  %v5969_v4 = vadd.f32 %v2556_v60, %v7585_v63  ;;  %3845 = vmatpush1.bf16.msra.mxu0 %v6807_v42  ;;  %4231 = vmatpush1.bf16.msra.mxu1 %v6810_v47  ;;  %v2698_v59 = vmax.f32 %v5903_v49, 0.0  ;;  %v2700_v23 = vmax.f32 %v5967_v3, 0.0  ;;  %v6828_v52 = vld [vmem:[#allocation5 + $0x3a8] ss:$16 sps:$4 sm:$0xff]  }
 0x2c0   : > { %v2701_v18 = vmax.f32 %v5904_v14, 0.0  ;;  %v2703_v40 = vmax.f32 %v5968_v61, 0.0  ;;  %3846 = vmatprep.subr.bf16.mxu0 %v6815_v34  ;;  %4232 = vmatprep.subr.bf16.mxu1 %v6818_v43  ;;  %v6833_v14 = vld [vmem:[#allocation5 + $0x3c4] ss:$16 sps:$4 sm:$0xff]  }
 0x2c1   : > { %v2702_v25 = vmax.f32 %v5905_v53, 0.0  ;;  %v2704_v27 = vmax.f32 %v5969_v4, 0.0  ;;  %v6836_v4 = vld [vmem:[#allocation5 + $0x3cc] ss:$16 sps:$4 sm:$0xff]  }
 0x2c2   : > { %v2801_v29 = vpack.c.bf16 %v2701_v18, %v2697_v22  ;;  %v7667_v54 = vpack.c.bf16 %v2703_v40, %v2699_v15 }
 0x2c3   : > { %v2802_v26 = vpack.c.bf16 %v2702_v25, %v2698_v59  ;;  %v7669_v39 = vpack.c.bf16 %v2704_v27, %v2700_v23  ;;  %v2174_v32 = vpop.f32.mrb[92].mxu0  ;;  %v2560_v33 = vpop.f32.mrb[92].mxu1  ;;  %3847 = vmatpush1.bf16.msra.mxu0 %v6813_v5  ;;  %4233 = vmatpush1.bf16.msra.mxu1 %v6816_v16  ;;  %v6831_v25 = vld [vmem:[#allocation5 + $0x3c0] ss:$16 sps:$4 sm:$0xff]   ;;  %v6834_v27 = vld [vmem:[#allocation5 + $0x3c8] ss:$16 sps:$4 sm:$0xff]  }
 0x2c4   : > { %v5906_v58 = vadd.f32 %v2174_v32, %v7576_v7  ;;  %v5970_v0 = vadd.f32 %v2560_v33, %v7579_v11  ;;  %v2176_v41 = vpop.f32.mrb[93].mxu0  ;;  %v2562_v24 = vpop.f32.mrb[93].mxu1  ;;  %3848 = vmatprep.subr.bf16.mxu0 %v6821_v19  ;;  %4234 = vmatprep.subr.bf16.mxu1 %v6824_v31 }
 0x2c5   : > { %v5907_v42 = vadd.f32 %v2176_v41, %v7582_v56  ;;  %v5971_v47 = vadd.f32 %v2562_v24, %v7585_v63  ;;  %v2178_v2 = vpop.f32.mrb[94].mxu0  ;;  %v2564_v10 = vpop.f32.mrb[94].mxu1  ;;  %3723 = vmatprep.mubr.bf16.mxu0 %v2802_v26  ;;  %4109 = vmatprep.mubr.bf16.mxu1 %v2802_v26 }
 0x2c6   : > { %v5908_v36 = vadd.f32 %v2178_v2, %v7576_v7  ;;  %v5972_v37 = vadd.f32 %v2564_v10, %v7579_v11  ;;  %v2180_v34 = vpop.f32.mrb[95].mxu0  ;;  %v2566_v43 = vpop.f32.mrb[95].mxu1  ;;  %3724 = vmatmul.mubr.bf16.gmra.mrb[152].mxu0 %v2801_v29  ;;  %4110 = vmatmul.mubr.bf16.gmra.mrb[152].mxu1 %v2801_v29  ;;  %v2705_v61 = vmax.f32 %v5906_v58, 0.0  ;;  %v2707_v57 = vmax.f32 %v5970_v0, 0.0 }
 0x2c7   : > { %v5909_v49 = vadd.f32 %v2180_v34, %v7582_v56  ;;  %v5973_v3 = vadd.f32 %v2566_v43, %v7585_v63  ;;  %3849 = vmatpush1.bf16.msra.mxu0 %v6819_v35  ;;  %4235 = vmatpush1.bf16.msra.mxu1 %v6822_v12  ;;  %v2706_v5 = vmax.f32 %v5907_v42, 0.0  ;;  %v2708_v16 = vmax.f32 %v5971_v47, 0.0  ;;  %v6839_v35 = vld [vmem:[#allocation5 + $0x3e4] ss:$16 sps:$4 sm:$0xff]   ;;  %v6842_v12 = vld [vmem:[#allocation5 + $0x3ec] ss:$16 sps:$4 sm:$0xff]  }
 0x2c8   : > { %v2709_v60 = vmax.f32 %v5908_v36, 0.0  ;;  %v2711_v53 = vmax.f32 %v5972_v37, 0.0  ;;  %3850 = vmatprep.subr.bf16.mxu0 %v6827_v48  ;;  %4236 = vmatprep.subr.bf16.mxu1 %v6830_v51  ;;  %v6837_v36 = vld [vmem:[#allocation5 + $0x3e0] ss:$16 sps:$4 sm:$0xff]   ;;  %v6840_v37 = vld [vmem:[#allocation5 + $0x3e8] ss:$16 sps:$4 sm:$0xff]  }
 0x2c9   : > { %v2710_v19 = vmax.f32 %v5909_v49, 0.0  ;;  %v2712_v22 = vmax.f32 %v5973_v3, 0.0 }
 0x2ca   : > { %v2805_v15 = vpack.c.bf16 %v2709_v60, %v2705_v61  ;;  %v7679_v18 = vpack.c.bf16 %v2711_v53, %v2707_v57 }
 0x2cb   : > { %v2806_v40 = vpack.c.bf16 %v2710_v19, %v2706_v5  ;;  %v7681_v31 = vpack.c.bf16 %v2712_v22, %v2708_v16  ;;  %v2184_v59 = vpop.f32.mrb[96].mxu0  ;;  %v2570_v23 = vpop.f32.mrb[96].mxu1  ;;  %3851 = vmatpush1.bf16.msra.mxu0 %v6825_v50  ;;  %4237 = vmatpush1.bf16.msra.mxu1 %v6828_v52 }
 0x2cc   : > { %v5910_v29 = vadd.f32 %v2184_v59, %v7576_v7  ;;  %v5974_v26 = vadd.f32 %v2570_v23, %v7579_v11  ;;  %v2186_v32 = vpop.f32.mrb[97].mxu0  ;;  %v2572_v33 = vpop.f32.mrb[97].mxu1  ;;  %3852 = vmatprep.subr.bf16.mxu0 %v6833_v14  ;;  %4238 = vmatprep.subr.bf16.mxu1 %v6836_v4 }
 0x2cd   : > { %v5911_v58 = vadd.f32 %v2186_v32, %v7582_v56  ;;  %v5975_v0 = vadd.f32 %v2572_v33, %v7585_v63  ;;  %v2188_v41 = vpop.f32.mrb[98].mxu0  ;;  %v2574_v24 = vpop.f32.mrb[98].mxu1  ;;  %3733 = vmatprep.mubr.bf16.mxu0 %v2806_v40  ;;  %4119 = vmatprep.mubr.bf16.mxu1 %v2806_v40 }
 0x2ce   : > { %v5912_v48 = vadd.f32 %v2188_v41, %v7576_v7  ;;  %v5976_v51 = vadd.f32 %v2574_v24, %v7579_v11  ;;  %v2190_v42 = vpop.f32.mrb[99].mxu0  ;;  %v2576_v47 = vpop.f32.mrb[99].mxu1  ;;  %3734 = vmatmul.mubr.bf16.gmra.mrb[156].mxu0 %v2805_v15  ;;  %4120 = vmatmul.mubr.bf16.gmra.mrb[156].mxu1 %v2805_v15  ;;  %v2713_v34 = vmax.f32 %v5910_v29, 0.0  ;;  %v2715_v43 = vmax.f32 %v5974_v26, 0.0 }
 0x2cf   : > { %v5913_v2 = vadd.f32 %v2190_v42, %v7582_v56  ;;  %v5977_v10 = vadd.f32 %v2576_v47, %v7585_v63  ;;  %3853 = vmatpush1.bf16.msra.mxu0 %v6831_v25  ;;  %4239 = vmatpush1.bf16.msra.mxu1 %v6834_v27  ;;  %v2714_v50 = vmax.f32 %v5911_v58, 0.0  ;;  %v2716_v52 = vmax.f32 %v5975_v0, 0.0 }
 0x2d0   : > { %v2717_v49 = vmax.f32 %v5912_v48, 0.0  ;;  %v2719_v3 = vmax.f32 %v5976_v51, 0.0  ;;  %3854 = vmatprep.subr.bf16.mxu0 %v6839_v35  ;;  %4240 = vmatprep.subr.bf16.mxu1 %v6842_v12 }
 0x2d1   : > { %v2718_v14 = vmax.f32 %v5913_v2, 0.0  ;;  %v2720_v61 = vmax.f32 %v5977_v10, 0.0 }
 0x2d2   : > { %v2809_v57 = vpack.c.bf16 %v2717_v49, %v2713_v34  ;;  %v7691_v60 = vpack.c.bf16 %v2719_v3, %v2715_v43 }
 0x2d3   : > { %v2810_v53 = vpack.c.bf16 %v2718_v14, %v2714_v50  ;;  %v7693_v4 = vpack.c.bf16 %v2720_v61, %v2716_v52  ;;  %v2194_v5 = vpop.f32.mrb[100].mxu0  ;;  %v2580_v16 = vpop.f32.mrb[100].mxu1  ;;  %3855 = vmatpush1.bf16.msra.mxu0 %v6837_v36  ;;  %4241 = vmatpush1.bf16.msra.mxu1 %v6840_v37 }
 0x2d4   : > { %v5914_v19 = vadd.f32 %v2194_v5, %v7576_v7  ;;  %v5978_v22 = vadd.f32 %v2580_v16, %v7579_v11  ;;  %v2196_v15 = vpop.f32.mrb[101].mxu0  ;;  %v2582_v40 = vpop.f32.mrb[101].mxu1 }
 0x2d5   : > { %v5915_v59 = vadd.f32 %v2196_v15, %v7582_v56  ;;  %v5979_v23 = vadd.f32 %v2582_v40, %v7585_v63  ;;  %v2198_v25 = vpop.f32.mrb[102].mxu0  ;;  %v2584_v27 = vpop.f32.mrb[102].mxu1  ;;  %3743 = vmatprep.mubr.bf16.mxu0 %v2810_v53  ;;  %4129 = vmatprep.mubr.bf16.mxu1 %v2810_v53 }
 0x2d6   : > { %v5916_v29 = vadd.f32 %v2198_v25, %v7576_v7  ;;  %v5980_v26 = vadd.f32 %v2584_v27, %v7579_v11  ;;  %v2200_v32 = vpop.f32.mrb[103].mxu0  ;;  %v2586_v33 = vpop.f32.mrb[103].mxu1  ;;  %3744 = vmatmul.mubr.bf16.gmra.mrb[160].mxu0 %v2809_v57  ;;  %4130 = vmatmul.mubr.bf16.gmra.mrb[160].mxu1 %v2809_v57  ;;  %v2721_v58 = vmax.f32 %v5914_v19, 0.0  ;;  %v2723_v0 = vmax.f32 %v5978_v22, 0.0 }
 0x2d7   : > { %v5917_v35 = vadd.f32 %v2200_v32, %v7582_v56  ;;  %v5981_v12 = vadd.f32 %v2586_v33, %v7585_v63  ;;  %v2722_v48 = vmax.f32 %v5915_v59, 0.0  ;;  %v2724_v51 = vmax.f32 %v5979_v23, 0.0 }
 0x2d8   : > { %v2725_v41 = vmax.f32 %v5916_v29, 0.0  ;;  %v2727_v24 = vmax.f32 %v5980_v26, 0.0 }
 0x2d9   : > { %v2726_v42 = vmax.f32 %v5917_v35, 0.0  ;;  %v2728_v47 = vmax.f32 %v5981_v12, 0.0 }
 0x2da   : > { %v2813_v2 = vpack.c.bf16 %v2725_v41, %v2721_v58  ;;  %v7703_v10 = vpack.c.bf16 %v2727_v24, %v2723_v0 }
 0x2db   : > { %v2814_v36 = vpack.c.bf16 %v2726_v42, %v2722_v48  ;;  %v7705_v37 = vpack.c.bf16 %v2728_v47, %v2724_v51  ;;  %v2204_v34 = vpop.f32.mrb[104].mxu0  ;;  %v2590_v43 = vpop.f32.mrb[104].mxu1 }
 0x2dc   : > { %v5918_v49 = vadd.f32 %v2204_v34, %v7576_v7  ;;  %v5982_v3 = vadd.f32 %v2590_v43, %v7579_v11  ;;  %v2206_v50 = vpop.f32.mrb[105].mxu0  ;;  %v2592_v52 = vpop.f32.mrb[105].mxu1 }
 0x2dd   : > { %v5919_v14 = vadd.f32 %v2206_v50, %v7582_v56  ;;  %v5983_v61 = vadd.f32 %v2592_v52, %v7585_v63  ;;  %v2208_v57 = vpop.f32.mrb[106].mxu0  ;;  %v2594_v53 = vpop.f32.mrb[106].mxu1  ;;  %3753 = vmatprep.mubr.bf16.mxu0 %v2814_v36  ;;  %4139 = vmatprep.mubr.bf16.mxu1 %v2814_v36 }
 0x2de   : > { %v5920_v5 = vadd.f32 %v2208_v57, %v7576_v7  ;;  %v5984_v16 = vadd.f32 %v2594_v53, %v7579_v11  ;;  %v2210_v19 = vpop.f32.mrb[107].mxu0  ;;  %v2596_v22 = vpop.f32.mrb[107].mxu1  ;;  %3754 = vmatmul.mubr.bf16.gmra.mrb[164].mxu0 %v2813_v2  ;;  %4140 = vmatmul.mubr.bf16.gmra.mrb[164].mxu1 %v2813_v2  ;;  %v2729_v59 = vmax.f32 %v5918_v49, 0.0  ;;  %v2731_v23 = vmax.f32 %v5982_v3, 0.0 }
 0x2df   : > { %v5921_v15 = vadd.f32 %v2210_v19, %v7582_v56  ;;  %v5985_v40 = vadd.f32 %v2596_v22, %v7585_v63  ;;  %v2730_v29 = vmax.f32 %v5919_v14, 0.0  ;;  %v2732_v26 = vmax.f32 %v5983_v61, 0.0 }
 0x2e0   : > { %v2733_v25 = vmax.f32 %v5920_v5, 0.0  ;;  %v2735_v27 = vmax.f32 %v5984_v16, 0.0 }
 0x2e1   : > { %v2734_v32 = vmax.f32 %v5921_v15, 0.0  ;;  %v2736_v33 = vmax.f32 %v5985_v40, 0.0 }
 0x2e2   : > { %v2817_v35 = vpack.c.bf16 %v2733_v25, %v2729_v59  ;;  %v7715_v12 = vpack.c.bf16 %v2735_v27, %v2731_v23 }
 0x2e3   : > { %v2818_v58 = vpack.c.bf16 %v2734_v32, %v2730_v29  ;;  %v7717_v0 = vpack.c.bf16 %v2736_v33, %v2732_v26  ;;  %v2214_v41 = vpop.f32.mrb[108].mxu0  ;;  %v2600_v24 = vpop.f32.mrb[108].mxu1 }
 0x2e4   : > { %v5922_v48 = vadd.f32 %v2214_v41, %v7576_v7  ;;  %v5986_v51 = vadd.f32 %v2600_v24, %v7579_v11  ;;  %v2216_v42 = vpop.f32.mrb[109].mxu0  ;;  %v2602_v47 = vpop.f32.mrb[109].mxu1 }
 0x2e5   : > { %v5923_v2 = vadd.f32 %v2216_v42, %v7582_v56  ;;  %v5987_v36 = vadd.f32 %v2602_v47, %v7585_v63  ;;  %v2218_v34 = vpop.f32.mrb[110].mxu0  ;;  %v2604_v43 = vpop.f32.mrb[110].mxu1  ;;  %3763 = vmatprep.mubr.bf16.mxu0 %v2818_v58  ;;  %4149 = vmatprep.mubr.bf16.mxu1 %v2818_v58 }
 0x2e6   : > { %v5924_v49 = vadd.f32 %v2218_v34, %v7576_v7  ;;  %v5988_v3 = vadd.f32 %v2604_v43, %v7579_v11  ;;  %v2220_v50 = vpop.f32.mrb[111].mxu0  ;;  %v2606_v52 = vpop.f32.mrb[111].mxu1  ;;  %3764 = vmatmul.mubr.bf16.gmra.mrb[168].mxu0 %v2817_v35  ;;  %4150 = vmatmul.mubr.bf16.gmra.mrb[168].mxu1 %v2817_v35  ;;  %v2737_v57 = vmax.f32 %v5922_v48, 0.0  ;;  %v2739_v53 = vmax.f32 %v5986_v51, 0.0 }
 0x2e7   : > { %v5925_v14 = vadd.f32 %v2220_v50, %v7582_v56  ;;  %v5989_v61 = vadd.f32 %v2606_v52, %v7585_v63  ;;  %v2738_v19 = vmax.f32 %v5923_v2, 0.0  ;;  %v2740_v22 = vmax.f32 %v5987_v36, 0.0 }
 0x2e8   : > { %v2741_v5 = vmax.f32 %v5924_v49, 0.0  ;;  %v2743_v16 = vmax.f32 %v5988_v3, 0.0  ;;  %v6843_v49 = vld [vmem:[%s8215_s7 + $0x40] sm:$0xff]  }
 0x2e9   : > { %v2742_v15 = vmax.f32 %v5925_v14, 0.0  ;;  %v2744_v40 = vmax.f32 %v5989_v61, 0.0  ;;  %v6845_v3 = vld [vmem:[%s8215_s7 + $0xc0] sm:$0xff]   ;;  %5654 = vmatprep.subr.bf16.mxu0 %v6843_v49 }
 0x2ea   : > { %v2821_v59 = vpack.c.bf16 %v2741_v5, %v2737_v57  ;;  %v7727_v23 = vpack.c.bf16 %v2743_v16, %v2739_v53  ;;  %5766 = vmatprep.subr.bf16.mxu1 %v6845_v3 }
 0x2eb   : > { %v2822_v25 = vpack.c.bf16 %v2742_v15, %v2738_v19  ;;  %v7729_v27 = vpack.c.bf16 %v2744_v40, %v2740_v22  ;;  %v2224_v29 = vpop.f32.mrb[112].mxu0  ;;  %v2610_v26 = vpop.f32.mrb[112].mxu1 }
 0x2ec   : > { %v5926_v32 = vadd.f32 %v2224_v29, %v7576_v7  ;;  %v5990_v33 = vadd.f32 %v2610_v26, %v7579_v11  ;;  %v2226_v35 = vpop.f32.mrb[113].mxu0  ;;  %v2612_v58 = vpop.f32.mrb[113].mxu1 }
 0x2ed   : > { %v5927_v41 = vadd.f32 %v2226_v35, %v7582_v56  ;;  %v5991_v24 = vadd.f32 %v2612_v58, %v7585_v63  ;;  %v2228_v48 = vpop.f32.mrb[114].mxu0  ;;  %v2614_v51 = vpop.f32.mrb[114].mxu1  ;;  %3773 = vmatprep.mubr.bf16.mxu0 %v2822_v25  ;;  %4159 = vmatprep.mubr.bf16.mxu1 %v2822_v25 }
 0x2ee   : > { %v5928_v42 = vadd.f32 %v2228_v48, %v7576_v7  ;;  %v5992_v47 = vadd.f32 %v2614_v51, %v7579_v11  ;;  %v2230_v2 = vpop.f32.mrb[115].mxu0  ;;  %v2616_v36 = vpop.f32.mrb[115].mxu1  ;;  %3774 = vmatmul.mubr.bf16.gmra.mrb[172].mxu0 %v2821_v59  ;;  %4160 = vmatmul.mubr.bf16.gmra.mrb[172].mxu1 %v2821_v59  ;;  %v2745_v50 = vmax.f32 %v5926_v32, 0.0  ;;  %v2747_v52 = vmax.f32 %v5990_v33, 0.0 }
 0x2ef   : > { %v5929_v34 = vadd.f32 %v2230_v2, %v7582_v56  ;;  %v5993_v43 = vadd.f32 %v2616_v36, %v7585_v63  ;;  %v2746_v57 = vmax.f32 %v5927_v41, 0.0  ;;  %v2748_v53 = vmax.f32 %v5991_v24, 0.0 }
 0x2f0   : > { %v2749_v14 = vmax.f32 %v5928_v42, 0.0  ;;  %v2751_v61 = vmax.f32 %v5992_v47, 0.0 }
 0x2f1   : > { %v2750_v5 = vmax.f32 %v5929_v34, 0.0  ;;  %v2752_v16 = vmax.f32 %v5993_v43, 0.0 }
 0x2f2   : > { %v2825_v19 = vpack.c.bf16 %v2749_v14, %v2745_v50  ;;  %v7745_v22 = vpack.c.bf16 %v2751_v61, %v2747_v52 }
 0x2f3   : > { %v2826_v15 = vpack.c.bf16 %v2750_v5, %v2746_v57  ;;  %v7747_v40 = vpack.c.bf16 %v2752_v16, %v2748_v53  ;;  %v2234_v59 = vpop.f32.mrb[116].mxu0  ;;  %v2620_v25 = vpop.f32.mrb[116].mxu1 }
 0x2f4   : > { %v5930_v29 = vadd.f32 %v2234_v59, %v7576_v7  ;;  %v5994_v26 = vadd.f32 %v2620_v25, %v7579_v11  ;;  %v2236_v32 = vpop.f32.mrb[117].mxu0  ;;  %v2622_v33 = vpop.f32.mrb[117].mxu1 }
 0x2f5   : > { %v5931_v35 = vadd.f32 %v2236_v32, %v7582_v56  ;;  %v5995_v58 = vadd.f32 %v2622_v33, %v7585_v63  ;;  %v2238_v41 = vpop.f32.mrb[118].mxu0  ;;  %v2624_v24 = vpop.f32.mrb[118].mxu1  ;;  %3783 = vmatprep.mubr.bf16.mxu0 %v2826_v15  ;;  %4169 = vmatprep.mubr.bf16.mxu1 %v2826_v15 }
 0x2f6   : > { %v5932_v48 = vadd.f32 %v2238_v41, %v7576_v7  ;;  %v5996_v51 = vadd.f32 %v2624_v24, %v7579_v11  ;;  %v2240_v42 = vpop.f32.mrb[119].mxu0  ;;  %v2626_v47 = vpop.f32.mrb[119].mxu1  ;;  %3784 = vmatmul.mubr.bf16.gmra.mrb[176].mxu0 %v2825_v19  ;;  %4170 = vmatmul.mubr.bf16.gmra.mrb[176].mxu1 %v2825_v19  ;;  %v2753_v34 = vmax.f32 %v5930_v29, 0.0  ;;  %v2755_v43 = vmax.f32 %v5994_v26, 0.0 }
 0x2f7   : > { %v5933_v2 = vadd.f32 %v2240_v42, %v7582_v56  ;;  %v5997_v36 = vadd.f32 %v2626_v47, %v7585_v63  ;;  %v2754_v50 = vmax.f32 %v5931_v35, 0.0  ;;  %v2756_v52 = vmax.f32 %v5995_v58, 0.0 }
 0x2f8   : > { %v2757_v49 = vmax.f32 %v5932_v48, 0.0  ;;  %v2759_v3 = vmax.f32 %v5996_v51, 0.0 }
 0x2f9   : > { %v2758_v14 = vmax.f32 %v5933_v2, 0.0  ;;  %v2760_v61 = vmax.f32 %v5997_v36, 0.0 }
 0x2fa   : > { %v2829_v57 = vpack.c.bf16 %v2757_v49, %v2753_v34  ;;  %v7757_v53 = vpack.c.bf16 %v2759_v3, %v2755_v43 }
 0x2fb   : > { %v2830_v5 = vpack.c.bf16 %v2758_v14, %v2754_v50  ;;  %v7759_v16 = vpack.c.bf16 %v2760_v61, %v2756_v52  ;;  %v2244_v15 = vpop.f32.mrb[120].mxu0  ;;  %v2630_v19 = vpop.f32.mrb[120].mxu1 }
 0x2fc   : > { %v5934_v59 = vadd.f32 %v2244_v15, %v7576_v7  ;;  %v5998_v25 = vadd.f32 %v2630_v19, %v7579_v11  ;;  %v2246_v29 = vpop.f32.mrb[121].mxu0  ;;  %v2632_v26 = vpop.f32.mrb[121].mxu1 }
 0x2fd   : > { %v5935_v32 = vadd.f32 %v2246_v29, %v7582_v56  ;;  %v5999_v33 = vadd.f32 %v2632_v26, %v7585_v63  ;;  %v2248_v35 = vpop.f32.mrb[122].mxu0  ;;  %v2634_v58 = vpop.f32.mrb[122].mxu1  ;;  %3793 = vmatprep.mubr.bf16.mxu0 %v2830_v5  ;;  %4179 = vmatprep.mubr.bf16.mxu1 %v2830_v5 }
 0x2fe   : > { %v5936_v41 = vadd.f32 %v2248_v35, %v7576_v7  ;;  %v6000_v24 = vadd.f32 %v2634_v58, %v7579_v11  ;;  %v2250_v48 = vpop.f32.mrb[123].mxu0  ;;  %v2636_v51 = vpop.f32.mrb[123].mxu1  ;;  %3794 = vmatmul.mubr.bf16.gmra.mrb[180].mxu0 %v2829_v57  ;;  %4180 = vmatmul.mubr.bf16.gmra.mrb[180].mxu1 %v2829_v57  ;;  %v2761_v2 = vmax.f32 %v5934_v59, 0.0  ;;  %v2763_v36 = vmax.f32 %v5998_v25, 0.0 }
 0x2ff   : > { %v5937_v42 = vadd.f32 %v2250_v48, %v7582_v56  ;;  %v6001_v47 = vadd.f32 %v2636_v51, %v7585_v63  ;;  %v2762_v49 = vmax.f32 %v5935_v32, 0.0  ;;  %v2764_v3 = vmax.f32 %v5999_v33, 0.0 }
 0x300   : > { %v2765_v34 = vmax.f32 %v5936_v41, 0.0  ;;  %v2767_v43 = vmax.f32 %v6000_v24, 0.0 }
 0x301   : > { %v2766_v50 = vmax.f32 %v5937_v42, 0.0  ;;  %v2768_v52 = vmax.f32 %v6001_v47, 0.0 }
 0x302   : > { %v2833_v14 = vpack.c.bf16 %v2765_v34, %v2761_v2  ;;  %v7769_v61 = vpack.c.bf16 %v2767_v43, %v2763_v36 }
 0x303   : > { %v2834_v5 = vpack.c.bf16 %v2766_v50, %v2762_v49  ;;  %v7771_v15 = vpack.c.bf16 %v2768_v52, %v2764_v3  ;;  %v2254_v19 = vpop.f32.mrb[124].mxu0  ;;  %v2640_v57 = vpop.f32.mrb[124].mxu1 }
 0x304   : > { %v5938_v29 = vadd.f32 %v2254_v19, %v7576_v7  ;;  %v6002_v26 = vadd.f32 %v2640_v57, %v7579_v11  ;;  %v2256_v59 = vpop.f32.mrb[125].mxu0  ;;  %v2642_v25 = vpop.f32.mrb[125].mxu1  ;;  %v6849_v57 = vld [vmem:[%s8215_s7 + $0xc8] sm:$0xff]  }
 0x305   : > { %v5939_v35 = vadd.f32 %v2256_v59, %v7582_v56  ;;  %v6003_v32 = vadd.f32 %v2642_v25, %v7585_v63  ;;  %v2258_v33 = vpop.f32.mrb[126].mxu0  ;;  %v2644_v58 = vpop.f32.mrb[126].mxu1  ;;  %3803 = vmatprep.mubr.bf16.mxu0 %v2834_v5  ;;  %4189 = vmatprep.mubr.bf16.mxu1 %v2834_v5  ;;  %v6854_v59 = vld [vmem:[%s8215_s7 + $0x90] sm:$0xff]   ;;  %v6855_v25 = vld [vmem:[%s8215_s7 + $0x58] sm:$0xff]  }
 0x306   : > { %v5940_v41 = vadd.f32 %v2258_v33, %v7576_v7  ;;  %v6004_v24 = vadd.f32 %v2644_v58, %v7579_v11  ;;  %v2260_v48 = vpop.f32.mrb[127].mxu0  ;;  %v2646_v51 = vpop.f32.mrb[127].mxu1  ;;  %3804 = vmatmul.mubr.bf16.gmra.mrb[184].mxu0 %v2833_v14  ;;  %4190 = vmatmul.mubr.bf16.gmra.mrb[184].mxu1 %v2833_v14  ;;  %v2769_v2 = vmax.f32 %v5938_v29, 0.0  ;;  %v2771_v36 = vmax.f32 %v6002_v26, 0.0  ;;  %v6847_v14 = vld [vmem:[%s8215_s7 + $0x48] sm:$0xff]   ;;  %v6852_v26 = vld [vmem:[%s8215_s7 + $0x10] sm:$0xff]  }
 0x307   : > { %v5941_v42 = vadd.f32 %v2260_v48, %v7582_v56  ;;  %v6005_v47 = vadd.f32 %v2646_v51, %v7585_v63  ;;  %v2770_v49 = vmax.f32 %v5939_v35, 0.0  ;;  %v2772_v3 = vmax.f32 %v6003_v32, 0.0  ;;  %v6844_v56 = vld [vmem:[%s8215_s7] sm:$0xff]   ;;  %v6850_v29 = vld [vmem:[%s8215_s7 + $0x88] sm:$0xff]   ;;  %v6857_v35 = vld [vmem:[%s8215_s7 + $0xd8] sm:$0xff]  }
 0x308   : > { %v2773_v34 = vmax.f32 %v5940_v41, 0.0  ;;  %v2775_v43 = vmax.f32 %v6004_v24, 0.0  ;;  %v6846_v63 = vld [vmem:[%s8215_s7 + $0x80] sm:$0xff]   ;;  %v6856_v32 = vld [vmem:[%s8215_s7 + $0x18] sm:$0xff]   ;;  %v6863_v24 = vld [vmem:[%s8215_s7 + $0x68] sm:$0xff]  }
 0x309   : > { %v2774_v50 = vmax.f32 %v5941_v42, 0.0  ;;  %v2776_v52 = vmax.f32 %v6005_v47, 0.0  ;;  %v6858_v33 = vld [vmem:[%s8215_s7 + $0x98] sm:$0xff]   ;;  %v6860_v58 = vld [vmem:[%s8215_s7 + $0x20] sm:$0xff]   ;;  %v6865_v48 = vld [vmem:[%s8215_s7 + $0xe8] sm:$0xff]  }
 0x30a   : > { %v2837_v5 = vpack.c.bf16 %v2773_v34, %v2769_v2  ;;  %v7781_v7 = vpack.c.bf16 %v2775_v43, %v2771_v36  ;;  %v6862_v41 = vld [vmem:[%s8215_s7 + $0xa0] sm:$0xff]   ;;  %v6864_v51 = vld [vmem:[%s8215_s7 + $0x28] sm:$0xff]   ;;  %v6868_v47 = vld [vmem:[%s8215_s7 + $0x30] sm:$0xff]  }
 0x30b   : > { %v2838_v11 = vpack.c.bf16 %v2774_v50, %v2770_v49  ;;  %v7783_v19 = vpack.c.bf16 %v2776_v52, %v2772_v3  ;;  %v6866_v42 = vld [vmem:[%s8215_s7 + $0xa8] sm:$0xff]   ;;  %v6870_v2 = vld [vmem:[%s8215_s7 + $0xb0] sm:$0xff]   ;;  %v6871_v36 = vld [vmem:[%s8215_s7 + $0x78] sm:$0xff]  }
 0x30c   : > { %v6873_v34 = vld [vmem:[%s8215_s7 + $0xf8] sm:$0xff]  }
 0x30d   : > { %3813 = vmatprep.mubr.bf16.mxu0 %v2838_v11  ;;  %4199 = vmatprep.mubr.bf16.mxu1 %v2838_v11  ;;  %v6872_v43 = vld [vmem:[%s8215_s7 + $0x38] sm:$0xff]  }
 0x30e   : > { %3814 = vmatmul.mubr.bf16.gmra.mrb[188].mxu0 %v2837_v5  ;;  %4200 = vmatmul.mubr.bf16.gmra.mrb[188].mxu1 %v2837_v5  ;;  %v6874_v49 = vld [vmem:[%s8215_s7 + $0xb8] sm:$0xff]  }
 0x30f   : > { %3856 = vmatprep.mubr.bf16.mxu0 %v7597_v45  ;;  %4242 = vmatprep.mubr.bf16.mxu1 %v7597_v45  ;;  %v6848_v45 = vld [vmem:[%s8215_s7 + $0x8] sm:$0xff]  }
 0x316   : > { %3857 = vmatmul.mubr.bf16.vlgmr.msra.gmra.mrb[128].mxu0 %v7595_v8  ;;  %4243 = vmatmul.mubr.bf16.vlgmr.msra.gmra.mrb[128].mxu1 %v7595_v8  ;;  %v6851_v8 = vld [vmem:[%s8215_s7 + $0x50] sm:$0xff]  }
 0x317   : > { %3866 = vmatprep.mubr.bf16.mxu0 %v7609_v13  ;;  %4252 = vmatprep.mubr.bf16.mxu1 %v7609_v13  ;;  %v6853_v13 = vld [vmem:[%s8215_s7 + $0xd0] sm:$0xff]  }
 0x318   : > { %5655 = vmatpush3.bf16.msra.mxu0 %v6844_v56  ;;  %5767 = vmatpush3.bf16.msra.mxu1 %v6846_v63 }
 0x319   : > { %5656 = vmatprep.subr.bf16.mxu0 %v6847_v14  ;;  %5768 = vmatprep.subr.bf16.mxu1 %v6849_v57 }
 0x31c   : > { %5657 = vmatpush3.bf16.msra.mxu0 %v6848_v45  ;;  %5769 = vmatpush3.bf16.msra.mxu1 %v6850_v29 }
 0x31d   : > { %5658 = vmatprep.subr.bf16.mxu0 %v6851_v8  ;;  %5770 = vmatprep.subr.bf16.mxu1 %v6853_v13 }
 0x31e   : > { %3867 = vmatmul.mubr.bf16.gmra.mrb[132].mxu0 %v7607_v38  ;;  %4253 = vmatmul.mubr.bf16.gmra.mrb[132].mxu1 %v7607_v38  ;;  %v6859_v38 = vld [vmem:[%s8215_s7 + $0x60] sm:$0xff]  }
 0x31f   : > { %3876 = vmatprep.mubr.bf16.mxu0 %v7621_v30  ;;  %4262 = vmatprep.mubr.bf16.mxu1 %v7621_v30  ;;  %v6861_v30 = vld [vmem:[%s8215_s7 + $0xe0] sm:$0xff]  }
 0x320   : > { %5659 = vmatpush3.bf16.msra.mxu0 %v6852_v26  ;;  %5771 = vmatpush3.bf16.msra.mxu1 %v6854_v59 }
 0x321   : > { %5660 = vmatprep.subr.bf16.mxu0 %v6855_v25  ;;  %5772 = vmatprep.subr.bf16.mxu1 %v6857_v35 }
 0x324   : > { %5661 = vmatpush3.bf16.msra.mxu0 %v6856_v32  ;;  %5773 = vmatpush3.bf16.msra.mxu1 %v6858_v33 }
 0x325   : > { %5662 = vmatprep.subr.bf16.mxu0 %v6859_v38  ;;  %5774 = vmatprep.subr.bf16.mxu1 %v6861_v30 }
 0x326   : > { %3877 = vmatmul.mubr.bf16.gmra.mrb[136].mxu0 %v7619_v20  ;;  %4263 = vmatmul.mubr.bf16.gmra.mrb[136].mxu1 %v7619_v20  ;;  %v6867_v20 = vld [vmem:[%s8215_s7 + $0x70] sm:$0xff]  }
 0x327   : > { %3886 = vmatprep.mubr.bf16.mxu0 %v7633_v17  ;;  %4272 = vmatprep.mubr.bf16.mxu1 %v7633_v17  ;;  %v6869_v17 = vld [vmem:[%s8215_s7 + $0xf0] sm:$0xff]  }
 0x328   : > { %5663 = vmatpush3.bf16.msra.mxu0 %v6860_v58  ;;  %5775 = vmatpush3.bf16.msra.mxu1 %v6862_v41 }
 0x329   : > { %5664 = vmatprep.subr.bf16.mxu0 %v6863_v24  ;;  %5776 = vmatprep.subr.bf16.mxu1 %v6865_v48 }
 0x32c   : > { %5665 = vmatpush3.bf16.msra.mxu0 %v6864_v51  ;;  %5777 = vmatpush3.bf16.msra.mxu1 %v6866_v42 }
 0x32d   : > { %5666 = vmatprep.subr.bf16.mxu0 %v6867_v20  ;;  %5778 = vmatprep.subr.bf16.mxu1 %v6869_v17 }
 0x32e   : > { %3887 = vmatmul.mubr.bf16.gmra.mrb[140].mxu0 %v7631_v55  ;;  %4273 = vmatmul.mubr.bf16.gmra.mrb[140].mxu1 %v7631_v55  ;;  %v2969_v55 = vld [vmem:[%s8214_s6] sm:$0xf] }
 0x32f   : > { %3896 = vmatprep.mubr.bf16.mxu0 %v7645_v46  ;;  %4282 = vmatprep.mubr.bf16.mxu1 %v7645_v46  ;;  %v7946_v46 = vrot.slane %v2969_v55, %v7307_v6 }
 0x330   : > { %5667 = vmatpush3.bf16.msra.mxu0 %v6868_v47  ;;  %5779 = vmatpush3.bf16.msra.mxu1 %v6870_v2 }
 0x331   : > { %5668 = vmatprep.subr.bf16.mxu0 %v6871_v36  ;;  %5780 = vmatprep.subr.bf16.mxu1 %v6873_v34 }
 0x334   : > { %5669 = vmatpush3.bf16.msra.mxu0 %v6872_v43  ;;  %5781 = vmatpush3.bf16.msra.mxu1 %v6874_v49 }
 0x336   : > { %3897 = vmatmul.mubr.bf16.gmra.mrb[144].mxu0 %v7643_v21  ;;  %4283 = vmatmul.mubr.bf16.gmra.mrb[144].mxu1 %v7643_v21  ;;  %v7943_v21 = vrot.slane %v2969_v55, %v7293_v62 }
 0x337   : > { %3906 = vmatprep.mubr.bf16.mxu0 %v7657_v28  ;;  %4292 = vmatprep.mubr.bf16.mxu1 %v7657_v28  ;;  %v7952_v28 = vrot.slane %v2969_v55, %v7310_v9 }
 0x33e   : > { %3907 = vmatmul.mubr.bf16.gmra.mrb[148].mxu0 %v7655_v44  ;;  %4293 = vmatmul.mubr.bf16.gmra.mrb[148].mxu1 %v7655_v44  ;;  %v7949_v44 = vrot.slane %v2969_v55, %v7298_v1 }
 0x33f   : > { %3916 = vmatprep.mubr.bf16.mxu0 %v7669_v39  ;;  %4302 = vmatprep.mubr.bf16.mxu1 %v7669_v39 }
 0x346   : > { %3917 = vmatmul.mubr.bf16.gmra.mrb[152].mxu0 %v7667_v54  ;;  %4303 = vmatmul.mubr.bf16.gmra.mrb[152].mxu1 %v7667_v54 }
 0x347   : > { %3926 = vmatprep.mubr.bf16.mxu0 %v7681_v31  ;;  %4312 = vmatprep.mubr.bf16.mxu1 %v7681_v31 }
 0x34e   : > { %3927 = vmatmul.mubr.bf16.gmra.mrb[156].mxu0 %v7679_v18  ;;  %4313 = vmatmul.mubr.bf16.gmra.mrb[156].mxu1 %v7679_v18 }
 0x34f   : > { %3936 = vmatprep.mubr.bf16.mxu0 %v7693_v4  ;;  %4322 = vmatprep.mubr.bf16.mxu1 %v7693_v4 }
 0x356   : > { %3937 = vmatmul.mubr.bf16.gmra.mrb[160].mxu0 %v7691_v60  ;;  %4323 = vmatmul.mubr.bf16.gmra.mrb[160].mxu1 %v7691_v60 }
 0x357   : > { %3946 = vmatprep.mubr.bf16.mxu0 %v7705_v37  ;;  %4332 = vmatprep.mubr.bf16.mxu1 %v7705_v37 }
 0x35e   : > { %3947 = vmatmul.mubr.bf16.gmra.mrb[164].mxu0 %v7703_v10  ;;  %4333 = vmatmul.mubr.bf16.gmra.mrb[164].mxu1 %v7703_v10 }
 0x35f   : > { %3956 = vmatprep.mubr.bf16.mxu0 %v7717_v0  ;;  %4342 = vmatprep.mubr.bf16.mxu1 %v7717_v0 }
 0x366   : > { %3957 = vmatmul.mubr.bf16.gmra.mrb[168].mxu0 %v7715_v12  ;;  %4343 = vmatmul.mubr.bf16.gmra.mrb[168].mxu1 %v7715_v12 }
 0x367   : > { %3966 = vmatprep.mubr.bf16.mxu0 %v7729_v27  ;;  %4352 = vmatprep.mubr.bf16.mxu1 %v7729_v27 }
 0x36e   : > { %3967 = vmatmul.mubr.bf16.gmra.mrb[172].mxu0 %v7727_v23  ;;  %4353 = vmatmul.mubr.bf16.gmra.mrb[172].mxu1 %v7727_v23 }
 0x36f   : > { %3976 = vmatprep.mubr.bf16.mxu0 %v7747_v40  ;;  %4362 = vmatprep.mubr.bf16.mxu1 %v7747_v40 }
 0x376   : > { %3977 = vmatmul.mubr.bf16.gmra.mrb[176].mxu0 %v7745_v22  ;;  %4363 = vmatmul.mubr.bf16.gmra.mrb[176].mxu1 %v7745_v22 }
 0x377   : > { %3986 = vmatprep.mubr.bf16.mxu0 %v7759_v16  ;;  %4372 = vmatprep.mubr.bf16.mxu1 %v7759_v16 }
 0x37e   : > { %3987 = vmatmul.mubr.bf16.gmra.mrb[180].mxu0 %v7757_v53  ;;  %4373 = vmatmul.mubr.bf16.gmra.mrb[180].mxu1 %v7757_v53 }
 0x37f   : > { %3996 = vmatprep.mubr.bf16.mxu0 %v7771_v15  ;;  %4382 = vmatprep.mubr.bf16.mxu1 %v7771_v15 }
 0x386   : > { %3997 = vmatmul.mubr.bf16.gmra.mrb[184].mxu0 %v7769_v61  ;;  %4383 = vmatmul.mubr.bf16.gmra.mrb[184].mxu1 %v7769_v61 }
 0x387   : > { %4006 = vmatprep.mubr.bf16.mxu0 %v7783_v19  ;;  %4392 = vmatprep.mubr.bf16.mxu1 %v7783_v19 }
 0x38e   : > { %4007 = vmatmul.mubr.bf16.gmra.mrb[188].mxu0 %v7781_v7  ;;  %4393 = vmatmul.mubr.bf16.gmra.mrb[188].mxu1 %v7781_v7 }
 0x3e9   : > { %v3858_v54 = vpop.f32.mrb[128].mxu0  ;;  %v4244_v39 = vpop.f32.mrb[128].mxu1 }
 0x3ea   : > { %v6006_v18 = vadd.f32 %v3858_v54, %v7943_v21  ;;  %v6070_v31 = vadd.f32 %v4244_v39, %v7946_v46  ;;  %v3860_v60 = vpop.f32.mrb[129].mxu0  ;;  %v4246_v4 = vpop.f32.mrb[129].mxu1 }
 0x3eb   : > { %v6007_v62 = vadd.f32 %v3860_v60, %v7949_v44  ;;  %v6071_v10 = vadd.f32 %v4246_v4, %v7952_v28  ;;  %v3862_v6 = vpop.f32.mrb[130].mxu0  ;;  %v4248_v37 = vpop.f32.mrb[130].mxu1 }
 0x3ec   : > { %v6008_v1 = vadd.f32 %v3862_v6, %v7943_v21  ;;  %v6072_v12 = vadd.f32 %v4248_v37, %v7946_v46  ;;  %v3864_v9 = vpop.f32.mrb[131].mxu0  ;;  %v4250_v0 = vpop.f32.mrb[131].mxu1  ;;  %v4403_v22 = vmax.f32 %v6006_v18, 0.0  ;;  %v4405_v40 = vmax.f32 %v6070_v31, 0.0 }
 0x3ed   : > { %v6009_v23 = vadd.f32 %v3864_v9, %v7949_v44  ;;  %v6073_v27 = vadd.f32 %v4250_v0, %v7952_v28  ;;  %v4404_v61 = vmax.f32 %v6007_v62, 0.0  ;;  %v4406_v15 = vmax.f32 %v6071_v10, 0.0 }
 0x3ee   : > { %v4407_v53 = vmax.f32 %v6008_v1, 0.0  ;;  %v4409_v16 = vmax.f32 %v6072_v12, 0.0 }
 0x3ef   : > { %v4408_v3 = vmax.f32 %v6009_v23, 0.0  ;;  %v4410_v50 = vmax.f32 %v6073_v27, 0.0 }
 0x3f0   : > { %v4531_v52 = vpack.c.bf16 %v4407_v53, %v4403_v22  ;;  %v4533_v5 = vpack.c.bf16 %v4409_v16, %v4405_v40 }
 0x3f1   : > { %v4532_v7 = vpack.c.bf16 %v4408_v3, %v4404_v61  ;;  %v4534_v11 = vpack.c.bf16 %v4410_v50, %v4406_v15  ;;  %v3868_v19 = vpop.f32.mrb[132].mxu0  ;;  %v4254_v56 = vpop.f32.mrb[132].mxu1 }
 0x3f2   : > { %v6010_v63 = vadd.f32 %v3868_v19, %v7943_v21  ;;  %v6074_v14 = vadd.f32 %v4254_v56, %v7946_v46  ;;  %v3870_v57 = vpop.f32.mrb[133].mxu0  ;;  %v4256_v45 = vpop.f32.mrb[133].mxu1 }
 0x3f3   : > { %v6011_v29 = vadd.f32 %v3870_v57, %v7949_v44  ;;  %v6075_v8 = vadd.f32 %v4256_v45, %v7952_v28  ;;  %v3872_v13 = vpop.f32.mrb[134].mxu0  ;;  %v4258_v26 = vpop.f32.mrb[134].mxu1  ;;  %4890 = vmatprep.mubr.bf16.mxu0 %v4532_v7  ;;  %5051 = vmatprep.mubr.bf16.mxu1 %v4534_v11 }
 0x3f4   : > { %v6012_v59 = vadd.f32 %v3872_v13, %v7943_v21  ;;  %v6076_v25 = vadd.f32 %v4258_v26, %v7946_v46  ;;  %v3874_v35 = vpop.f32.mrb[135].mxu0  ;;  %v4260_v32 = vpop.f32.mrb[135].mxu1  ;;  %4891 = vmatmul.mubr.bf16.vlgmr.msra.gmra.mrb[192].mxu0 %v4531_v52  ;;  %5052 = vmatmul.mubr.bf16.vlgmr.msra.gmra.mrb[192].mxu1 %v4533_v5  ;;  %v4411_v30 = vmax.f32 %v6010_v63, 0.0  ;;  %v4413_v58 = vmax.f32 %v6074_v14, 0.0 }
 0x3f5   : > { %v6013_v33 = vadd.f32 %v3874_v35, %v7949_v44  ;;  %v6077_v38 = vadd.f32 %v4260_v32, %v7952_v28  ;;  %v4412_v48 = vmax.f32 %v6011_v29, 0.0  ;;  %v4414_v51 = vmax.f32 %v6075_v8, 0.0 }
 0x3f6   : > { %v4415_v41 = vmax.f32 %v6012_v59, 0.0  ;;  %v4417_v24 = vmax.f32 %v6076_v25, 0.0 }
 0x3f7   : > { %v4416_v42 = vmax.f32 %v6013_v33, 0.0  ;;  %v4418_v20 = vmax.f32 %v6077_v38, 0.0 }
 0x3f8   : > { %v4535_v17 = vpack.c.bf16 %v4415_v41, %v4411_v30  ;;  %v4537_v47 = vpack.c.bf16 %v4417_v24, %v4413_v58 }
 0x3f9   : > { %v4536_v2 = vpack.c.bf16 %v4416_v42, %v4412_v48  ;;  %v4538_v36 = vpack.c.bf16 %v4418_v20, %v4414_v51  ;;  %v3878_v34 = vpop.f32.mrb[136].mxu0  ;;  %v4264_v43 = vpop.f32.mrb[136].mxu1 }
 0x3fa   : > { %v6014_v49 = vadd.f32 %v3878_v34, %v7943_v21  ;;  %v6078_v55 = vadd.f32 %v4264_v43, %v7946_v46  ;;  %v3880_v54 = vpop.f32.mrb[137].mxu0  ;;  %v4266_v39 = vpop.f32.mrb[137].mxu1 }
 0x3fb   : > { %v6015_v18 = vadd.f32 %v3880_v54, %v7949_v44  ;;  %v6079_v31 = vadd.f32 %v4266_v39, %v7952_v28  ;;  %v3882_v60 = vpop.f32.mrb[138].mxu0  ;;  %v4268_v4 = vpop.f32.mrb[138].mxu1  ;;  %4898 = vmatprep.mubr.bf16.mxu0 %v4536_v2  ;;  %5059 = vmatprep.mubr.bf16.mxu1 %v4538_v36 }
 0x3fc   : > { %v6016_v62 = vadd.f32 %v3882_v60, %v7943_v21  ;;  %v6080_v10 = vadd.f32 %v4268_v4, %v7946_v46  ;;  %v3884_v6 = vpop.f32.mrb[139].mxu0  ;;  %v4270_v37 = vpop.f32.mrb[139].mxu1  ;;  %4899 = vmatmul.mubr.bf16.gmra.mrb[196].mxu0 %v4535_v17  ;;  %5060 = vmatmul.mubr.bf16.gmra.mrb[196].mxu1 %v4537_v47  ;;  %v4419_v9 = vmax.f32 %v6014_v49, 0.0  ;;  %v4421_v0 = vmax.f32 %v6078_v55, 0.0 }
 0x3fd   : > { %v6017_v1 = vadd.f32 %v3884_v6, %v7949_v44  ;;  %v6081_v12 = vadd.f32 %v4270_v37, %v7952_v28  ;;  %v4420_v22 = vmax.f32 %v6015_v18, 0.0  ;;  %v4422_v40 = vmax.f32 %v6079_v31, 0.0 }
 0x3fe   : > { %v4423_v23 = vmax.f32 %v6016_v62, 0.0  ;;  %v4425_v27 = vmax.f32 %v6080_v10, 0.0 }
 0x3ff   : > { %v4424_v53 = vmax.f32 %v6017_v1, 0.0  ;;  %v4426_v16 = vmax.f32 %v6081_v12, 0.0 }
 0x400   : > { %v4539_v61 = vpack.c.bf16 %v4423_v23, %v4419_v9  ;;  %v4541_v15 = vpack.c.bf16 %v4425_v27, %v4421_v0 }
 0x401   : > { %v4540_v3 = vpack.c.bf16 %v4424_v53, %v4420_v22  ;;  %v4542_v50 = vpack.c.bf16 %v4426_v16, %v4422_v40  ;;  %v3888_v52 = vpop.f32.mrb[140].mxu0  ;;  %v4274_v5 = vpop.f32.mrb[140].mxu1 }
 0x402   : > { %v6018_v7 = vadd.f32 %v3888_v52, %v7943_v21  ;;  %v6082_v11 = vadd.f32 %v4274_v5, %v7946_v46  ;;  %v3890_v19 = vpop.f32.mrb[141].mxu0  ;;  %v4276_v56 = vpop.f32.mrb[141].mxu1 }
 0x403   : > { %v6019_v63 = vadd.f32 %v3890_v19, %v7949_v44  ;;  %v6083_v14 = vadd.f32 %v4276_v56, %v7952_v28  ;;  %v3892_v57 = vpop.f32.mrb[142].mxu0  ;;  %v4278_v45 = vpop.f32.mrb[142].mxu1  ;;  %4906 = vmatprep.mubr.bf16.mxu0 %v4540_v3  ;;  %5067 = vmatprep.mubr.bf16.mxu1 %v4542_v50 }
 0x404   : > { %v6020_v29 = vadd.f32 %v3892_v57, %v7943_v21  ;;  %v6084_v8 = vadd.f32 %v4278_v45, %v7946_v46  ;;  %v3894_v13 = vpop.f32.mrb[143].mxu0  ;;  %v4280_v26 = vpop.f32.mrb[143].mxu1  ;;  %4907 = vmatmul.mubr.bf16.gmra.mrb[200].mxu0 %v4539_v61  ;;  %5068 = vmatmul.mubr.bf16.gmra.mrb[200].mxu1 %v4541_v15  ;;  %v4427_v35 = vmax.f32 %v6018_v7, 0.0  ;;  %v4429_v32 = vmax.f32 %v6082_v11, 0.0 }
 0x405   : > { %v6021_v59 = vadd.f32 %v3894_v13, %v7949_v44  ;;  %v6085_v25 = vadd.f32 %v4280_v26, %v7952_v28  ;;  %v4428_v30 = vmax.f32 %v6019_v63, 0.0  ;;  %v4430_v58 = vmax.f32 %v6083_v14, 0.0 }
 0x406   : > { %v4431_v33 = vmax.f32 %v6020_v29, 0.0  ;;  %v4433_v38 = vmax.f32 %v6084_v8, 0.0 }
 0x407   : > { %v4432_v41 = vmax.f32 %v6021_v59, 0.0  ;;  %v4434_v24 = vmax.f32 %v6085_v25, 0.0 }
 0x408   : > { %v4543_v48 = vpack.c.bf16 %v4431_v33, %v4427_v35  ;;  %v4545_v51 = vpack.c.bf16 %v4433_v38, %v4429_v32 }
 0x409   : > { %v4544_v42 = vpack.c.bf16 %v4432_v41, %v4428_v30  ;;  %v4546_v20 = vpack.c.bf16 %v4434_v24, %v4430_v58  ;;  %v3898_v17 = vpop.f32.mrb[144].mxu0  ;;  %v4284_v47 = vpop.f32.mrb[144].mxu1 }
 0x40a   : > { %v6022_v2 = vadd.f32 %v3898_v17, %v7943_v21  ;;  %v6086_v36 = vadd.f32 %v4284_v47, %v7946_v46  ;;  %v3900_v34 = vpop.f32.mrb[145].mxu0  ;;  %v4286_v43 = vpop.f32.mrb[145].mxu1 }
 0x40b   : > { %v6023_v49 = vadd.f32 %v3900_v34, %v7949_v44  ;;  %v6087_v55 = vadd.f32 %v4286_v43, %v7952_v28  ;;  %v3902_v54 = vpop.f32.mrb[146].mxu0  ;;  %v4288_v39 = vpop.f32.mrb[146].mxu1  ;;  %4914 = vmatprep.mubr.bf16.mxu0 %v4544_v42  ;;  %5075 = vmatprep.mubr.bf16.mxu1 %v4546_v20 }
 0x40c   : > { %v6024_v18 = vadd.f32 %v3902_v54, %v7943_v21  ;;  %v6088_v31 = vadd.f32 %v4288_v39, %v7946_v46  ;;  %v3904_v60 = vpop.f32.mrb[147].mxu0  ;;  %v4290_v4 = vpop.f32.mrb[147].mxu1  ;;  %4915 = vmatmul.mubr.bf16.gmra.mrb[204].mxu0 %v4543_v48  ;;  %5076 = vmatmul.mubr.bf16.gmra.mrb[204].mxu1 %v4545_v51  ;;  %v4435_v6 = vmax.f32 %v6022_v2, 0.0  ;;  %v4437_v37 = vmax.f32 %v6086_v36, 0.0 }
 0x40d   : > { %v6025_v62 = vadd.f32 %v3904_v60, %v7949_v44  ;;  %v6089_v10 = vadd.f32 %v4290_v4, %v7952_v28  ;;  %v4436_v9 = vmax.f32 %v6023_v49, 0.0  ;;  %v4438_v0 = vmax.f32 %v6087_v55, 0.0 }
 0x40e   : > { %v4439_v1 = vmax.f32 %v6024_v18, 0.0  ;;  %v4441_v12 = vmax.f32 %v6088_v31, 0.0 }
 0x40f   : > { %v4440_v23 = vmax.f32 %v6025_v62, 0.0  ;;  %v4442_v27 = vmax.f32 %v6089_v10, 0.0 }
 0x410   : > { %v4547_v22 = vpack.c.bf16 %v4439_v1, %v4435_v6  ;;  %v4549_v40 = vpack.c.bf16 %v4441_v12, %v4437_v37 }
 0x411   : > { %v4548_v53 = vpack.c.bf16 %v4440_v23, %v4436_v9  ;;  %v4550_v16 = vpack.c.bf16 %v4442_v27, %v4438_v0  ;;  %v3908_v61 = vpop.f32.mrb[148].mxu0  ;;  %v4294_v15 = vpop.f32.mrb[148].mxu1 }
 0x412   : > { %v6026_v3 = vadd.f32 %v3908_v61, %v7943_v21  ;;  %v6090_v50 = vadd.f32 %v4294_v15, %v7946_v46  ;;  %v3910_v52 = vpop.f32.mrb[149].mxu0  ;;  %v4296_v5 = vpop.f32.mrb[149].mxu1 }
 0x413   : > { %v6027_v7 = vadd.f32 %v3910_v52, %v7949_v44  ;;  %v6091_v11 = vadd.f32 %v4296_v5, %v7952_v28  ;;  %v3912_v19 = vpop.f32.mrb[150].mxu0  ;;  %v4298_v56 = vpop.f32.mrb[150].mxu1  ;;  %4922 = vmatprep.mubr.bf16.mxu0 %v4548_v53  ;;  %5083 = vmatprep.mubr.bf16.mxu1 %v4550_v16 }
 0x414   : > { %v6028_v63 = vadd.f32 %v3912_v19, %v7943_v21  ;;  %v6092_v14 = vadd.f32 %v4298_v56, %v7946_v46  ;;  %v3914_v57 = vpop.f32.mrb[151].mxu0  ;;  %v4300_v45 = vpop.f32.mrb[151].mxu1  ;;  %4923 = vmatmul.mubr.bf16.gmra.mrb[208].mxu0 %v4547_v22  ;;  %5084 = vmatmul.mubr.bf16.gmra.mrb[208].mxu1 %v4549_v40  ;;  %v4443_v13 = vmax.f32 %v6026_v3, 0.0  ;;  %v4445_v26 = vmax.f32 %v6090_v50, 0.0 }
 0x415   : > { %v6029_v29 = vadd.f32 %v3914_v57, %v7949_v44  ;;  %v6093_v8 = vadd.f32 %v4300_v45, %v7952_v28  ;;  %v4444_v35 = vmax.f32 %v6027_v7, 0.0  ;;  %v4446_v32 = vmax.f32 %v6091_v11, 0.0 }
 0x416   : > { %v4447_v59 = vmax.f32 %v6028_v63, 0.0  ;;  %v4449_v25 = vmax.f32 %v6092_v14, 0.0 }
 0x417   : > { %v4448_v33 = vmax.f32 %v6029_v29, 0.0  ;;  %v4450_v38 = vmax.f32 %v6093_v8, 0.0 }
 0x418   : > { %v4551_v30 = vpack.c.bf16 %v4447_v59, %v4443_v13  ;;  %v4553_v58 = vpack.c.bf16 %v4449_v25, %v4445_v26 }
 0x419   : > { %v4552_v41 = vpack.c.bf16 %v4448_v33, %v4444_v35  ;;  %v4554_v24 = vpack.c.bf16 %v4450_v38, %v4446_v32  ;;  %v3918_v48 = vpop.f32.mrb[152].mxu0  ;;  %v4304_v51 = vpop.f32.mrb[152].mxu1 }
 0x41a   : > { %v6030_v42 = vadd.f32 %v3918_v48, %v7943_v21  ;;  %v6094_v20 = vadd.f32 %v4304_v51, %v7946_v46  ;;  %v3920_v17 = vpop.f32.mrb[153].mxu0  ;;  %v4306_v47 = vpop.f32.mrb[153].mxu1 }
 0x41b   : > { %v6031_v2 = vadd.f32 %v3920_v17, %v7949_v44  ;;  %v6095_v36 = vadd.f32 %v4306_v47, %v7952_v28  ;;  %v3922_v34 = vpop.f32.mrb[154].mxu0  ;;  %v4308_v43 = vpop.f32.mrb[154].mxu1  ;;  %4930 = vmatprep.mubr.bf16.mxu0 %v4552_v41  ;;  %5091 = vmatprep.mubr.bf16.mxu1 %v4554_v24 }
 0x41c   : > { %v6032_v49 = vadd.f32 %v3922_v34, %v7943_v21  ;;  %v6096_v55 = vadd.f32 %v4308_v43, %v7946_v46  ;;  %v3924_v54 = vpop.f32.mrb[155].mxu0  ;;  %v4310_v39 = vpop.f32.mrb[155].mxu1  ;;  %4931 = vmatmul.mubr.bf16.gmra.mrb[212].mxu0 %v4551_v30  ;;  %5092 = vmatmul.mubr.bf16.gmra.mrb[212].mxu1 %v4553_v58  ;;  %v4451_v60 = vmax.f32 %v6030_v42, 0.0  ;;  %v4453_v4 = vmax.f32 %v6094_v20, 0.0 }
 0x41d   : > { %v6033_v18 = vadd.f32 %v3924_v54, %v7949_v44  ;;  %v6097_v31 = vadd.f32 %v4310_v39, %v7952_v28  ;;  %v4452_v6 = vmax.f32 %v6031_v2, 0.0  ;;  %v4454_v37 = vmax.f32 %v6095_v36, 0.0 }
 0x41e   : > { %v4455_v62 = vmax.f32 %v6032_v49, 0.0  ;;  %v4457_v10 = vmax.f32 %v6096_v55, 0.0 }
 0x41f   : > { %v4456_v1 = vmax.f32 %v6033_v18, 0.0  ;;  %v4458_v12 = vmax.f32 %v6097_v31, 0.0 }
 0x420   : > { %v4555_v9 = vpack.c.bf16 %v4455_v62, %v4451_v60  ;;  %v4557_v0 = vpack.c.bf16 %v4457_v10, %v4453_v4 }
 0x421   : > { %v4556_v23 = vpack.c.bf16 %v4456_v1, %v4452_v6  ;;  %v4558_v27 = vpack.c.bf16 %v4458_v12, %v4454_v37  ;;  %v3928_v22 = vpop.f32.mrb[156].mxu0  ;;  %v4314_v40 = vpop.f32.mrb[156].mxu1 }
 0x422   : > { %v6034_v53 = vadd.f32 %v3928_v22, %v7943_v21  ;;  %v6098_v16 = vadd.f32 %v4314_v40, %v7946_v46  ;;  %v3930_v61 = vpop.f32.mrb[157].mxu0  ;;  %v4316_v15 = vpop.f32.mrb[157].mxu1 }
 0x423   : > { %v6035_v3 = vadd.f32 %v3930_v61, %v7949_v44  ;;  %v6099_v50 = vadd.f32 %v4316_v15, %v7952_v28  ;;  %v3932_v52 = vpop.f32.mrb[158].mxu0  ;;  %v4318_v5 = vpop.f32.mrb[158].mxu1  ;;  %4938 = vmatprep.mubr.bf16.mxu0 %v4556_v23  ;;  %5099 = vmatprep.mubr.bf16.mxu1 %v4558_v27 }
 0x424   : > { %v6036_v7 = vadd.f32 %v3932_v52, %v7943_v21  ;;  %v6100_v11 = vadd.f32 %v4318_v5, %v7946_v46  ;;  %v3934_v19 = vpop.f32.mrb[159].mxu0  ;;  %v4320_v56 = vpop.f32.mrb[159].mxu1  ;;  %4939 = vmatmul.mubr.bf16.gmra.mrb[216].mxu0 %v4555_v9  ;;  %5100 = vmatmul.mubr.bf16.gmra.mrb[216].mxu1 %v4557_v0  ;;  %v4459_v57 = vmax.f32 %v6034_v53, 0.0  ;;  %v4461_v45 = vmax.f32 %v6098_v16, 0.0 }
 0x425   : > { %v6037_v63 = vadd.f32 %v3934_v19, %v7949_v44  ;;  %v6101_v14 = vadd.f32 %v4320_v56, %v7952_v28  ;;  %v4460_v13 = vmax.f32 %v6035_v3, 0.0  ;;  %v4462_v26 = vmax.f32 %v6099_v50, 0.0 }
 0x426   : > { %v4463_v29 = vmax.f32 %v6036_v7, 0.0  ;;  %v4465_v8 = vmax.f32 %v6100_v11, 0.0 }
 0x427   : > { %v4464_v59 = vmax.f32 %v6037_v63, 0.0  ;;  %v4466_v25 = vmax.f32 %v6101_v14, 0.0 }
 0x428   : > { %v4559_v35 = vpack.c.bf16 %v4463_v29, %v4459_v57  ;;  %v4561_v32 = vpack.c.bf16 %v4465_v8, %v4461_v45 }
 0x429   : > { %v4560_v33 = vpack.c.bf16 %v4464_v59, %v4460_v13  ;;  %v4562_v38 = vpack.c.bf16 %v4466_v25, %v4462_v26  ;;  %v3938_v30 = vpop.f32.mrb[160].mxu0  ;;  %v4324_v58 = vpop.f32.mrb[160].mxu1 }
 0x42a   : > { %v6038_v41 = vadd.f32 %v3938_v30, %v7943_v21  ;;  %v6102_v24 = vadd.f32 %v4324_v58, %v7946_v46  ;;  %v3940_v48 = vpop.f32.mrb[161].mxu0  ;;  %v4326_v51 = vpop.f32.mrb[161].mxu1 }
 0x42b   : > { %v6039_v42 = vadd.f32 %v3940_v48, %v7949_v44  ;;  %v6103_v20 = vadd.f32 %v4326_v51, %v7952_v28  ;;  %v3942_v17 = vpop.f32.mrb[162].mxu0  ;;  %v4328_v47 = vpop.f32.mrb[162].mxu1  ;;  %4946 = vmatprep.mubr.bf16.mxu0 %v4560_v33  ;;  %5107 = vmatprep.mubr.bf16.mxu1 %v4562_v38 }
 0x42c   : > { %v6040_v2 = vadd.f32 %v3942_v17, %v7943_v21  ;;  %v6104_v36 = vadd.f32 %v4328_v47, %v7946_v46  ;;  %v3944_v34 = vpop.f32.mrb[163].mxu0  ;;  %v4330_v43 = vpop.f32.mrb[163].mxu1  ;;  %4947 = vmatmul.mubr.bf16.gmra.mrb[220].mxu0 %v4559_v35  ;;  %5108 = vmatmul.mubr.bf16.gmra.mrb[220].mxu1 %v4561_v32  ;;  %v4467_v54 = vmax.f32 %v6038_v41, 0.0  ;;  %v4469_v39 = vmax.f32 %v6102_v24, 0.0 }
 0x42d   : > { %v6041_v49 = vadd.f32 %v3944_v34, %v7949_v44  ;;  %v6105_v55 = vadd.f32 %v4330_v43, %v7952_v28  ;;  %v4468_v60 = vmax.f32 %v6039_v42, 0.0  ;;  %v4470_v4 = vmax.f32 %v6103_v20, 0.0 }
 0x42e   : > { %v4471_v18 = vmax.f32 %v6040_v2, 0.0  ;;  %v4473_v31 = vmax.f32 %v6104_v36, 0.0 }
 0x42f   : > { %v4472_v62 = vmax.f32 %v6041_v49, 0.0  ;;  %v4474_v10 = vmax.f32 %v6105_v55, 0.0 }
 0x430   : > { %v4563_v6 = vpack.c.bf16 %v4471_v18, %v4467_v54  ;;  %v4565_v37 = vpack.c.bf16 %v4473_v31, %v4469_v39 }
 0x431   : > { %v4564_v1 = vpack.c.bf16 %v4472_v62, %v4468_v60  ;;  %v4566_v12 = vpack.c.bf16 %v4474_v10, %v4470_v4  ;;  %v3948_v9 = vpop.f32.mrb[164].mxu0  ;;  %v4334_v0 = vpop.f32.mrb[164].mxu1 }
 0x432   : > { %v6042_v23 = vadd.f32 %v3948_v9, %v7943_v21  ;;  %v6106_v27 = vadd.f32 %v4334_v0, %v7946_v46  ;;  %v3950_v22 = vpop.f32.mrb[165].mxu0  ;;  %v4336_v40 = vpop.f32.mrb[165].mxu1 }
 0x433   : > { %v6043_v53 = vadd.f32 %v3950_v22, %v7949_v44  ;;  %v6107_v16 = vadd.f32 %v4336_v40, %v7952_v28  ;;  %v3952_v61 = vpop.f32.mrb[166].mxu0  ;;  %v4338_v15 = vpop.f32.mrb[166].mxu1  ;;  %4954 = vmatprep.mubr.bf16.mxu0 %v4564_v1  ;;  %5115 = vmatprep.mubr.bf16.mxu1 %v4566_v12 }
 0x434   : > { %v6044_v3 = vadd.f32 %v3952_v61, %v7943_v21  ;;  %v6108_v50 = vadd.f32 %v4338_v15, %v7946_v46  ;;  %v3954_v52 = vpop.f32.mrb[167].mxu0  ;;  %v4340_v5 = vpop.f32.mrb[167].mxu1  ;;  %4955 = vmatmul.mubr.bf16.gmra.mrb[224].mxu0 %v4563_v6  ;;  %5116 = vmatmul.mubr.bf16.gmra.mrb[224].mxu1 %v4565_v37  ;;  %v4475_v19 = vmax.f32 %v6042_v23, 0.0  ;;  %v4477_v56 = vmax.f32 %v6106_v27, 0.0 }
 0x435   : > { %v6045_v7 = vadd.f32 %v3954_v52, %v7949_v44  ;;  %v6109_v11 = vadd.f32 %v4340_v5, %v7952_v28  ;;  %v4476_v57 = vmax.f32 %v6043_v53, 0.0  ;;  %v4478_v45 = vmax.f32 %v6107_v16, 0.0 }
 0x436   : > { %v4479_v63 = vmax.f32 %v6044_v3, 0.0  ;;  %v4481_v14 = vmax.f32 %v6108_v50, 0.0 }
 0x437   : > { %v4480_v29 = vmax.f32 %v6045_v7, 0.0  ;;  %v4482_v8 = vmax.f32 %v6109_v11, 0.0 }
 0x438   : > { %v4567_v13 = vpack.c.bf16 %v4479_v63, %v4475_v19  ;;  %v4569_v26 = vpack.c.bf16 %v4481_v14, %v4477_v56 }
 0x439   : > { %v4568_v59 = vpack.c.bf16 %v4480_v29, %v4476_v57  ;;  %v4570_v25 = vpack.c.bf16 %v4482_v8, %v4478_v45  ;;  %v3958_v35 = vpop.f32.mrb[168].mxu0  ;;  %v4344_v32 = vpop.f32.mrb[168].mxu1 }
 0x43a   : > { %v6046_v33 = vadd.f32 %v3958_v35, %v7943_v21  ;;  %v6110_v38 = vadd.f32 %v4344_v32, %v7946_v46  ;;  %v3960_v30 = vpop.f32.mrb[169].mxu0  ;;  %v4346_v58 = vpop.f32.mrb[169].mxu1 }
 0x43b   : > { %v6047_v41 = vadd.f32 %v3960_v30, %v7949_v44  ;;  %v6111_v24 = vadd.f32 %v4346_v58, %v7952_v28  ;;  %v3962_v48 = vpop.f32.mrb[170].mxu0  ;;  %v4348_v51 = vpop.f32.mrb[170].mxu1  ;;  %4962 = vmatprep.mubr.bf16.mxu0 %v4568_v59  ;;  %5123 = vmatprep.mubr.bf16.mxu1 %v4570_v25 }
 0x43c   : > { %v6048_v42 = vadd.f32 %v3962_v48, %v7943_v21  ;;  %v6112_v20 = vadd.f32 %v4348_v51, %v7946_v46  ;;  %v3964_v17 = vpop.f32.mrb[171].mxu0  ;;  %v4350_v47 = vpop.f32.mrb[171].mxu1  ;;  %4963 = vmatmul.mubr.bf16.gmra.mrb[228].mxu0 %v4567_v13  ;;  %5124 = vmatmul.mubr.bf16.gmra.mrb[228].mxu1 %v4569_v26  ;;  %v4483_v34 = vmax.f32 %v6046_v33, 0.0  ;;  %v4485_v43 = vmax.f32 %v6110_v38, 0.0 }
 0x43d   : > { %v6049_v2 = vadd.f32 %v3964_v17, %v7949_v44  ;;  %v6113_v36 = vadd.f32 %v4350_v47, %v7952_v28  ;;  %v4484_v54 = vmax.f32 %v6047_v41, 0.0  ;;  %v4486_v39 = vmax.f32 %v6111_v24, 0.0 }
 0x43e   : > { %v4487_v49 = vmax.f32 %v6048_v42, 0.0  ;;  %v4489_v55 = vmax.f32 %v6112_v20, 0.0 }
 0x43f   : > { %v4488_v18 = vmax.f32 %v6049_v2, 0.0  ;;  %v4490_v31 = vmax.f32 %v6113_v36, 0.0 }
 0x440   : > { %v4571_v60 = vpack.c.bf16 %v4487_v49, %v4483_v34  ;;  %v4573_v4 = vpack.c.bf16 %v4489_v55, %v4485_v43 }
 0x441   : > { %v4572_v62 = vpack.c.bf16 %v4488_v18, %v4484_v54  ;;  %v4574_v10 = vpack.c.bf16 %v4490_v31, %v4486_v39  ;;  %v3968_v6 = vpop.f32.mrb[172].mxu0  ;;  %v4354_v37 = vpop.f32.mrb[172].mxu1 }
 0x442   : > { %v6050_v1 = vadd.f32 %v3968_v6, %v7943_v21  ;;  %v6114_v12 = vadd.f32 %v4354_v37, %v7946_v46  ;;  %v3970_v9 = vpop.f32.mrb[173].mxu0  ;;  %v4356_v0 = vpop.f32.mrb[173].mxu1 }
 0x443   : > { %v6051_v23 = vadd.f32 %v3970_v9, %v7949_v44  ;;  %v6115_v27 = vadd.f32 %v4356_v0, %v7952_v28  ;;  %v3972_v22 = vpop.f32.mrb[174].mxu0  ;;  %v4358_v40 = vpop.f32.mrb[174].mxu1  ;;  %4970 = vmatprep.mubr.bf16.mxu0 %v4572_v62  ;;  %5131 = vmatprep.mubr.bf16.mxu1 %v4574_v10 }
 0x444   : > { %v6052_v53 = vadd.f32 %v3972_v22, %v7943_v21  ;;  %v6116_v16 = vadd.f32 %v4358_v40, %v7946_v46  ;;  %v3974_v61 = vpop.f32.mrb[175].mxu0  ;;  %v4360_v15 = vpop.f32.mrb[175].mxu1  ;;  %4971 = vmatmul.mubr.bf16.gmra.mrb[232].mxu0 %v4571_v60  ;;  %5132 = vmatmul.mubr.bf16.gmra.mrb[232].mxu1 %v4573_v4  ;;  %v4491_v52 = vmax.f32 %v6050_v1, 0.0  ;;  %v4493_v5 = vmax.f32 %v6114_v12, 0.0 }
 0x445   : > { %v6053_v3 = vadd.f32 %v3974_v61, %v7949_v44  ;;  %v6117_v50 = vadd.f32 %v4360_v15, %v7952_v28  ;;  %v4492_v19 = vmax.f32 %v6051_v23, 0.0  ;;  %v4494_v56 = vmax.f32 %v6115_v27, 0.0 }
 0x446   : > { %v4495_v7 = vmax.f32 %v6052_v53, 0.0  ;;  %v4497_v11 = vmax.f32 %v6116_v16, 0.0 }
 0x447   : > { %v4496_v63 = vmax.f32 %v6053_v3, 0.0  ;;  %v4498_v14 = vmax.f32 %v6117_v50, 0.0 }
 0x448   : > { %v4575_v57 = vpack.c.bf16 %v4495_v7, %v4491_v52  ;;  %v4577_v45 = vpack.c.bf16 %v4497_v11, %v4493_v5 }
 0x449   : > { %v4576_v29 = vpack.c.bf16 %v4496_v63, %v4492_v19  ;;  %v4578_v8 = vpack.c.bf16 %v4498_v14, %v4494_v56  ;;  %v3978_v13 = vpop.f32.mrb[176].mxu0  ;;  %v4364_v26 = vpop.f32.mrb[176].mxu1 }
 0x44a   : > { %v6054_v59 = vadd.f32 %v3978_v13, %v7943_v21  ;;  %v6118_v25 = vadd.f32 %v4364_v26, %v7946_v46  ;;  %v3980_v35 = vpop.f32.mrb[177].mxu0  ;;  %v4366_v32 = vpop.f32.mrb[177].mxu1 }
 0x44b   : > { %v6055_v33 = vadd.f32 %v3980_v35, %v7949_v44  ;;  %v6119_v38 = vadd.f32 %v4366_v32, %v7952_v28  ;;  %v3982_v30 = vpop.f32.mrb[178].mxu0  ;;  %v4368_v58 = vpop.f32.mrb[178].mxu1  ;;  %4978 = vmatprep.mubr.bf16.mxu0 %v4576_v29  ;;  %5139 = vmatprep.mubr.bf16.mxu1 %v4578_v8 }
 0x44c   : > { %v6056_v41 = vadd.f32 %v3982_v30, %v7943_v21  ;;  %v6120_v24 = vadd.f32 %v4368_v58, %v7946_v46  ;;  %v3984_v48 = vpop.f32.mrb[179].mxu0  ;;  %v4370_v51 = vpop.f32.mrb[179].mxu1  ;;  %4979 = vmatmul.mubr.bf16.gmra.mrb[236].mxu0 %v4575_v57  ;;  %5140 = vmatmul.mubr.bf16.gmra.mrb[236].mxu1 %v4577_v45  ;;  %v4499_v17 = vmax.f32 %v6054_v59, 0.0  ;;  %v4501_v47 = vmax.f32 %v6118_v25, 0.0 }
 0x44d   : > { %v6057_v42 = vadd.f32 %v3984_v48, %v7949_v44  ;;  %v6121_v20 = vadd.f32 %v4370_v51, %v7952_v28  ;;  %v4500_v34 = vmax.f32 %v6055_v33, 0.0  ;;  %v4502_v43 = vmax.f32 %v6119_v38, 0.0 }
 0x44e   : > { %v4503_v2 = vmax.f32 %v6056_v41, 0.0  ;;  %v4505_v36 = vmax.f32 %v6120_v24, 0.0 }
 0x44f   : > { %v4504_v49 = vmax.f32 %v6057_v42, 0.0  ;;  %v4506_v55 = vmax.f32 %v6121_v20, 0.0 }
 0x450   : > { %v4579_v54 = vpack.c.bf16 %v4503_v2, %v4499_v17  ;;  %v4581_v39 = vpack.c.bf16 %v4505_v36, %v4501_v47 }
 0x451   : > { %v4580_v18 = vpack.c.bf16 %v4504_v49, %v4500_v34  ;;  %v4582_v31 = vpack.c.bf16 %v4506_v55, %v4502_v43  ;;  %v3988_v60 = vpop.f32.mrb[180].mxu0  ;;  %v4374_v4 = vpop.f32.mrb[180].mxu1 }
 0x452   : > { %v6058_v62 = vadd.f32 %v3988_v60, %v7943_v21  ;;  %v6122_v10 = vadd.f32 %v4374_v4, %v7946_v46  ;;  %v3990_v6 = vpop.f32.mrb[181].mxu0  ;;  %v4376_v37 = vpop.f32.mrb[181].mxu1 }
 0x453   : > { %v6059_v1 = vadd.f32 %v3990_v6, %v7949_v44  ;;  %v6123_v12 = vadd.f32 %v4376_v37, %v7952_v28  ;;  %v3992_v9 = vpop.f32.mrb[182].mxu0  ;;  %v4378_v0 = vpop.f32.mrb[182].mxu1  ;;  %4986 = vmatprep.mubr.bf16.mxu0 %v4580_v18  ;;  %5147 = vmatprep.mubr.bf16.mxu1 %v4582_v31 }
 0x454   : > { %v6060_v23 = vadd.f32 %v3992_v9, %v7943_v21  ;;  %v6124_v27 = vadd.f32 %v4378_v0, %v7946_v46  ;;  %v3994_v22 = vpop.f32.mrb[183].mxu0  ;;  %v4380_v40 = vpop.f32.mrb[183].mxu1  ;;  %4987 = vmatmul.mubr.bf16.gmra.mrb[240].mxu0 %v4579_v54  ;;  %5148 = vmatmul.mubr.bf16.gmra.mrb[240].mxu1 %v4581_v39  ;;  %v4507_v61 = vmax.f32 %v6058_v62, 0.0  ;;  %v4509_v15 = vmax.f32 %v6122_v10, 0.0 }
 0x455   : > { %v6061_v53 = vadd.f32 %v3994_v22, %v7949_v44  ;;  %v6125_v16 = vadd.f32 %v4380_v40, %v7952_v28  ;;  %v4508_v52 = vmax.f32 %v6059_v1, 0.0  ;;  %v4510_v5 = vmax.f32 %v6123_v12, 0.0 }
 0x456   : > { %v4511_v3 = vmax.f32 %v6060_v23, 0.0  ;;  %v4513_v50 = vmax.f32 %v6124_v27, 0.0 }
 0x457   : > { %v4512_v7 = vmax.f32 %v6061_v53, 0.0  ;;  %v4514_v11 = vmax.f32 %v6125_v16, 0.0 }
 0x458   : > { %v4583_v19 = vpack.c.bf16 %v4511_v3, %v4507_v61  ;;  %v4585_v56 = vpack.c.bf16 %v4513_v50, %v4509_v15 }
 0x459   : > { %v4584_v63 = vpack.c.bf16 %v4512_v7, %v4508_v52  ;;  %v4586_v14 = vpack.c.bf16 %v4514_v11, %v4510_v5  ;;  %v3998_v57 = vpop.f32.mrb[184].mxu0  ;;  %v4384_v45 = vpop.f32.mrb[184].mxu1  ;;  %v8086_v7 = vld [vmem:[%s8216_s8] ss:$0 sm:$0xff] }
 0x45a   : > { %v6062_v29 = vadd.f32 %v3998_v57, %v7943_v21  ;;  %v6126_v8 = vadd.f32 %v4384_v45, %v7946_v46  ;;  %v4000_v13 = vpop.f32.mrb[185].mxu0  ;;  %v4386_v26 = vpop.f32.mrb[185].mxu1 }
 0x45b   : > { %v6063_v59 = vadd.f32 %v4000_v13, %v7949_v44  ;;  %v6127_v25 = vadd.f32 %v4386_v26, %v7952_v28  ;;  %v4002_v35 = vpop.f32.mrb[186].mxu0  ;;  %v4388_v32 = vpop.f32.mrb[186].mxu1  ;;  %4994 = vmatprep.mubr.bf16.mxu0 %v4584_v63  ;;  %5155 = vmatprep.mubr.bf16.mxu1 %v4586_v14 }
 0x45c   : > { %v6064_v33 = vadd.f32 %v4002_v35, %v7943_v21  ;;  %v6128_v38 = vadd.f32 %v4388_v32, %v7946_v46  ;;  %v4004_v30 = vpop.f32.mrb[187].mxu0  ;;  %v4390_v58 = vpop.f32.mrb[187].mxu1  ;;  %4995 = vmatmul.mubr.bf16.gmra.mrb[244].mxu0 %v4583_v19  ;;  %5156 = vmatmul.mubr.bf16.gmra.mrb[244].mxu1 %v4585_v56  ;;  %v4515_v48 = vmax.f32 %v6062_v29, 0.0  ;;  %v4517_v51 = vmax.f32 %v6126_v8, 0.0 }
 0x45d   : > { %v6065_v41 = vadd.f32 %v4004_v30, %v7949_v44  ;;  %v6129_v24 = vadd.f32 %v4390_v58, %v7952_v28  ;;  %v4516_v17 = vmax.f32 %v6063_v59, 0.0  ;;  %v4518_v47 = vmax.f32 %v6127_v25, 0.0 }
 0x45e   : > { %v4519_v42 = vmax.f32 %v6064_v33, 0.0  ;;  %v4521_v20 = vmax.f32 %v6128_v38, 0.0 }
 0x45f   : > { %v4520_v2 = vmax.f32 %v6065_v41, 0.0  ;;  %v4522_v36 = vmax.f32 %v6129_v24, 0.0 }
 0x460   : > { %v4587_v34 = vpack.c.bf16 %v4519_v42, %v4515_v48  ;;  %v4589_v43 = vpack.c.bf16 %v4521_v20, %v4517_v51 }
 0x461   : > { %v4588_v49 = vpack.c.bf16 %v4520_v2, %v4516_v17  ;;  %v4590_v55 = vpack.c.bf16 %v4522_v36, %v4518_v47  ;;  %v4008_v54 = vpop.f32.mrb[188].mxu0  ;;  %v4394_v39 = vpop.f32.mrb[188].mxu1 }
 0x462   : > { %v6066_v18 = vadd.f32 %v4008_v54, %v7943_v21  ;;  %v6130_v31 = vadd.f32 %v4394_v39, %v7946_v46  ;;  %v4010_v60 = vpop.f32.mrb[189].mxu0  ;;  %v4396_v4 = vpop.f32.mrb[189].mxu1 }
 0x463   : > { %v6067_v62 = vadd.f32 %v4010_v60, %v7949_v44  ;;  %v6131_v10 = vadd.f32 %v4396_v4, %v7952_v28  ;;  %v4012_v6 = vpop.f32.mrb[190].mxu0  ;;  %v4398_v37 = vpop.f32.mrb[190].mxu1  ;;  %5002 = vmatprep.mubr.bf16.mxu0 %v4588_v49  ;;  %5163 = vmatprep.mubr.bf16.mxu1 %v4590_v55 }
 0x464   : > { %v6068_v1 = vadd.f32 %v4012_v6, %v7943_v21  ;;  %v6132_v12 = vadd.f32 %v4398_v37, %v7946_v46  ;;  %v4014_v9 = vpop.f32.mrb[191].mxu0  ;;  %v4400_v0 = vpop.f32.mrb[191].mxu1  ;;  %5003 = vmatmul.mubr.bf16.gmra.mrb[248].mxu0 %v4587_v34  ;;  %5164 = vmatmul.mubr.bf16.gmra.mrb[248].mxu1 %v4589_v43  ;;  %v4523_v22 = vmax.f32 %v6066_v18, 0.0  ;;  %v4525_v40 = vmax.f32 %v6130_v31, 0.0 }
 0x465   : > { %v6069_v23 = vadd.f32 %v4014_v9, %v7949_v44  ;;  %v6133_v27 = vadd.f32 %v4400_v0, %v7952_v28  ;;  %v4524_v61 = vmax.f32 %v6067_v62, 0.0  ;;  %v4526_v15 = vmax.f32 %v6131_v10, 0.0 }
 0x466   : > { %v4527_v53 = vmax.f32 %v6068_v1, 0.0  ;;  %v4529_v16 = vmax.f32 %v6132_v12, 0.0 }
 0x467   : > { %v4528_v3 = vmax.f32 %v6069_v23, 0.0  ;;  %v4530_v50 = vmax.f32 %v6133_v27, 0.0 }
 0x468   : > { %v4591_v21 = vpack.c.bf16 %v4527_v53, %v4523_v22  ;;  %v4593_v46 = vpack.c.bf16 %v4529_v16, %v4525_v40 }
 0x469   : > { %v4592_v52 = vpack.c.bf16 %v4528_v3, %v4524_v61  ;;  %v4594_v5 = vpack.c.bf16 %v4530_v50, %v4526_v15 }
 0x46b   : > { %5010 = vmatprep.mubr.bf16.mxu0 %v4592_v52  ;;  %5171 = vmatprep.mubr.bf16.mxu1 %v4594_v5 }
 0x46c   : > { %5011 = vmatmul.mubr.bf16.gmra.mrb[252].mxu0 %v4591_v21  ;;  %5172 = vmatmul.mubr.bf16.gmra.mrb[252].mxu1 %v4593_v46 }
 0x4c7   : > { %v5670_v44 = vpop.f32.mrb[192].mxu0  ;;  %v5782_v28 = vpop.f32.mrb[192].mxu1 }
 0x4c8   : > { %v5671_v11 = vpop.f32.mrb[193].mxu0  ;;  %v5783_v19 = vpop.f32.mrb[193].mxu1 }
 0x4c9   : > { %v5672_v56 = vadd.f32 %v5671_v11, %v5670_v44  ;;  %v5784_v63 = vadd.f32 %v5783_v19, %v5782_v28  ;;  %v5673_v14 = vpop.f32.mrb[194].mxu0  ;;  %v5785_v57 = vpop.f32.mrb[194].mxu1 }
 0x4ca   : > { %v5674_v45 = vpop.f32.mrb[195].mxu0  ;;  %v5786_v29 = vpop.f32.mrb[195].mxu1 }
 0x4cb   : > { %v4893_v8 = vadd.f32 %v5672_v56, %v8086_v7  ;;  %v5675_v13 = vadd.f32 %v5674_v45, %v5673_v14  ;;  %v5787_v26 = vadd.f32 %v5786_v29, %v5785_v57 }
 0x4cd   : > { %v5054_v59 = vadd.f32 %v5784_v63, %v4893_v8  ;;  %v4896_v25 = vadd.f32 %v5675_v13, %v8086_v7 }
 0x4cf   : > { %5180 = vst [vmem:[%s8092_s16] sm:$0xff] %v5054_v59  ;;  %v5057_v35 = vadd.f32 %v5787_v26, %v4896_v25  ;;  %v5676_v32 = vpop.f32.mrb[196].mxu0  ;;  %v5788_v33 = vpop.f32.mrb[196].mxu1 }
 0x4d0   : > { %v5677_v38 = vpop.f32.mrb[197].mxu0  ;;  %v5789_v30 = vpop.f32.mrb[197].mxu1 }
 0x4d1   : > { %5181 = vst [vmem:[%s8092_s16 + $0x8] sm:$0xff] %v5057_v35  ;;  %v5678_v58 = vadd.f32 %v5677_v38, %v5676_v32  ;;  %v5790_v41 = vadd.f32 %v5789_v30, %v5788_v33  ;;  %v5679_v24 = vpop.f32.mrb[198].mxu0  ;;  %v5791_v48 = vpop.f32.mrb[198].mxu1 }
 0x4d2   : > { %v5680_v51 = vpop.f32.mrb[199].mxu0  ;;  %v5792_v42 = vpop.f32.mrb[199].mxu1 }
 0x4d3   : > { %v4901_v20 = vadd.f32 %v5678_v58, %v8086_v7  ;;  %v5681_v17 = vadd.f32 %v5680_v51, %v5679_v24  ;;  %v5793_v47 = vadd.f32 %v5792_v42, %v5791_v48 }
 0x4d5   : > { %v5062_v2 = vadd.f32 %v5790_v41, %v4901_v20  ;;  %v4904_v36 = vadd.f32 %v5681_v17, %v8086_v7 }
 0x4d7   : > { %5182 = vst [vmem:[%s8092_s16 + $0x10] sm:$0xff] %v5062_v2  ;;  %v5065_v34 = vadd.f32 %v5793_v47, %v4904_v36  ;;  %v5682_v43 = vpop.f32.mrb[200].mxu0  ;;  %v5794_v49 = vpop.f32.mrb[200].mxu1 }
 0x4d8   : > { %v5683_v55 = vpop.f32.mrb[201].mxu0  ;;  %v5795_v54 = vpop.f32.mrb[201].mxu1 }
 0x4d9   : > { %5183 = vst [vmem:[%s8092_s16 + $0x18] sm:$0xff] %v5065_v34  ;;  %v5684_v39 = vadd.f32 %v5683_v55, %v5682_v43  ;;  %v5796_v18 = vadd.f32 %v5795_v54, %v5794_v49  ;;  %v5685_v31 = vpop.f32.mrb[202].mxu0  ;;  %v5797_v60 = vpop.f32.mrb[202].mxu1 }
 0x4da   : > { %v5686_v4 = vpop.f32.mrb[203].mxu0  ;;  %v5798_v62 = vpop.f32.mrb[203].mxu1 }
 0x4db   : > { %v4909_v10 = vadd.f32 %v5684_v39, %v8086_v7  ;;  %v5687_v6 = vadd.f32 %v5686_v4, %v5685_v31  ;;  %v5799_v37 = vadd.f32 %v5798_v62, %v5797_v60 }
 0x4dd   : > { %v5070_v1 = vadd.f32 %v5796_v18, %v4909_v10  ;;  %v4912_v12 = vadd.f32 %v5687_v6, %v8086_v7 }
 0x4df   : > { %5184 = vst [vmem:[%s8092_s16 + $0x20] sm:$0xff] %v5070_v1  ;;  %v5073_v9 = vadd.f32 %v5799_v37, %v4912_v12  ;;  %v5688_v0 = vpop.f32.mrb[204].mxu0  ;;  %v5800_v23 = vpop.f32.mrb[204].mxu1 }
 0x4e0   : > { %v5689_v27 = vpop.f32.mrb[205].mxu0  ;;  %v5801_v22 = vpop.f32.mrb[205].mxu1 }
 0x4e1   : > { %5185 = vst [vmem:[%s8092_s16 + $0x28] sm:$0xff] %v5073_v9  ;;  %v5690_v40 = vadd.f32 %v5689_v27, %v5688_v0  ;;  %v5802_v53 = vadd.f32 %v5801_v22, %v5800_v23  ;;  %v5691_v16 = vpop.f32.mrb[206].mxu0  ;;  %v5803_v61 = vpop.f32.mrb[206].mxu1 }
 0x4e2   : > { %v5692_v15 = vpop.f32.mrb[207].mxu0  ;;  %v5804_v3 = vpop.f32.mrb[207].mxu1 }
 0x4e3   : > { %v4917_v50 = vadd.f32 %v5690_v40, %v8086_v7  ;;  %v5693_v21 = vadd.f32 %v5692_v15, %v5691_v16  ;;  %v5805_v46 = vadd.f32 %v5804_v3, %v5803_v61 }
 0x4e5   : > { %v5078_v52 = vadd.f32 %v5802_v53, %v4917_v50  ;;  %v4920_v5 = vadd.f32 %v5693_v21, %v8086_v7 }
 0x4e7   : > { %5186 = vst [vmem:[%s8092_s16 + $0x30] sm:$0xff] %v5078_v52  ;;  %v5081_v44 = vadd.f32 %v5805_v46, %v4920_v5  ;;  %v5694_v28 = vpop.f32.mrb[208].mxu0  ;;  %v5806_v11 = vpop.f32.mrb[208].mxu1 }
 0x4e8   : > { %v5695_v19 = vpop.f32.mrb[209].mxu0  ;;  %v5807_v56 = vpop.f32.mrb[209].mxu1 }
 0x4e9   : > { %5187 = vst [vmem:[%s8092_s16 + $0x38] sm:$0xff] %v5081_v44  ;;  %v5696_v63 = vadd.f32 %v5695_v19, %v5694_v28  ;;  %v5808_v14 = vadd.f32 %v5807_v56, %v5806_v11  ;;  %v5697_v57 = vpop.f32.mrb[210].mxu0  ;;  %v5809_v45 = vpop.f32.mrb[210].mxu1 }
 0x4ea   : > { %v5698_v29 = vpop.f32.mrb[211].mxu0  ;;  %v5810_v8 = vpop.f32.mrb[211].mxu1 }
 0x4eb   : > { %v4925_v13 = vadd.f32 %v5696_v63, %v8086_v7  ;;  %v5699_v26 = vadd.f32 %v5698_v29, %v5697_v57  ;;  %v5811_v59 = vadd.f32 %v5810_v8, %v5809_v45 }
 0x4ed   : > { %v5086_v25 = vadd.f32 %v5808_v14, %v4925_v13  ;;  %v4928_v35 = vadd.f32 %v5699_v26, %v8086_v7 }
 0x4ef   : > { %5188 = vst [vmem:[%s8092_s16 + $0x40] sm:$0xff] %v5086_v25  ;;  %v5089_v32 = vadd.f32 %v5811_v59, %v4928_v35  ;;  %v5700_v33 = vpop.f32.mrb[212].mxu0  ;;  %v5812_v38 = vpop.f32.mrb[212].mxu1 }
 0x4f0   : > { %v5701_v30 = vpop.f32.mrb[213].mxu0  ;;  %v5813_v58 = vpop.f32.mrb[213].mxu1 }
 0x4f1   : > { %5189 = vst [vmem:[%s8092_s16 + $0x48] sm:$0xff] %v5089_v32  ;;  %v5702_v41 = vadd.f32 %v5701_v30, %v5700_v33  ;;  %v5814_v24 = vadd.f32 %v5813_v58, %v5812_v38  ;;  %v5703_v48 = vpop.f32.mrb[214].mxu0  ;;  %v5815_v51 = vpop.f32.mrb[214].mxu1 }
 0x4f2   : > { %v5704_v42 = vpop.f32.mrb[215].mxu0  ;;  %v5816_v20 = vpop.f32.mrb[215].mxu1 }
 0x4f3   : > { %v4933_v17 = vadd.f32 %v5702_v41, %v8086_v7  ;;  %v5705_v47 = vadd.f32 %v5704_v42, %v5703_v48  ;;  %v5817_v2 = vadd.f32 %v5816_v20, %v5815_v51 }
 0x4f5   : > { %v5094_v36 = vadd.f32 %v5814_v24, %v4933_v17  ;;  %v4936_v34 = vadd.f32 %v5705_v47, %v8086_v7 }
 0x4f7   : > { %5190 = vst [vmem:[%s8092_s16 + $0x50] sm:$0xff] %v5094_v36  ;;  %v5097_v43 = vadd.f32 %v5817_v2, %v4936_v34  ;;  %v5706_v49 = vpop.f32.mrb[216].mxu0  ;;  %v5818_v55 = vpop.f32.mrb[216].mxu1 }
 0x4f8   : > { %v5707_v54 = vpop.f32.mrb[217].mxu0  ;;  %v5819_v39 = vpop.f32.mrb[217].mxu1 }
 0x4f9   : > { %5191 = vst [vmem:[%s8092_s16 + $0x58] sm:$0xff] %v5097_v43  ;;  %v5708_v18 = vadd.f32 %v5707_v54, %v5706_v49  ;;  %v5820_v31 = vadd.f32 %v5819_v39, %v5818_v55  ;;  %v5709_v60 = vpop.f32.mrb[218].mxu0  ;;  %v5821_v4 = vpop.f32.mrb[218].mxu1 }
 0x4fa   : > { %v5710_v62 = vpop.f32.mrb[219].mxu0  ;;  %v5822_v10 = vpop.f32.mrb[219].mxu1 }
 0x4fb   : > { %v4941_v6 = vadd.f32 %v5708_v18, %v8086_v7  ;;  %v5711_v37 = vadd.f32 %v5710_v62, %v5709_v60  ;;  %v5823_v1 = vadd.f32 %v5822_v10, %v5821_v4 }
 0x4fd   : > { %v5102_v12 = vadd.f32 %v5820_v31, %v4941_v6  ;;  %v4944_v9 = vadd.f32 %v5711_v37, %v8086_v7 }
 0x4ff   : > { %5192 = vst [vmem:[%s8092_s16 + $0x60] sm:$0xff] %v5102_v12  ;;  %v5105_v0 = vadd.f32 %v5823_v1, %v4944_v9  ;;  %v5712_v23 = vpop.f32.mrb[220].mxu0  ;;  %v5824_v27 = vpop.f32.mrb[220].mxu1 }
 0x500   : > { %v5713_v22 = vpop.f32.mrb[221].mxu0  ;;  %v5825_v40 = vpop.f32.mrb[221].mxu1 }
 0x501   : > { %5193 = vst [vmem:[%s8092_s16 + $0x68] sm:$0xff] %v5105_v0  ;;  %v5714_v53 = vadd.f32 %v5713_v22, %v5712_v23  ;;  %v5826_v16 = vadd.f32 %v5825_v40, %v5824_v27  ;;  %v5715_v61 = vpop.f32.mrb[222].mxu0  ;;  %v5827_v15 = vpop.f32.mrb[222].mxu1 }
 0x502   : > { %v5716_v3 = vpop.f32.mrb[223].mxu0  ;;  %v5828_v50 = vpop.f32.mrb[223].mxu1 }
 0x503   : > { %v4949_v21 = vadd.f32 %v5714_v53, %v8086_v7  ;;  %v5717_v46 = vadd.f32 %v5716_v3, %v5715_v61  ;;  %v5829_v52 = vadd.f32 %v5828_v50, %v5827_v15 }
 0x505   : > { %v5110_v5 = vadd.f32 %v5826_v16, %v4949_v21  ;;  %v4952_v44 = vadd.f32 %v5717_v46, %v8086_v7 }
 0x507   : > { %5194 = vst [vmem:[%s8092_s16 + $0x70] sm:$0xff] %v5110_v5  ;;  %v5113_v28 = vadd.f32 %v5829_v52, %v4952_v44  ;;  %v5718_v11 = vpop.f32.mrb[224].mxu0  ;;  %v5830_v19 = vpop.f32.mrb[224].mxu1 }
 0x508   : > { %v5719_v56 = vpop.f32.mrb[225].mxu0  ;;  %v5831_v63 = vpop.f32.mrb[225].mxu1 }
 0x509   : > { %5195 = vst [vmem:[%s8092_s16 + $0x78] sm:$0xff] %v5113_v28  ;;  %v5720_v14 = vadd.f32 %v5719_v56, %v5718_v11  ;;  %v5832_v57 = vadd.f32 %v5831_v63, %v5830_v19  ;;  %v5721_v45 = vpop.f32.mrb[226].mxu0  ;;  %v5833_v29 = vpop.f32.mrb[226].mxu1 }
 0x50a   : > { %v5722_v8 = vpop.f32.mrb[227].mxu0  ;;  %v5834_v13 = vpop.f32.mrb[227].mxu1 }
 0x50b   : > { %v4957_v26 = vadd.f32 %v5720_v14, %v8086_v7  ;;  %v5723_v59 = vadd.f32 %v5722_v8, %v5721_v45  ;;  %v5835_v25 = vadd.f32 %v5834_v13, %v5833_v29 }
 0x50d   : > { %v5118_v35 = vadd.f32 %v5832_v57, %v4957_v26  ;;  %v4960_v32 = vadd.f32 %v5723_v59, %v8086_v7 }
 0x50f   : > { %5196 = vst [vmem:[%s8092_s16 + $0x80] sm:$0xff] %v5118_v35  ;;  %v5121_v33 = vadd.f32 %v5835_v25, %v4960_v32  ;;  %v5724_v38 = vpop.f32.mrb[228].mxu0  ;;  %v5836_v30 = vpop.f32.mrb[228].mxu1 }
 0x510   : > { %v5725_v58 = vpop.f32.mrb[229].mxu0  ;;  %v5837_v41 = vpop.f32.mrb[229].mxu1 }
 0x511   : > { %5197 = vst [vmem:[%s8092_s16 + $0x88] sm:$0xff] %v5121_v33  ;;  %v5726_v24 = vadd.f32 %v5725_v58, %v5724_v38  ;;  %v5838_v48 = vadd.f32 %v5837_v41, %v5836_v30  ;;  %v5727_v51 = vpop.f32.mrb[230].mxu0  ;;  %v5839_v42 = vpop.f32.mrb[230].mxu1 }
 0x512   : > { %v5728_v20 = vpop.f32.mrb[231].mxu0  ;;  %v5840_v17 = vpop.f32.mrb[231].mxu1 }
 0x513   : > { %v4965_v47 = vadd.f32 %v5726_v24, %v8086_v7  ;;  %v5729_v2 = vadd.f32 %v5728_v20, %v5727_v51  ;;  %v5841_v36 = vadd.f32 %v5840_v17, %v5839_v42 }
 0x515   : > { %v5126_v34 = vadd.f32 %v5838_v48, %v4965_v47  ;;  %v4968_v43 = vadd.f32 %v5729_v2, %v8086_v7 }
 0x517   : > { %5198 = vst [vmem:[%s8092_s16 + $0x90] sm:$0xff] %v5126_v34  ;;  %v5129_v49 = vadd.f32 %v5841_v36, %v4968_v43  ;;  %v5730_v55 = vpop.f32.mrb[232].mxu0  ;;  %v5842_v54 = vpop.f32.mrb[232].mxu1 }
 0x518   : > { %v5731_v39 = vpop.f32.mrb[233].mxu0  ;;  %v5843_v18 = vpop.f32.mrb[233].mxu1 }
 0x519   : > { %5199 = vst [vmem:[%s8092_s16 + $0x98] sm:$0xff] %v5129_v49  ;;  %v5732_v31 = vadd.f32 %v5731_v39, %v5730_v55  ;;  %v5844_v60 = vadd.f32 %v5843_v18, %v5842_v54  ;;  %v5733_v4 = vpop.f32.mrb[234].mxu0  ;;  %v5845_v62 = vpop.f32.mrb[234].mxu1 }
 0x51a   : > { %v5734_v10 = vpop.f32.mrb[235].mxu0  ;;  %v5846_v6 = vpop.f32.mrb[235].mxu1 }
 0x51b   : > { %v4973_v37 = vadd.f32 %v5732_v31, %v8086_v7  ;;  %v5735_v1 = vadd.f32 %v5734_v10, %v5733_v4  ;;  %v5847_v12 = vadd.f32 %v5846_v6, %v5845_v62 }
 0x51d   : > { %v5134_v9 = vadd.f32 %v5844_v60, %v4973_v37  ;;  %v4976_v0 = vadd.f32 %v5735_v1, %v8086_v7 }
 0x51f   : > { %5200 = vst [vmem:[%s8092_s16 + $0xa0] sm:$0xff] %v5134_v9  ;;  %v5137_v23 = vadd.f32 %v5847_v12, %v4976_v0  ;;  %v5736_v27 = vpop.f32.mrb[236].mxu0  ;;  %v5848_v22 = vpop.f32.mrb[236].mxu1 }
 0x520   : > { %v5737_v40 = vpop.f32.mrb[237].mxu0  ;;  %v5849_v53 = vpop.f32.mrb[237].mxu1 }
 0x521   : > { %5201 = vst [vmem:[%s8092_s16 + $0xa8] sm:$0xff] %v5137_v23  ;;  %v5738_v16 = vadd.f32 %v5737_v40, %v5736_v27  ;;  %v5850_v61 = vadd.f32 %v5849_v53, %v5848_v22  ;;  %v5739_v15 = vpop.f32.mrb[238].mxu0  ;;  %v5851_v3 = vpop.f32.mrb[238].mxu1 }
 0x522   : > { %v5740_v50 = vpop.f32.mrb[239].mxu0  ;;  %v5852_v21 = vpop.f32.mrb[239].mxu1 }
 0x523   : > { %v4981_v46 = vadd.f32 %v5738_v16, %v8086_v7  ;;  %v5741_v52 = vadd.f32 %v5740_v50, %v5739_v15  ;;  %v5853_v5 = vadd.f32 %v5852_v21, %v5851_v3 }
 0x525   : > { %v5142_v44 = vadd.f32 %v5850_v61, %v4981_v46  ;;  %v4984_v28 = vadd.f32 %v5741_v52, %v8086_v7 }
 0x527   : > { %5202 = vst [vmem:[%s8092_s16 + $0xb0] sm:$0xff] %v5142_v44  ;;  %v5145_v11 = vadd.f32 %v5853_v5, %v4984_v28  ;;  %v5742_v19 = vpop.f32.mrb[240].mxu0  ;;  %v5854_v56 = vpop.f32.mrb[240].mxu1 }
 0x528   : > { %v5743_v63 = vpop.f32.mrb[241].mxu0  ;;  %v5855_v14 = vpop.f32.mrb[241].mxu1 }
 0x529   : > { %5203 = vst [vmem:[%s8092_s16 + $0xb8] sm:$0xff] %v5145_v11  ;;  %v5744_v57 = vadd.f32 %v5743_v63, %v5742_v19  ;;  %v5856_v45 = vadd.f32 %v5855_v14, %v5854_v56  ;;  %v5745_v29 = vpop.f32.mrb[242].mxu0  ;;  %v5857_v8 = vpop.f32.mrb[242].mxu1 }
 0x52a   : > { %v5746_v13 = vpop.f32.mrb[243].mxu0  ;;  %v5858_v26 = vpop.f32.mrb[243].mxu1 }
 0x52b   : > { %v4989_v59 = vadd.f32 %v5744_v57, %v8086_v7  ;;  %v5747_v25 = vadd.f32 %v5746_v13, %v5745_v29  ;;  %v5859_v35 = vadd.f32 %v5858_v26, %v5857_v8 }
 0x52d   : > { %v5150_v32 = vadd.f32 %v5856_v45, %v4989_v59  ;;  %v4992_v33 = vadd.f32 %v5747_v25, %v8086_v7 }
 0x52f   : > { %5204 = vst [vmem:[%s8092_s16 + $0xc0] sm:$0xff] %v5150_v32  ;;  %v5153_v38 = vadd.f32 %v5859_v35, %v4992_v33  ;;  %v5748_v30 = vpop.f32.mrb[244].mxu0  ;;  %v5860_v58 = vpop.f32.mrb[244].mxu1 }
 0x530   : > { %v5749_v41 = vpop.f32.mrb[245].mxu0  ;;  %v5861_v24 = vpop.f32.mrb[245].mxu1 }
 0x531   : > { %5205 = vst [vmem:[%s8092_s16 + $0xc8] sm:$0xff] %v5153_v38  ;;  %v5750_v48 = vadd.f32 %v5749_v41, %v5748_v30  ;;  %v5862_v51 = vadd.f32 %v5861_v24, %v5860_v58  ;;  %v5751_v42 = vpop.f32.mrb[246].mxu0  ;;  %v5863_v20 = vpop.f32.mrb[246].mxu1 }
 0x532   : > { %v5752_v17 = vpop.f32.mrb[247].mxu0  ;;  %v5864_v47 = vpop.f32.mrb[247].mxu1 }
 0x533   : > { %v4997_v2 = vadd.f32 %v5750_v48, %v8086_v7  ;;  %v5753_v36 = vadd.f32 %v5752_v17, %v5751_v42  ;;  %v5865_v34 = vadd.f32 %v5864_v47, %v5863_v20 }
 0x535   : > { %v5158_v43 = vadd.f32 %v5862_v51, %v4997_v2  ;;  %v5000_v49 = vadd.f32 %v5753_v36, %v8086_v7 }
 0x537   : > { %5206 = vst [vmem:[%s8092_s16 + $0xd0] sm:$0xff] %v5158_v43  ;;  %v5161_v55 = vadd.f32 %v5865_v34, %v5000_v49  ;;  %v5754_v54 = vpop.f32.mrb[248].mxu0  ;;  %v5866_v39 = vpop.f32.mrb[248].mxu1 }
 0x538   : > { %v5755_v18 = vpop.f32.mrb[249].mxu0  ;;  %v5867_v31 = vpop.f32.mrb[249].mxu1 }
 0x539   : > { %5207 = vst [vmem:[%s8092_s16 + $0xd8] sm:$0xff] %v5161_v55  ;;  %v5756_v60 = vadd.f32 %v5755_v18, %v5754_v54  ;;  %v5868_v4 = vadd.f32 %v5867_v31, %v5866_v39  ;;  %v5757_v62 = vpop.f32.mrb[250].mxu0  ;;  %v5869_v10 = vpop.f32.mrb[250].mxu1 }
 0x53a   : > { %v5758_v6 = vpop.f32.mrb[251].mxu0  ;;  %v5870_v37 = vpop.f32.mrb[251].mxu1 }
 0x53b   : > { %v5005_v1 = vadd.f32 %v5756_v60, %v8086_v7  ;;  %v5759_v12 = vadd.f32 %v5758_v6, %v5757_v62  ;;  %v5871_v9 = vadd.f32 %v5870_v37, %v5869_v10 }
 0x53d   : > { %v5166_v0 = vadd.f32 %v5868_v4, %v5005_v1  ;;  %v5008_v23 = vadd.f32 %v5759_v12, %v8086_v7 }
 0x53f   : > { %5208 = vst [vmem:[%s8092_s16 + $0xe0] sm:$0xff] %v5166_v0  ;;  %v5169_v27 = vadd.f32 %v5871_v9, %v5008_v23  ;;  %v5760_v22 = vpop.f32.mrb[252].mxu0  ;;  %v5872_v40 = vpop.f32.mrb[252].mxu1 }
 0x540   : > { %v5761_v53 = vpop.f32.mrb[253].mxu0  ;;  %v5873_v16 = vpop.f32.mrb[253].mxu1 }
 0x541   : > { %5209 = vst [vmem:[%s8092_s16 + $0xe8] sm:$0xff] %v5169_v27  ;;  %v5762_v61 = vadd.f32 %v5761_v53, %v5760_v22  ;;  %v5874_v15 = vadd.f32 %v5873_v16, %v5872_v40  ;;  %v5763_v3 = vpop.f32.mrb[254].mxu0  ;;  %v5875_v50 = vpop.f32.mrb[254].mxu1 }
 0x542   : > { %v5764_v21 = vpop.f32.mrb[255].mxu0  ;;  %v5876_v46 = vpop.f32.mrb[255].mxu1 }
 0x543   : > { %v5013_v52 = vadd.f32 %v5762_v61, %v8086_v7  ;;  %v5765_v5 = vadd.f32 %v5764_v21, %v5763_v3  ;;  %v5877_v44 = vadd.f32 %v5876_v46, %v5875_v50 }
 0x545   : > { %v5174_v28 = vadd.f32 %v5874_v15, %v5013_v52  ;;  %v5016_v11 = vadd.f32 %v5765_v5, %v8086_v7 }
 0x547   : > { %5210 = vst [vmem:[%s8092_s16 + $0xf0] sm:$0xff] %v5174_v28  ;;  %v5177_v19 = vadd.f32 %v5877_v44, %v5016_v11 }
 0x549   : > { %5211 = vst [vmem:[%s8092_s16 + $0xf8] sm:$0xff] %v5177_v19 }
 0x54a   : > { %6944 = shalt.err (!%p6941_p11)
}
 0x54b   : > { %s6945_s26 = scalar_lea.hbm %s8159_s11, 4096  ;;  %s6949_s29 = scalar_lea.hbm %s8217_s9, 8192 }
 0x54c   : > { %p6946_p13 = scmp.ne.s32.totalorder %s8159_s11, %s6945_s26  ;;  %p6950_p6 = scmp.lt.u32.totalorder %s8159_s11, %s8217_s9 }
 0x54d   : > { %p6951_p9 = scmp.lt.u32.totalorder %s6949_s29, %s6945_s26  ;;  %p6953_p10 = scmp.lt.u32.totalorder %s6945_s26, %s8159_s11 }
 0x54e   : > { %p6947_p5 = pnand %p6946_p13, %p8236_p1 }
 0x54f   : > { %p6952_p12 = por %p6951_p9, %p6950_p6 }
 0x550   : > { %p6948_p0 = pneg %p6947_p5 }
 0x551   : > { %p6954_p2 = por %p6953_p10, %p6952_p12 }
 0x553   : > { %p6955_p3 = pnand %p6954_p2, %p6948_p0 }
 0x555   : > { %6958 = shalt.err (!%p6955_p3)
}
 0x556   : > { %s7009_s17 = smov 128   ;;  %s7010_s25 = smov 8  }
 0x557   : > { %6398 = dma.vmem_to_hbm [thread:$0]  (%p8236_p1), %s8161_s22, 4096, %s8159_s11, %s8167_s15, %s7009_s17, %s7009_s17, %s7010_s25  }
 0x558 PF: > { %p6415_p4 = scmp.ge.s32.totalorder %s7001_s12, 2  ;;  %s5241_s23 = sand.u32 1, %s6989_s30  }
 0x559   : > { %p8237_p7 = scmp.ne.s32.totalorder %s8228_s20, 0  ;;  %s5242_s13 = scalar_lea.sflag [#allocation4], %s5241_s23 }
 0x55b   : > { %p6408_p8 = pnand %p6415_p4, %p8237_p7 }
 0x55d   : > { %6984 = dma.done.wait (!%p6408_p8), %s5242_s13, 4096  }
 0x55e   : > { %6986 = vsyncadd (!%p6408_p8), %s5242_s13, 4294963200  ;;  %s8238_s12 = sld [smem:[#allocation12_spill]]  ;;  %s8239_s18 = sld [smem:[#allocation11_spill]] }
 0x55f   : > { %s8240_s11 = sld [smem:[#allocation13_spill]]  ;;  %s8241_s30 = smov %s6993_s10 }
 0x564   : > { %p21_p11 = scmp.ge.s32.totalorder %s8238_s12, 4   ;;  %s8242_s10 = smov %s8239_s18 }
 0x566   :  { %23 = sbr.rel (!%p21_p11) target bundleno = 5 (0x5), region = 100 }
 0x56d   :  { %5247 = vsyncpa [#allocation3], 1 }
 0x56e   :  { %5249 = vsyncpa [#allocation3 + $0x1], 1 }
 0x56f   :  { %5250 = vsyncpa [#allocation6], 1 }
 0x570   :  { %5251 = vsyncpa [#allocation4], 1 }
 0x571   :  { %5253 = vsyncpa [#allocation4 + $0x1], 1 }

</bundles_post_ra>
